<compile_context>
chip_gen: v6e
topology: v6e:2x2x1
jax: 0.10.0
libtpu: 0.0.40
codegen_flags: <defaults>
</compile_context>

<pallas_src>
import functools

import jax
import jax.numpy as jnp
from jax import lax
from jax.experimental import pallas as pl
from jax.experimental.pallas import tpu as pltpu

_LANE = 128


def _compute_vmem_limit():
    """Generation-aware VMEM request (big blocks on v5e/v6e, headroom on v7x)."""
    try:
        cap = int(pltpu.get_tpu_info().vmem_capacity_bytes)
    except Exception:
        cap = 64 * 1024 * 1024
    if cap >= 96 * 1024 * 1024:          # v5e / v6e: 128 MiB physical
        return 100 * 1024 * 1024
    return int(cap * 0.6)                # v7x: 64 MiB physical


_VMEM_LIMIT = _compute_vmem_limit()


# ----------------------------------------------------------------------------
# Small host-side helpers (layout plumbing only -- single cheap passes)
# ----------------------------------------------------------------------------
def _round_up(n, m):
    return ((n + m - 1) // m) * m


def _ctile_out(cp):
    """Lane/MXU friendly Cout tile dividing the padded width."""
    return 256 if cp % 256 == 0 else _LANE


def _row_tile(h, w, c, budget=4 * 1024 * 1024):
    """Largest divisor of h whose (rows, w, c) f32 tile fits the budget."""
    per_row = max(w * c * 4, 1)
    t = max(1, min(h, budget // per_row))
    while h % t != 0:
        t -= 1
    return t


def _pad_last(x, cp):
    c = x.shape[-1]
    if c == cp:
        return x
    return jnp.pad(x, [(0, 0)] * (x.ndim - 1) + [(0, cp - c)])


def _pad_vec(v, cp):
    return jnp.pad(v.astype(jnp.float32), (0, cp - v.shape[0]))[None, :]


def _space_to_depth(x, s, pad):
    """(B,H,W,C) -> (B, s*s, Hq, Wq, C).

    Phase-decomposes the zero spatially-padded input so every stride-s conv
    tap becomes an UN-strided shifted window of one phase plane.  One pass,
    same bytes as the input -- this replaces any im2col materialisation.
    """
    B, H, W, C = x.shape
    Hp, Wp = H + 2 * pad, W + 2 * pad
    Hq, Wq = -(-Hp // s), -(-Wp // s)
    xp = jnp.pad(x, ((0, 0),
                     (pad, Hq * s - Hp + pad),
                     (pad, Wq * s - Wp + pad),
                     (0, 0)))
    x6 = xp.reshape(B, Hq, s, Wq, s, C)
    return x6.transpose(0, 2, 4, 1, 3, 5).reshape(B, s * s, Hq, Wq, C)


def _conv_taps(ksize, s):
    """Static (phase, dh, dw) per tap, matching the stacked-weight order."""
    return [((kh % s) * s + (kw % s), kh // s, kw // s)
            for kh in range(ksize) for kw in range(ksize)]


def _stack_3x3(w_oihw, cp_in, cp_out):
    cout, cin = w_oihw.shape[:2]
    w = jnp.transpose(w_oihw, (2, 3, 1, 0)).reshape(9, cin, cout)
    w = jnp.pad(w, ((0, 0), (0, cp_in - cin), (0, cp_out - cout)))
    return w.astype(jnp.bfloat16)


def _stack_1x1(w_oihw, cp_in, cp_out):
    cout, cin = w_oihw.shape[:2]
    w = jnp.transpose(w_oihw[:, :, 0, 0])                        # (cin, cout)
    w = jnp.pad(w, ((0, cp_in - cin), (0, cp_out - cout)))
    return w[None].astype(jnp.bfloat16)                          # (1, cin_p, cout_p)


# ----------------------------------------------------------------------------
# Kernel 1: conv1 (3x3, stride s) + folded BN1 + ReLU, with the 1x1/stride-s
#           projection shortcut (+ folded BN) fused in so the space-to-depth
#           input is read from HBM exactly once.  Full-Cin contraction, no
#           accumulator round-trip.
# ----------------------------------------------------------------------------
def _conv1_kernel(*refs, taps, sc_tap, ho, wo, has_sc):
    if has_sc:
        (x_ref, w_ref, sc_ref, bs_ref,
         wsc_ref, scsc_ref, bssc_ref, y_ref, sh_ref) = refs
    else:
        x_ref, w_ref, sc_ref, bs_ref, y_ref = refs

    acc = None
    for t, (ph, dh, dw) in enumerate(taps):
        patch = x_ref[0, ph, dh:dh + ho, dw:dw + wo, :]           # bf16 window
        patch = patch.reshape(ho * wo, patch.shape[-1])
        contrib = jnp.dot(patch, w_ref[t],
                          preferred_element_type=jnp.float32)    # MXU, f32 acc
        acc = contrib if acc is None else acc + contrib

    y = jnp.maximum(acc * sc_ref[...] + bs_ref[...], 0.0)        # f32 epilogue
    y_ref[0] = y.reshape(ho, wo, y.shape[-1]).astype(y_ref.dtype)

    if has_sc:
        ph, dh, dw = sc_tap
        patch = x_ref[0, ph, dh:dh + ho, dw:dw + wo, :]
        patch = patch.reshape(ho * wo, patch.shape[-1])
        s = jnp.dot(patch, wsc_ref[0], preferred_element_type=jnp.float32)
        s = s * scsc_ref[...] + bssc_ref[...]
        sh_ref[0] = s.reshape(ho, wo, s.shape[-1]).astype(sh_ref.dtype)


def conv1_bn_relu(xs1, w1, scale1, bias1, *, taps, ho, wo,
                  wsc=None, sc_scale=None, sc_bias=None, sc_tap=None):
    B, P, Hq, Wq, cp_in = xs1.shape
    cp_out = w1.shape[-1]
    ct_out = _ctile_out(cp_out)
    n_co = cp_out // ct_out
    has_sc = wsc is not None

    kern = functools.partial(_conv1_kernel, taps=taps, sc_tap=sc_tap,
                             ho=ho, wo=wo, has_sc=has_sc)

    x_spec = pl.BlockSpec((1, P, Hq, Wq, cp_in), lambda b, co: (b, 0, 0, 0, 0))
    w_spec = pl.BlockSpec((len(taps), cp_in, ct_out), lambda b, co: (0, 0, co))
    v_spec = pl.BlockSpec((1, ct_out), lambda b, co: (0, co))
    o_spec = pl.BlockSpec((1, ho, wo, ct_out), lambda b, co: (b, 0, 0, co))

    in_specs = [x_spec, w_spec, v_spec, v_spec]
    args = [xs1, w1, scale1, bias1]
    out_shape = jax.ShapeDtypeStruct((B, ho, wo, cp_out), jnp.bfloat16)
    out_specs = o_spec
    if has_sc:
        in_specs += [pl.BlockSpec((1, cp_in, ct_out), lambda b, co: (0, 0, co)),
                     v_spec, v_spec]
        args += [wsc, sc_scale, sc_bias]
        out_shape = (out_shape,
                     jax.ShapeDtypeStruct((B, ho, wo, cp_out), jnp.bfloat16))
        out_specs = (o_spec, o_spec)

    return pl.pallas_call(
        kern,
        out_shape=out_shape,
        grid=(B, n_co),
        in_specs=in_specs,
        out_specs=out_specs,
        compiler_params=pltpu.CompilerParams(
            dimension_semantics=("parallel", "parallel"),
            vmem_limit_bytes=_VMEM_LIMIT),
    )(*args)


# ----------------------------------------------------------------------------
# Kernel 2: conv2 (3x3, stride 1) + folded BN2, SE average pool in the
#           epilogue.  The spatial pad of y1 happens in a small VMEM scratch
#           (no extra HBM pass over the intermediate activation).
# ----------------------------------------------------------------------------
def _conv2_kernel(x_ref, w_ref, sc_ref, bs_ref, y_ref, pool_ref, xpad_ref, *,
                  ho, wo):
    # Zero-initialised padded plane in VMEM; interior = the resident y1 block.
    xpad_ref[...] = jnp.zeros_like(xpad_ref)
    xpad_ref[1:1 + ho, 1:1 + wo, :] = x_ref[0]

    acc = None
    for t in range(9):
        dh, dw = t // 3, t % 3
        patch = xpad_ref[dh:dh + ho, dw:dw + wo, :]
        patch = patch.reshape(ho * wo, patch.shape[-1])
        contrib = jnp.dot(patch, w_ref[t],
                          preferred_element_type=jnp.float32)
        acc = contrib if acc is None else acc + contrib

    y = acc * sc_ref[...] + bs_ref[...]                           # f32, no ReLU
    y_ref[0] = y.reshape(ho, wo, y.shape[-1]).astype(y_ref.dtype)
    pool_ref[0] = jnp.broadcast_to(
        jnp.mean(y, axis=0, keepdims=True), pool_ref.shape[1:])


def conv2_bn_pool(y1, w2, scale2, bias2, *, ho, wo):
    B = y1.shape[0]
    cp_in = y1.shape[-1]
    cp_out = w2.shape[-1]
    ct_out = _ctile_out(cp_out)
    n_co = cp_out // ct_out

    kern = functools.partial(_conv2_kernel, ho=ho, wo=wo)
    return pl.pallas_call(
        kern,
        out_shape=(jax.ShapeDtypeStruct((B, ho, wo, cp_out), jnp.bfloat16),
                   jax.ShapeDtypeStruct((B, 8, cp_out), jnp.float32)),
        grid=(B, n_co),
        in_specs=[
            pl.BlockSpec((1, ho, wo, cp_in), lambda b, co: (b, 0, 0, 0)),
            pl.BlockSpec((9, cp_in, ct_out), lambda b, co: (0, 0, co)),
            pl.BlockSpec((1, ct_out), lambda b, co: (0, co)),
            pl.BlockSpec((1, ct_out), lambda b, co: (0, co)),
        ],
        out_specs=(
            pl.BlockSpec((1, ho, wo, ct_out), lambda b, co: (b, 0, 0, co)),
            pl.BlockSpec((1, 8, ct_out), lambda b, co: (b, 0, co)),
        ),
        scratch_shapes=[pltpu.VMEM((ho + 2, wo + 2, cp_in), jnp.bfloat16)],
        compiler_params=pltpu.CompilerParams(
            dimension_semantics=("parallel", "parallel"),
            vmem_limit_bytes=_VMEM_LIMIT),
    )(y1, w2, scale2, bias2)


# ----------------------------------------------------------------------------
# Kernel 3: SE channel scaling + residual add + final ReLU.
#           bf16 inputs (upcast in-register), f32 math, spatially row-tiled.
# ----------------------------------------------------------------------------
def _se_residual_kernel(y_ref, s_ref, g_ref, o_ref):
    y = y_ref[...].astype(jnp.float32)
    s = s_ref[...].astype(jnp.float32)
    o_ref[...] = jnp.maximum(y * g_ref[...] + s, 0.0)


def se_scale_add_relu(y, short, gate):
    B, H, W, cp = y.shape
    ct = _ctile_out(cp)
    n_co = cp // ct
    th = _row_tile(H, W, ct)
    n_h = H // th
    return pl.pallas_call(
        _se_residual_kernel,
        out_shape=jax.ShapeDtypeStruct((B, H, W, cp), jnp.float32),
        grid=(B, n_h, n_co),
        in_specs=[
            pl.BlockSpec((1, th, W, ct), lambda b, h, co: (b, h, 0, co)),
            pl.BlockSpec((1, th, W, ct), lambda b, h, co: (b, h, 0, co)),
            pl.BlockSpec((1, 1, 1, ct), lambda b, h, co: (b, 0, 0, co)),
        ],
        out_specs=pl.BlockSpec((1, th, W, ct), lambda b, h, co: (b, h, 0, co)),
        compiler_params=pltpu.CompilerParams(
            dimension_semantics=("parallel", "parallel", "parallel"),
            vmem_limit_bytes=_VMEM_LIMIT),
    )(y, short, gate)


# ----------------------------------------------------------------------------
# Deterministic parameter construction (inference-mode BN already folded)
# ----------------------------------------------------------------------------
def make_params(key, cin, cout, reduction=16):
    ks = jax.random.split(key, 20)
    rnd = lambda k, shape, s=0.1: s * jax.random.normal(k, shape, jnp.float32)

    p = {}
    p["w_conv1"] = rnd(ks[0], (cout, cin, 3, 3))        # OIHW like PyTorch
    p["w_conv2"] = rnd(ks[1], (cout, cout, 3, 3))
    p["w_sc"] = rnd(ks[2], (cout, cin, 1, 1))

    idx = 3
    for name in ("bn1", "bn2", "bnsc"):
        gamma = 1.0 + rnd(ks[idx], (cout,)); idx += 1
        beta = rnd(ks[idx], (cout,)); idx += 1
        rmean = rnd(ks[idx], (cout,)); idx += 1
        rvar = 0.5 + jax.random.uniform(ks[idx], (cout,), jnp.float32); idx += 1
        scale = gamma / jnp.sqrt(rvar + 1e-5)
        p[f"{name}_scale"] = scale
        p[f"{name}_bias"] = beta - rmean * scale

    cr = max(cout // reduction, 1)
    p["se_w1"] = rnd(ks[idx], (cout, cr), 0.3); idx += 1   # (in, out) orientation
    p["se_w2"] = rnd(ks[idx], (cr, cout), 0.3); idx += 1
    return p


# ----------------------------------------------------------------------------
# Forward pass
# ----------------------------------------------------------------------------
def enhanced_res_block_forward(x_nchw, p, stride):
    x = jnp.transpose(x_nchw, (0, 2, 3, 1)).astype(jnp.float32)   # NHWC
    B, H, W, cin = x.shape
    cout = p["w_conv1"].shape[0]
    cp_in, cp_out = _round_up(cin, _LANE), _round_up(cout, _LANE)

    ho = (H + 2 - 3) // stride + 1
    wo = (W + 2 - 3) // stride + 1

    # One cheap restructuring pass; activations stored bf16 in HBM.
    x_b = _pad_last(x, cp_in).astype(jnp.bfloat16)
    xs1 = _space_to_depth(x_b, stride, pad=1)

    w1 = _stack_3x3(p["w_conv1"], cp_in, cp_out)
    sc1 = _pad_vec(p["bn1_scale"], cp_out)
    bs1 = _pad_vec(p["bn1_bias"], cp_out)
    taps1 = _conv_taps(3, stride)

    has_proj = (stride != 1) or (cin != cout)
    if has_proj:
        # x[s*oh, s*ow] == x_pad(pad=1)[s*oh+1, s*ow+1]: a single space-to-depth
        # tap, so the strided 1x1 shortcut rides on conv1's resident block.
        sc_tap = ((1 % stride) * stride + (1 % stride), 1 // stride, 1 // stride)
        y1, short = conv1_bn_relu(
            xs1, w1, sc1, bs1, taps=taps1, ho=ho, wo=wo,
            wsc=_stack_1x1(p["w_sc"], cp_in, cp_out),
            sc_scale=_pad_vec(p["bnsc_scale"], cp_out),
            sc_bias=_pad_vec(p["bnsc_bias"], cp_out),
            sc_tap=sc_tap)
    else:
        y1 = conv1_bn_relu(xs1, w1, sc1, bs1, taps=taps1, ho=ho, wo=wo)
        short = _pad_last(x, cp_out).astype(jnp.bfloat16)

    # conv2 + BN2; epilogue also emits the SE average pool (no extra pass).
    y2, pool8 = conv2_bn_pool(
        y1, _stack_3x3(p["w_conv2"], cp_out, cp_out),
        _pad_vec(p["bn2_scale"], cp_out), _pad_vec(p["bn2_bias"], cp_out),
        ho=ho, wo=wo)

    # SE gate: tiny (B,C) MLP kept in plain JAX (sub-(8,128) in every dim).
    pooled = pool8[:, 0, :cout]                                    # (B, cout) f32
    h = jnp.maximum(jnp.dot(pooled, p["se_w1"],
                            precision=lax.Precision.HIGHEST), 0.0)
    gate = jax.nn.sigmoid(jnp.dot(h, p["se_w2"],
                                  precision=lax.Precision.HIGHEST))
    gate = _pad_last(gate, cp_out).reshape(B, 1, 1, cp_out)

    out = se_scale_add_relu(y2, short, gate)
    return jnp.transpose(out[:, :, :, :cout], (0, 3, 1, 2))        # NCHW


# ----------------------------------------------------------------------------
# Pure-JAX reference (for numerical verification)
# ----------------------------------------------------------------------------
def ref_forward(x_nchw, p, stride):
    x = jnp.transpose(x_nchw, (0, 2, 3, 1)).astype(jnp.float32)

    def conv(inp, w_oihw, strd, pad):
        w = jnp.transpose(w_oihw, (2, 3, 1, 0))
        return lax.conv_general_dilated(
            inp, w, (strd, strd), [(pad, pad), (pad, pad)],
            dimension_numbers=("NHWC", "HWIO", "NHWC"),
            precision=lax.Precision.HIGHEST)

    y = jnp.maximum(conv(x, p["w_conv1"], stride, 1) * p["bn1_scale"]
                    + p["bn1_bias"], 0.0)
    y = conv(y, p["w_conv2"], 1, 1) * p["bn2_scale"] + p["bn2_bias"]
    pooled = jnp.mean(y, axis=(1, 2))
    a = jax.nn.sigmoid(jnp.maximum(pooled @ p["se_w1"], 0.0) @ p["se_w2"])
    y = y * a[:, None, None, :]
    if stride != 1 or x.shape[-1] != p["w_conv1"].shape[0]:
        s = conv(x, p["w_sc"], stride, 0) * p["bnsc_scale"] + p["bnsc_bias"]
    else:
        s = x
    out = jnp.maximum(y + s, 0.0)
    return jnp.transpose(out, (0, 3, 1, 2))


if __name__ == "__main__":
    key = jax.random.PRNGKey(0)
    k1, k2, k3, k4 = jax.random.split(key, 4)

    fwd = jax.jit(enhanced_res_block_forward, static_argnums=(2,))
    rfwd = jax.jit(ref_forward, static_argnums=(2,))

    # Config A: stride-2, channel-expanding block (projection shortcut path).
    B, Cin, H, W, Cout, stride = 2, 16, 16, 16, 32, 2
    x = jax.random.normal(k1, (B, Cin, H, W), jnp.float32)   # NCHW like PyTorch
    params = make_params(k2, Cin, Cout)
    out = jax.block_until_ready(fwd(x, params, stride))
    ref = jax.block_until_ready(rfwd(x, params, stride))
    assert out.shape == (B, Cout, H // stride, W // stride), out.shape
    assert jnp.all(jnp.isfinite(out))
    assert jnp.allclose(out, ref, atol=5e-2, rtol=5e-2), (
        float(jnp.max(jnp.abs(out - ref))))

    # Config B: stride-1, identity-shortcut block.
    x2 = jax.random.normal(k3, (2, 32, H, W), jnp.float32)
    params2 = make_params(k4, 32, 32)
    out2 = jax.block_until_ready(fwd(x2, params2, 1))
    ref2 = jax.block_until_ready(rfwd(x2, params2, 1))
    assert out2.shape == (2, 32, H, W), out2.shape
    assert jnp.all(jnp.isfinite(out2))
    assert jnp.allclose(out2, ref2, atol=5e-2, rtol=5e-2), (
        float(jnp.max(jnp.abs(out2 - ref2))))

    print("KERNEL_OK")
</pallas_src>

<mosaic_0001>
module attributes {stable_mosaic.version = 11 : i64} {
  func.func @_conv1_kernel(%arg0: i32, %arg1: i32, %arg2: memref<1x4x9x9x128xbf16, #tpu.memory_space<vmem>>, %arg3: memref<9x128x128xbf16, #tpu.memory_space<vmem>>, %arg4: memref<1x128xf32, #tpu.memory_space<vmem>>, %arg5: memref<1x128xf32, #tpu.memory_space<vmem>>, %arg6: memref<1x128x128xbf16, #tpu.memory_space<vmem>>, %arg7: memref<1x128xf32, #tpu.memory_space<vmem>>, %arg8: memref<1x128xf32, #tpu.memory_space<vmem>>, %arg9: memref<1x8x8x128xbf16, #tpu.memory_space<vmem>>, %arg10: memref<1x8x8x128xbf16, #tpu.memory_space<vmem>>) attributes {dimension_semantics = [#tpu.dimension_semantics<parallel>, #tpu.dimension_semantics<parallel>], iteration_bounds = array<i64: 2, 1>, scalar_prefetch = 0 : i64, scratch_operands = 0 : i64, tpu.core_type = #tpu.core_type<tc>, window_params = [{transform_indices = @transform_0, window_bounds = array<i64: 1, 4, 9, 9, 128>}, {transform_indices = @transform_1, window_bounds = array<i64: 9, 128, 128>}, {transform_indices = @transform_2, window_bounds = array<i64: 1, 128>}, {transform_indices = @transform_3, window_bounds = array<i64: 1, 128>}, {transform_indices = @transform_4, window_bounds = array<i64: 1, 128, 128>}, {transform_indices = @transform_5, window_bounds = array<i64: 1, 128>}, {transform_indices = @transform_6, window_bounds = array<i64: 1, 128>}, {transform_indices = @transform_7, window_bounds = array<i64: 1, 8, 8, 128>}, {transform_indices = @transform_8, window_bounds = array<i64: 1, 8, 8, 128>}]} {
    %c0 = arith.constant 0 : index
    %c0_0 = arith.constant 0 : index
    %c0_1 = arith.constant 0 : index
    %c0_2 = arith.constant 0 : index
    %c0_3 = arith.constant 0 : index
    %0 = vector.load %arg2[%c0, %c0_0, %c0_1, %c0_2, %c0_3] : memref<1x4x9x9x128xbf16, #tpu.memory_space<vmem>>, vector<1x1x8x8x128xbf16>
    %1 = vector.shape_cast %0 : vector<1x1x8x8x128xbf16> to vector<8x8x128xbf16>
    %2 = vector.shape_cast %1 : vector<8x8x128xbf16> to vector<64x128xbf16>
    %c0_4 = arith.constant 0 : index
    %c0_5 = arith.constant 0 : index
    %c0_6 = arith.constant 0 : index
    %3 = vector.load %arg3[%c0_4, %c0_5, %c0_6] : memref<9x128x128xbf16, #tpu.memory_space<vmem>>, vector<1x128x128xbf16>
    %4 = vector.shape_cast %3 : vector<1x128x128xbf16> to vector<128x128xbf16>
    %cst = arith.constant dense<0.000000e+00> : vector<64x128xf32>
    %5 = tpu.matmul %2, %4, %cst {dimension_numbers = #tpu.dot_dimension_numbers<[1], [0], [0], [1], [0, 0, 1, 1], [], []>} : vector<64x128xbf16>, vector<128x128xbf16>, vector<64x128xf32> -> vector<64x128xf32>
    %c0_7 = arith.constant 0 : index
    %c1 = arith.constant 1 : index
    %c0_8 = arith.constant 0 : index
    %c0_9 = arith.constant 0 : index
    %c0_10 = arith.constant 0 : index
    %6 = vector.load %arg2[%c0_7, %c1, %c0_8, %c0_9, %c0_10] : memref<1x4x9x9x128xbf16, #tpu.memory_space<vmem>>, vector<1x1x8x8x128xbf16>
    %7 = vector.shape_cast %6 : vector<1x1x8x8x128xbf16> to vector<8x8x128xbf16>
    %8 = vector.shape_cast %7 : vector<8x8x128xbf16> to vector<64x128xbf16>
    %c1_11 = arith.constant 1 : index
    %c0_12 = arith.constant 0 : index
    %c0_13 = arith.constant 0 : index
    %9 = vector.load %arg3[%c1_11, %c0_12, %c0_13] : memref<9x128x128xbf16, #tpu.memory_space<vmem>>, vector<1x128x128xbf16>
    %10 = vector.shape_cast %9 : vector<1x128x128xbf16> to vector<128x128xbf16>
    %cst_14 = arith.constant dense<0.000000e+00> : vector<64x128xf32>
    %11 = tpu.matmul %8, %10, %cst_14 {dimension_numbers = #tpu.dot_dimension_numbers<[1], [0], [0], [1], [0, 0, 1, 1], [], []>} : vector<64x128xbf16>, vector<128x128xbf16>, vector<64x128xf32> -> vector<64x128xf32>
    %12 = arith.addf %5, %11 : vector<64x128xf32>
    %c0_15 = arith.constant 0 : index
    %c0_16 = arith.constant 0 : index
    %c0_17 = arith.constant 0 : index
    %c1_18 = arith.constant 1 : index
    %c0_19 = arith.constant 0 : index
    %13 = vector.load %arg2[%c0_15, %c0_16, %c0_17, %c1_18, %c0_19] : memref<1x4x9x9x128xbf16, #tpu.memory_space<vmem>>, vector<1x1x8x8x128xbf16>
    %14 = vector.shape_cast %13 : vector<1x1x8x8x128xbf16> to vector<8x8x128xbf16>
    %15 = vector.shape_cast %14 : vector<8x8x128xbf16> to vector<64x128xbf16>
    %c2 = arith.constant 2 : index
    %c0_20 = arith.constant 0 : index
    %c0_21 = arith.constant 0 : index
    %16 = vector.load %arg3[%c2, %c0_20, %c0_21] : memref<9x128x128xbf16, #tpu.memory_space<vmem>>, vector<1x128x128xbf16>
    %17 = vector.shape_cast %16 : vector<1x128x128xbf16> to vector<128x128xbf16>
    %cst_22 = arith.constant dense<0.000000e+00> : vector<64x128xf32>
    %18 = tpu.matmul %15, %17, %cst_22 {dimension_numbers = #tpu.dot_dimension_numbers<[1], [0], [0], [1], [0, 0, 1, 1], [], []>} : vector<64x128xbf16>, vector<128x128xbf16>, vector<64x128xf32> -> vector<64x128xf32>
    %19 = arith.addf %12, %18 : vector<64x128xf32>
    %c0_23 = arith.constant 0 : index
    %c2_24 = arith.constant 2 : index
    %c0_25 = arith.constant 0 : index
    %c0_26 = arith.constant 0 : index
    %c0_27 = arith.constant 0 : index
    %20 = vector.load %arg2[%c0_23, %c2_24, %c0_25, %c0_26, %c0_27] : memref<1x4x9x9x128xbf16, #tpu.memory_space<vmem>>, vector<1x1x8x8x128xbf16>
    %21 = vector.shape_cast %20 : vector<1x1x8x8x128xbf16> to vector<8x8x128xbf16>
    %22 = vector.shape_cast %21 : vector<8x8x128xbf16> to vector<64x128xbf16>
    %c3 = arith.constant 3 : index
    %c0_28 = arith.constant 0 : index
    %c0_29 = arith.constant 0 : index
    %23 = vector.load %arg3[%c3, %c0_28, %c0_29] : memref<9x128x128xbf16, #tpu.memory_space<vmem>>, vector<1x128x128xbf16>
    %24 = vector.shape_cast %23 : vector<1x128x128xbf16> to vector<128x128xbf16>
    %cst_30 = arith.constant dense<0.000000e+00> : vector<64x128xf32>
    %25 = tpu.matmul %22, %24, %cst_30 {dimension_numbers = #tpu.dot_dimension_numbers<[1], [0], [0], [1], [0, 0, 1, 1], [], []>} : vector<64x128xbf16>, vector<128x128xbf16>, vector<64x128xf32> -> vector<64x128xf32>
    %26 = arith.addf %19, %25 : vector<64x128xf32>
    %c0_31 = arith.constant 0 : index
    %c3_32 = arith.constant 3 : index
    %c0_33 = arith.constant 0 : index
    %c0_34 = arith.constant 0 : index
    %c0_35 = arith.constant 0 : index
    %27 = vector.load %arg2[%c0_31, %c3_32, %c0_33, %c0_34, %c0_35] : memref<1x4x9x9x128xbf16, #tpu.memory_space<vmem>>, vector<1x1x8x8x128xbf16>
    %28 = vector.shape_cast %27 : vector<1x1x8x8x128xbf16> to vector<8x8x128xbf16>
    %29 = vector.shape_cast %28 : vector<8x8x128xbf16> to vector<64x128xbf16>
    %c4 = arith.constant 4 : index
    %c0_36 = arith.constant 0 : index
    %c0_37 = arith.constant 0 : index
    %30 = vector.load %arg3[%c4, %c0_36, %c0_37] : memref<9x128x128xbf16, #tpu.memory_space<vmem>>, vector<1x128x128xbf16>
    %31 = vector.shape_cast %30 : vector<1x128x128xbf16> to vector<128x128xbf16>
    %cst_38 = arith.constant dense<0.000000e+00> : vector<64x128xf32>
    %32 = tpu.matmul %29, %31, %cst_38 {dimension_numbers = #tpu.dot_dimension_numbers<[1], [0], [0], [1], [0, 0, 1, 1], [], []>} : vector<64x128xbf16>, vector<128x128xbf16>, vector<64x128xf32> -> vector<64x128xf32>
    %33 = arith.addf %26, %32 : vector<64x128xf32>
    %c0_39 = arith.constant 0 : index
    %c2_40 = arith.constant 2 : index
    %c0_41 = arith.constant 0 : index
    %c1_42 = arith.constant 1 : index
    %c0_43 = arith.constant 0 : index
    %34 = vector.load %arg2[%c0_39, %c2_40, %c0_41, %c1_42, %c0_43] : memref<1x4x9x9x128xbf16, #tpu.memory_space<vmem>>, vector<1x1x8x8x128xbf16>
    %35 = vector.shape_cast %34 : vector<1x1x8x8x128xbf16> to vector<8x8x128xbf16>
    %36 = vector.shape_cast %35 : vector<8x8x128xbf16> to vector<64x128xbf16>
    %c5 = arith.constant 5 : index
    %c0_44 = arith.constant 0 : index
    %c0_45 = arith.constant 0 : index
    %37 = vector.load %arg3[%c5, %c0_44, %c0_45] : memref<9x128x128xbf16, #tpu.memory_space<vmem>>, vector<1x128x128xbf16>
    %38 = vector.shape_cast %37 : vector<1x128x128xbf16> to vector<128x128xbf16>
    %cst_46 = arith.constant dense<0.000000e+00> : vector<64x128xf32>
    %39 = tpu.matmul %36, %38, %cst_46 {dimension_numbers = #tpu.dot_dimension_numbers<[1], [0], [0], [1], [0, 0, 1, 1], [], []>} : vector<64x128xbf16>, vector<128x128xbf16>, vector<64x128xf32> -> vector<64x128xf32>
    %40 = arith.addf %33, %39 : vector<64x128xf32>
    %c0_47 = arith.constant 0 : index
    %c0_48 = arith.constant 0 : index
    %c1_49 = arith.constant 1 : index
    %c0_50 = arith.constant 0 : index
    %c0_51 = arith.constant 0 : index
    %41 = vector.load %arg2[%c0_47, %c0_48, %c1_49, %c0_50, %c0_51] : memref<1x4x9x9x128xbf16, #tpu.memory_space<vmem>>, vector<1x1x8x8x128xbf16>
    %42 = vector.shape_cast %41 : vector<1x1x8x8x128xbf16> to vector<8x8x128xbf16>
    %43 = vector.shape_cast %42 : vector<8x8x128xbf16> to vector<64x128xbf16>
    %c6 = arith.constant 6 : index
    %c0_52 = arith.constant 0 : index
    %c0_53 = arith.constant 0 : index
    %44 = vector.load %arg3[%c6, %c0_52, %c0_53] : memref<9x128x128xbf16, #tpu.memory_space<vmem>>, vector<1x128x128xbf16>
    %45 = vector.shape_cast %44 : vector<1x128x128xbf16> to vector<128x128xbf16>
    %cst_54 = arith.constant dense<0.000000e+00> : vector<64x128xf32>
    %46 = tpu.matmul %43, %45, %cst_54 {dimension_numbers = #tpu.dot_dimension_numbers<[1], [0], [0], [1], [0, 0, 1, 1], [], []>} : vector<64x128xbf16>, vector<128x128xbf16>, vector<64x128xf32> -> vector<64x128xf32>
    %47 = arith.addf %40, %46 : vector<64x128xf32>
    %c0_55 = arith.constant 0 : index
    %c1_56 = arith.constant 1 : index
    %c1_57 = arith.constant 1 : index
    %c0_58 = arith.constant 0 : index
    %c0_59 = arith.constant 0 : index
    %48 = vector.load %arg2[%c0_55, %c1_56, %c1_57, %c0_58, %c0_59] : memref<1x4x9x9x128xbf16, #tpu.memory_space<vmem>>, vector<1x1x8x8x128xbf16>
    %49 = vector.shape_cast %48 : vector<1x1x8x8x128xbf16> to vector<8x8x128xbf16>
    %50 = vector.shape_cast %49 : vector<8x8x128xbf16> to vector<64x128xbf16>
    %c7 = arith.constant 7 : index
    %c0_60 = arith.constant 0 : index
    %c0_61 = arith.constant 0 : index
    %51 = vector.load %arg3[%c7, %c0_60, %c0_61] : memref<9x128x128xbf16, #tpu.memory_space<vmem>>, vector<1x128x128xbf16>
    %52 = vector.shape_cast %51 : vector<1x128x128xbf16> to vector<128x128xbf16>
    %cst_62 = arith.constant dense<0.000000e+00> : vector<64x128xf32>
    %53 = tpu.matmul %50, %52, %cst_62 {dimension_numbers = #tpu.dot_dimension_numbers<[1], [0], [0], [1], [0, 0, 1, 1], [], []>} : vector<64x128xbf16>, vector<128x128xbf16>, vector<64x128xf32> -> vector<64x128xf32>
    %54 = arith.addf %47, %53 : vector<64x128xf32>
    %c0_63 = arith.constant 0 : index
    %c0_64 = arith.constant 0 : index
    %c1_65 = arith.constant 1 : index
    %c1_66 = arith.constant 1 : index
    %c0_67 = arith.constant 0 : index
    %55 = vector.load %arg2[%c0_63, %c0_64, %c1_65, %c1_66, %c0_67] : memref<1x4x9x9x128xbf16, #tpu.memory_space<vmem>>, vector<1x1x8x8x128xbf16>
    %56 = vector.shape_cast %55 : vector<1x1x8x8x128xbf16> to vector<8x8x128xbf16>
    %57 = vector.shape_cast %56 : vector<8x8x128xbf16> to vector<64x128xbf16>
    %c8 = arith.constant 8 : index
    %c0_68 = arith.constant 0 : index
    %c0_69 = arith.constant 0 : index
    %58 = vector.load %arg3[%c8, %c0_68, %c0_69] : memref<9x128x128xbf16, #tpu.memory_space<vmem>>, vector<1x128x128xbf16>
    %59 = vector.shape_cast %58 : vector<1x128x128xbf16> to vector<128x128xbf16>
    %cst_70 = arith.constant dense<0.000000e+00> : vector<64x128xf32>
    %60 = tpu.matmul %57, %59, %cst_70 {dimension_numbers = #tpu.dot_dimension_numbers<[1], [0], [0], [1], [0, 0, 1, 1], [], []>} : vector<64x128xbf16>, vector<128x128xbf16>, vector<64x128xf32> -> vector<64x128xf32>
    %61 = arith.addf %54, %60 : vector<64x128xf32>
    %c0_71 = arith.constant 0 : index
    %c0_72 = arith.constant 0 : index
    %62 = vector.load %arg4[%c0_71, %c0_72] : memref<1x128xf32, #tpu.memory_space<vmem>>, vector<1x128xf32>
    %63 = vector.broadcast %62 : vector<1x128xf32> to vector<64x128xf32>
    %64 = arith.mulf %61, %63 : vector<64x128xf32>
    %c0_73 = arith.constant 0 : index
    %c0_74 = arith.constant 0 : index
    %65 = vector.load %arg5[%c0_73, %c0_74] : memref<1x128xf32, #tpu.memory_space<vmem>>, vector<1x128xf32>
    %66 = vector.broadcast %65 : vector<1x128xf32> to vector<64x128xf32>
    %67 = arith.addf %64, %66 : vector<64x128xf32>
    %cst_75 = arith.constant 0.000000e+00 : f32
    %68 = vector.broadcast %cst_75 : f32 to vector<64x128xf32>
    %69 = arith.maximumf %67, %68 : vector<64x128xf32>
    %70 = vector.shape_cast %69 : vector<64x128xf32> to vector<8x8x128xf32>
    %71 = arith.truncf %70 : vector<8x8x128xf32> to vector<8x8x128xbf16>
    %c0_76 = arith.constant 0 : index
    %c0_77 = arith.constant 0 : index
    %c0_78 = arith.constant 0 : index
    %c0_79 = arith.constant 0 : index
    %72 = vector.load %arg9[%c0_76, %c0_77, %c0_78, %c0_79] : memref<1x8x8x128xbf16, #tpu.memory_space<vmem>>, vector<1x8x8x128xbf16>
    %73 = vector.shape_cast %72 : vector<1x8x8x128xbf16> to vector<8x8x128xbf16>
    %74 = vector.shape_cast %71 : vector<8x8x128xbf16> to vector<1x8x8x128xbf16>
    tpu.vector_store %arg9[%c0_76, %c0_77, %c0_78, %c0_79], %74 {strides = array<i32>} : memref<1x8x8x128xbf16, #tpu.memory_space<vmem>>, vector<1x8x8x128xbf16>,
    %c0_80 = arith.constant 0 : index
    %c3_81 = arith.constant 3 : index
    %c0_82 = arith.constant 0 : index
    %c0_83 = arith.constant 0 : index
    %c0_84 = arith.constant 0 : index
    %75 = vector.load %arg2[%c0_80, %c3_81, %c0_82, %c0_83, %c0_84] : memref<1x4x9x9x128xbf16, #tpu.memory_space<vmem>>, vector<1x1x8x8x128xbf16>
    %76 = vector.shape_cast %75 : vector<1x1x8x8x128xbf16> to vector<8x8x128xbf16>
    %77 = vector.shape_cast %76 : vector<8x8x128xbf16> to vector<64x128xbf16>
    %c0_85 = arith.constant 0 : index
    %c0_86 = arith.constant 0 : index
    %c0_87 = arith.constant 0 : index
    %78 = vector.load %arg6[%c0_85, %c0_86, %c0_87] : memref<1x128x128xbf16, #tpu.memory_space<vmem>>, vector<1x128x128xbf16>
    %79 = vector.shape_cast %78 : vector<1x128x128xbf16> to vector<128x128xbf16>
    %cst_88 = arith.constant dense<0.000000e+00> : vector<64x128xf32>
    %80 = tpu.matmul %77, %79, %cst_88 {dimension_numbers = #tpu.dot_dimension_numbers<[1], [0], [0], [1], [0, 0, 1, 1], [], []>} : vector<64x128xbf16>, vector<128x128xbf16>, vector<64x128xf32> -> vector<64x128xf32>
    %c0_89 = arith.constant 0 : index
    %c0_90 = arith.constant 0 : index
    %81 = vector.load %arg7[%c0_89, %c0_90] : memref<1x128xf32, #tpu.memory_space<vmem>>, vector<1x128xf32>
    %82 = vector.broadcast %81 : vector<1x128xf32> to vector<64x128xf32>
    %83 = arith.mulf %80, %82 : vector<64x128xf32>
    %c0_91 = arith.constant 0 : index
    %c0_92 = arith.constant 0 : index
    %84 = vector.load %arg8[%c0_91, %c0_92] : memref<1x128xf32, #tpu.memory_space<vmem>>, vector<1x128xf32>
    %85 = vector.broadcast %84 : vector<1x128xf32> to vector<64x128xf32>
    %86 = arith.addf %83, %85 : vector<64x128xf32>
    %87 = vector.shape_cast %86 : vector<64x128xf32> to vector<8x8x128xf32>
    %88 = arith.truncf %87 : vector<8x8x128xf32> to vector<8x8x128xbf16>
    %c0_93 = arith.constant 0 : index
    %c0_94 = arith.constant 0 : index
    %c0_95 = arith.constant 0 : index
    %c0_96 = arith.constant 0 : index
    %89 = vector.load %arg10[%c0_93, %c0_94, %c0_95, %c0_96] : memref<1x8x8x128xbf16, #tpu.memory_space<vmem>>, vector<1x8x8x128xbf16>
    %90 = vector.shape_cast %89 : vector<1x8x8x128xbf16> to vector<8x8x128xbf16>
    %91 = vector.shape_cast %88 : vector<8x8x128xbf16> to vector<1x8x8x128xbf16>
    tpu.vector_store %arg10[%c0_93, %c0_94, %c0_95, %c0_96], %91 {strides = array<i32>} : memref<1x8x8x128xbf16, #tpu.memory_space<vmem>>, vector<1x8x8x128xbf16>,
    return
  }
  func.func @transform_0(%arg0: i32, %arg1: i32) -> (i32, i32, i32, i32, i32) {
    %c0_i32 = arith.constant 0 : i32
    %c0_i32_0 = arith.constant 0 : i32
    %c0_i32_1 = arith.constant 0 : i32
    %c0_i32_2 = arith.constant 0 : i32
    %c0_i32_3 = arith.constant 0 : i32
    return %arg0, %c0_i32, %c0_i32_0, %c0_i32_1, %c0_i32_2 : i32, i32, i32, i32, i32
  }
  func.func @transform_1(%arg0: i32, %arg1: i32) -> (i32, i32, i32) {
    %c0_i32 = arith.constant 0 : i32
    %c0_i32_0 = arith.constant 0 : i32
    %c0_i32_1 = arith.constant 0 : i32
    return %c0_i32, %c0_i32_0, %arg1 : i32, i32, i32
  }
  func.func @transform_2(%arg0: i32, %arg1: i32) -> (i32, i32) {
    %c0_i32 = arith.constant 0 : i32
    %c0_i32_0 = arith.constant 0 : i32
    return %c0_i32, %arg1 : i32, i32
  }
  func.func @transform_3(%arg0: i32, %arg1: i32) -> (i32, i32) {
    %c0_i32 = arith.constant 0 : i32
    %c0_i32_0 = arith.constant 0 : i32
    return %c0_i32, %arg1 : i32, i32
  }
  func.func @transform_4(%arg0: i32, %arg1: i32) -> (i32, i32, i32) {
    %c0_i32 = arith.constant 0 : i32
    %c0_i32_0 = arith.constant 0 : i32
    %c0_i32_1 = arith.constant 0 : i32
    return %c0_i32, %c0_i32_0, %arg1 : i32, i32, i32
  }
  func.func @transform_5(%arg0: i32, %arg1: i32) -> (i32, i32) {
    %c0_i32 = arith.constant 0 : i32
    %c0_i32_0 = arith.constant 0 : i32
    return %c0_i32, %arg1 : i32, i32
  }
  func.func @transform_6(%arg0: i32, %arg1: i32) -> (i32, i32) {
    %c0_i32 = arith.constant 0 : i32
    %c0_i32_0 = arith.constant 0 : i32
    return %c0_i32, %arg1 : i32, i32
  }
  func.func @transform_7(%arg0: i32, %arg1: i32) -> (i32, i32, i32, i32) {
    %c0_i32 = arith.constant 0 : i32
    %c0_i32_0 = arith.constant 0 : i32
    %c0_i32_1 = arith.constant 0 : i32
    return %arg0, %c0_i32, %c0_i32_0, %arg1 : i32, i32, i32, i32
  }
  func.func @transform_8(%arg0: i32, %arg1: i32) -> (i32, i32, i32, i32) {
    %c0_i32 = arith.constant 0 : i32
    %c0_i32_0 = arith.constant 0 : i32
    %c0_i32_1 = arith.constant 0 : i32
    return %arg0, %c0_i32, %c0_i32_0, %arg1 : i32, i32, i32, i32
  }
}

module attributes {stable_mosaic.version = 11 : i64} {
  func.func @_conv2_kernel(%arg0: i32, %arg1: i32, %arg2: memref<1x8x8x128xbf16, #tpu.memory_space<vmem>>, %arg3: memref<9x128x128xbf16, #tpu.memory_space<vmem>>, %arg4: memref<1x128xf32, #tpu.memory_space<vmem>>, %arg5: memref<1x128xf32, #tpu.memory_space<vmem>>, %arg6: memref<1x8x8x128xbf16, #tpu.memory_space<vmem>>, %arg7: memref<1x8x128xf32, #tpu.memory_space<vmem>>, %arg8: memref<10x10x128xbf16, #tpu.memory_space<vmem>>) attributes {dimension_semantics = [#tpu.dimension_semantics<parallel>, #tpu.dimension_semantics<parallel>], iteration_bounds = array<i64: 2, 1>, scalar_prefetch = 0 : i64, scratch_operands = 1 : i64, tpu.core_type = #tpu.core_type<tc>, window_params = [{transform_indices = @transform_0, window_bounds = array<i64: 1, 8, 8, 128>}, {transform_indices = @transform_1, window_bounds = array<i64: 9, 128, 128>}, {transform_indices = @transform_2, window_bounds = array<i64: 1, 128>}, {transform_indices = @transform_3, window_bounds = array<i64: 1, 128>}, {transform_indices = @transform_4, window_bounds = array<i64: 1, 8, 8, 128>}, {transform_indices = @transform_5, window_bounds = array<i64: 1, 8, 128>}]} {
    %cst = arith.constant 0.000000e+00 : bf16
    %0 = vector.broadcast %cst : bf16 to vector<10x10x128xbf16>
    %c0 = arith.constant 0 : index
    %c0_0 = arith.constant 0 : index
    %c0_1 = arith.constant 0 : index
    %1 = vector.load %arg8[%c0, %c0_0, %c0_1] : memref<10x10x128xbf16, #tpu.memory_space<vmem>>, vector<10x10x128xbf16>
    tpu.vector_store %arg8[%c0, %c0_0, %c0_1], %0 {strides = array<i32>} : memref<10x10x128xbf16, #tpu.memory_space<vmem>>, vector<10x10x128xbf16>,
    %c0_2 = arith.constant 0 : index
    %c0_3 = arith.constant 0 : index
    %c0_4 = arith.constant 0 : index
    %c0_5 = arith.constant 0 : index
    %2 = vector.load %arg2[%c0_2, %c0_3, %c0_4, %c0_5] : memref<1x8x8x128xbf16, #tpu.memory_space<vmem>>, vector<1x8x8x128xbf16>
    %3 = vector.shape_cast %2 : vector<1x8x8x128xbf16> to vector<8x8x128xbf16>
    %c1 = arith.constant 1 : index
    %c1_6 = arith.constant 1 : index
    %c0_7 = arith.constant 0 : index
    %4 = vector.load %arg8[%c1, %c1_6, %c0_7] : memref<10x10x128xbf16, #tpu.memory_space<vmem>>, vector<8x8x128xbf16>
    tpu.vector_store %arg8[%c1, %c1_6, %c0_7], %3 {strides = array<i32>} : memref<10x10x128xbf16, #tpu.memory_space<vmem>>, vector<8x8x128xbf16>,
    %c0_8 = arith.constant 0 : index
    %c0_9 = arith.constant 0 : index
    %c0_10 = arith.constant 0 : index
    %5 = vector.load %arg8[%c0_8, %c0_9, %c0_10] : memref<10x10x128xbf16, #tpu.memory_space<vmem>>, vector<8x8x128xbf16>
    %6 = vector.shape_cast %5 : vector<8x8x128xbf16> to vector<64x128xbf16>
    %c0_11 = arith.constant 0 : index
    %c0_12 = arith.constant 0 : index
    %c0_13 = arith.constant 0 : index
    %7 = vector.load %arg3[%c0_11, %c0_12, %c0_13] : memref<9x128x128xbf16, #tpu.memory_space<vmem>>, vector<1x128x128xbf16>
    %8 = vector.shape_cast %7 : vector<1x128x128xbf16> to vector<128x128xbf16>
    %cst_14 = arith.constant dense<0.000000e+00> : vector<64x128xf32>
    %9 = tpu.matmul %6, %8, %cst_14 {dimension_numbers = #tpu.dot_dimension_numbers<[1], [0], [0], [1], [0, 0, 1, 1], [], []>} : vector<64x128xbf16>, vector<128x128xbf16>, vector<64x128xf32> -> vector<64x128xf32>
    %c0_15 = arith.constant 0 : index
    %c1_16 = arith.constant 1 : index
    %c0_17 = arith.constant 0 : index
    %10 = vector.load %arg8[%c0_15, %c1_16, %c0_17] : memref<10x10x128xbf16, #tpu.memory_space<vmem>>, vector<8x8x128xbf16>
    %11 = vector.shape_cast %10 : vector<8x8x128xbf16> to vector<64x128xbf16>
    %c1_18 = arith.constant 1 : index
    %c0_19 = arith.constant 0 : index
    %c0_20 = arith.constant 0 : index
    %12 = vector.load %arg3[%c1_18, %c0_19, %c0_20] : memref<9x128x128xbf16, #tpu.memory_space<vmem>>, vector<1x128x128xbf16>
    %13 = vector.shape_cast %12 : vector<1x128x128xbf16> to vector<128x128xbf16>
    %cst_21 = arith.constant dense<0.000000e+00> : vector<64x128xf32>
    %14 = tpu.matmul %11, %13, %cst_21 {dimension_numbers = #tpu.dot_dimension_numbers<[1], [0], [0], [1], [0, 0, 1, 1], [], []>} : vector<64x128xbf16>, vector<128x128xbf16>, vector<64x128xf32> -> vector<64x128xf32>
    %15 = arith.addf %9, %14 : vector<64x128xf32>
    %c0_22 = arith.constant 0 : index
    %c2 = arith.constant 2 : index
    %c0_23 = arith.constant 0 : index
    %16 = vector.load %arg8[%c0_22, %c2, %c0_23] : memref<10x10x128xbf16, #tpu.memory_space<vmem>>, vector<8x8x128xbf16>
    %17 = vector.shape_cast %16 : vector<8x8x128xbf16> to vector<64x128xbf16>
    %c2_24 = arith.constant 2 : index
    %c0_25 = arith.constant 0 : index
    %c0_26 = arith.constant 0 : index
    %18 = vector.load %arg3[%c2_24, %c0_25, %c0_26] : memref<9x128x128xbf16, #tpu.memory_space<vmem>>, vector<1x128x128xbf16>
    %19 = vector.shape_cast %18 : vector<1x128x128xbf16> to vector<128x128xbf16>
    %cst_27 = arith.constant dense<0.000000e+00> : vector<64x128xf32>
    %20 = tpu.matmul %17, %19, %cst_27 {dimension_numbers = #tpu.dot_dimension_numbers<[1], [0], [0], [1], [0, 0, 1, 1], [], []>} : vector<64x128xbf16>, vector<128x128xbf16>, vector<64x128xf32> -> vector<64x128xf32>
    %21 = arith.addf %15, %20 : vector<64x128xf32>
    %c1_28 = arith.constant 1 : index
    %c0_29 = arith.constant 0 : index
    %c0_30 = arith.constant 0 : index
    %22 = vector.load %arg8[%c1_28, %c0_29, %c0_30] : memref<10x10x128xbf16, #tpu.memory_space<vmem>>, vector<8x8x128xbf16>
    %23 = vector.shape_cast %22 : vector<8x8x128xbf16> to vector<64x128xbf16>
    %c3 = arith.constant 3 : index
    %c0_31 = arith.constant 0 : index
    %c0_32 = arith.constant 0 : index
    %24 = vector.load %arg3[%c3, %c0_31, %c0_32] : memref<9x128x128xbf16, #tpu.memory_space<vmem>>, vector<1x128x128xbf16>
    %25 = vector.shape_cast %24 : vector<1x128x128xbf16> to vector<128x128xbf16>
    %cst_33 = arith.constant dense<0.000000e+00> : vector<64x128xf32>
    %26 = tpu.matmul %23, %25, %cst_33 {dimension_numbers = #tpu.dot_dimension_numbers<[1], [0], [0], [1], [0, 0, 1, 1], [], []>} : vector<64x128xbf16>, vector<128x128xbf16>, vector<64x128xf32> -> vector<64x128xf32>
    %27 = arith.addf %21, %26 : vector<64x128xf32>
    %c1_34 = arith.constant 1 : index
    %c1_35 = arith.constant 1 : index
    %c0_36 = arith.constant 0 : index
    %28 = vector.load %arg8[%c1_34, %c1_35, %c0_36] : memref<10x10x128xbf16, #tpu.memory_space<vmem>>, vector<8x8x128xbf16>
    %29 = vector.shape_cast %28 : vector<8x8x128xbf16> to vector<64x128xbf16>
    %c4 = arith.constant 4 : index
    %c0_37 = arith.constant 0 : index
    %c0_38 = arith.constant 0 : index
    %30 = vector.load %arg3[%c4, %c0_37, %c0_38] : memref<9x128x128xbf16, #tpu.memory_space<vmem>>, vector<1x128x128xbf16>
    %31 = vector.shape_cast %30 : vector<1x128x128xbf16> to vector<128x128xbf16>
    %cst_39 = arith.constant dense<0.000000e+00> : vector<64x128xf32>
    %32 = tpu.matmul %29, %31, %cst_39 {dimension_numbers = #tpu.dot_dimension_numbers<[1], [0], [0], [1], [0, 0, 1, 1], [], []>} : vector<64x128xbf16>, vector<128x128xbf16>, vector<64x128xf32> -> vector<64x128xf32>
    %33 = arith.addf %27, %32 : vector<64x128xf32>
    %c1_40 = arith.constant 1 : index
    %c2_41 = arith.constant 2 : index
    %c0_42 = arith.constant 0 : index
    %34 = vector.load %arg8[%c1_40, %c2_41, %c0_42] : memref<10x10x128xbf16, #tpu.memory_space<vmem>>, vector<8x8x128xbf16>
    %35 = vector.shape_cast %34 : vector<8x8x128xbf16> to vector<64x128xbf16>
    %c5 = arith.constant 5 : index
    %c0_43 = arith.constant 0 : index
    %c0_44 = arith.constant 0 : index
    %36 = vector.load %arg3[%c5, %c0_43, %c0_44] : memref<9x128x128xbf16, #tpu.memory_space<vmem>>, vector<1x128x128xbf16>
    %37 = vector.shape_cast %36 : vector<1x128x128xbf16> to vector<128x128xbf16>
    %cst_45 = arith.constant dense<0.000000e+00> : vector<64x128xf32>
    %38 = tpu.matmul %35, %37, %cst_45 {dimension_numbers = #tpu.dot_dimension_numbers<[1], [0], [0], [1], [0, 0, 1, 1], [], []>} : vector<64x128xbf16>, vector<128x128xbf16>, vector<64x128xf32> -> vector<64x128xf32>
    %39 = arith.addf %33, %38 : vector<64x128xf32>
    %c2_46 = arith.constant 2 : index
    %c0_47 = arith.constant 0 : index
    %c0_48 = arith.constant 0 : index
    %40 = vector.load %arg8[%c2_46, %c0_47, %c0_48] : memref<10x10x128xbf16, #tpu.memory_space<vmem>>, vector<8x8x128xbf16>
    %41 = vector.shape_cast %40 : vector<8x8x128xbf16> to vector<64x128xbf16>
    %c6 = arith.constant 6 : index
    %c0_49 = arith.constant 0 : index
    %c0_50 = arith.constant 0 : index
    %42 = vector.load %arg3[%c6, %c0_49, %c0_50] : memref<9x128x128xbf16, #tpu.memory_space<vmem>>, vector<1x128x128xbf16>
    %43 = vector.shape_cast %42 : vector<1x128x128xbf16> to vector<128x128xbf16>
    %cst_51 = arith.constant dense<0.000000e+00> : vector<64x128xf32>
    %44 = tpu.matmul %41, %43, %cst_51 {dimension_numbers = #tpu.dot_dimension_numbers<[1], [0], [0], [1], [0, 0, 1, 1], [], []>} : vector<64x128xbf16>, vector<128x128xbf16>, vector<64x128xf32> -> vector<64x128xf32>
    %45 = arith.addf %39, %44 : vector<64x128xf32>
    %c2_52 = arith.constant 2 : index
    %c1_53 = arith.constant 1 : index
    %c0_54 = arith.constant 0 : index
    %46 = vector.load %arg8[%c2_52, %c1_53, %c0_54] : memref<10x10x128xbf16, #tpu.memory_space<vmem>>, vector<8x8x128xbf16>
    %47 = vector.shape_cast %46 : vector<8x8x128xbf16> to vector<64x128xbf16>
    %c7 = arith.constant 7 : index
    %c0_55 = arith.constant 0 : index
    %c0_56 = arith.constant 0 : index
    %48 = vector.load %arg3[%c7, %c0_55, %c0_56] : memref<9x128x128xbf16, #tpu.memory_space<vmem>>, vector<1x128x128xbf16>
    %49 = vector.shape_cast %48 : vector<1x128x128xbf16> to vector<128x128xbf16>
    %cst_57 = arith.constant dense<0.000000e+00> : vector<64x128xf32>
    %50 = tpu.matmul %47, %49, %cst_57 {dimension_numbers = #tpu.dot_dimension_numbers<[1], [0], [0], [1], [0, 0, 1, 1], [], []>} : vector<64x128xbf16>, vector<128x128xbf16>, vector<64x128xf32> -> vector<64x128xf32>
    %51 = arith.addf %45, %50 : vector<64x128xf32>
    %c2_58 = arith.constant 2 : index
    %c2_59 = arith.constant 2 : index
    %c0_60 = arith.constant 0 : index
    %52 = vector.load %arg8[%c2_58, %c2_59, %c0_60] : memref<10x10x128xbf16, #tpu.memory_space<vmem>>, vector<8x8x128xbf16>
    %53 = vector.shape_cast %52 : vector<8x8x128xbf16> to vector<64x128xbf16>
    %c8 = arith.constant 8 : index
    %c0_61 = arith.constant 0 : index
    %c0_62 = arith.constant 0 : index
    %54 = vector.load %arg3[%c8, %c0_61, %c0_62] : memref<9x128x128xbf16, #tpu.memory_space<vmem>>, vector<1x128x128xbf16>
    %55 = vector.shape_cast %54 : vector<1x128x128xbf16> to vector<128x128xbf16>
    %cst_63 = arith.constant dense<0.000000e+00> : vector<64x128xf32>
    %56 = tpu.matmul %53, %55, %cst_63 {dimension_numbers = #tpu.dot_dimension_numbers<[1], [0], [0], [1], [0, 0, 1, 1], [], []>} : vector<64x128xbf16>, vector<128x128xbf16>, vector<64x128xf32> -> vector<64x128xf32>
    %57 = arith.addf %51, %56 : vector<64x128xf32>
    %c0_64 = arith.constant 0 : index
    %c0_65 = arith.constant 0 : index
    %58 = vector.load %arg4[%c0_64, %c0_65] : memref<1x128xf32, #tpu.memory_space<vmem>>, vector<1x128xf32>
    %59 = vector.broadcast %58 : vector<1x128xf32> to vector<64x128xf32>
    %60 = arith.mulf %57, %59 : vector<64x128xf32>
    %c0_66 = arith.constant 0 : index
    %c0_67 = arith.constant 0 : index
    %61 = vector.load %arg5[%c0_66, %c0_67] : memref<1x128xf32, #tpu.memory_space<vmem>>, vector<1x128xf32>
    %62 = vector.broadcast %61 : vector<1x128xf32> to vector<64x128xf32>
    %63 = arith.addf %60, %62 : vector<64x128xf32>
    %64 = vector.shape_cast %63 : vector<64x128xf32> to vector<8x8x128xf32>
    %65 = arith.truncf %64 : vector<8x8x128xf32> to vector<8x8x128xbf16>
    %c0_68 = arith.constant 0 : index
    %c0_69 = arith.constant 0 : index
    %c0_70 = arith.constant 0 : index
    %c0_71 = arith.constant 0 : index
    %66 = vector.load %arg6[%c0_68, %c0_69, %c0_70, %c0_71] : memref<1x8x8x128xbf16, #tpu.memory_space<vmem>>, vector<1x8x8x128xbf16>
    %67 = vector.shape_cast %66 : vector<1x8x8x128xbf16> to vector<8x8x128xbf16>
    %68 = vector.shape_cast %65 : vector<8x8x128xbf16> to vector<1x8x8x128xbf16>
    tpu.vector_store %arg6[%c0_68, %c0_69, %c0_70, %c0_71], %68 {strides = array<i32>} : memref<1x8x8x128xbf16, #tpu.memory_space<vmem>>, vector<1x8x8x128xbf16>,
    %cst_72 = arith.constant dense<0.000000e+00> : vector<128xf32>
    %69 = vector.multi_reduction <add>, %63, %cst_72 [0] : vector<64x128xf32> to vector<128xf32>
    %70 = vector.shape_cast %69 : vector<128xf32> to vector<1x128xf32>
    %cst_73 = arith.constant 6.400000e+01 : f32
    %71 = vector.broadcast %cst_73 : f32 to vector<1x128xf32>
    %72 = arith.divf %70, %71 : vector<1x128xf32>
    %73 = vector.shape_cast %72 : vector<1x128xf32> to vector<1x128xf32>
    %74 = vector.broadcast %73 : vector<1x128xf32> to vector<8x128xf32>
    %c0_74 = arith.constant 0 : index
    %c0_75 = arith.constant 0 : index
    %c0_76 = arith.constant 0 : index
    %75 = vector.load %arg7[%c0_74, %c0_75, %c0_76] : memref<1x8x128xf32, #tpu.memory_space<vmem>>, vector<1x8x128xf32>
    %76 = vector.shape_cast %75 : vector<1x8x128xf32> to vector<8x128xf32>
    %77 = vector.shape_cast %74 : vector<8x128xf32> to vector<1x8x128xf32>
    tpu.vector_store %arg7[%c0_74, %c0_75, %c0_76], %77 {strides = array<i32>} : memref<1x8x128xf32, #tpu.memory_space<vmem>>, vector<1x8x128xf32>,
    return
  }
  func.func @transform_0(%arg0: i32, %arg1: i32) -> (i32, i32, i32, i32) {
    %c0_i32 = arith.constant 0 : i32
    %c0_i32_0 = arith.constant 0 : i32
    %c0_i32_1 = arith.constant 0 : i32
    %c0_i32_2 = arith.constant 0 : i32
    return %arg0, %c0_i32, %c0_i32_0, %c0_i32_1 : i32, i32, i32, i32
  }
  func.func @transform_1(%arg0: i32, %arg1: i32) -> (i32, i32, i32) {
    %c0_i32 = arith.constant 0 : i32
    %c0_i32_0 = arith.constant 0 : i32
    %c0_i32_1 = arith.constant 0 : i32
    return %c0_i32, %c0_i32_0, %arg1 : i32, i32, i32
  }
  func.func @transform_2(%arg0: i32, %arg1: i32) -> (i32, i32) {
    %c0_i32 = arith.constant 0 : i32
    %c0_i32_0 = arith.constant 0 : i32
    return %c0_i32, %arg1 : i32, i32
  }
  func.func @transform_3(%arg0: i32, %arg1: i32) -> (i32, i32) {
    %c0_i32 = arith.constant 0 : i32
    %c0_i32_0 = arith.constant 0 : i32
    return %c0_i32, %arg1 : i32, i32
  }
  func.func @transform_4(%arg0: i32, %arg1: i32) -> (i32, i32, i32, i32) {
    %c0_i32 = arith.constant 0 : i32
    %c0_i32_0 = arith.constant 0 : i32
    %c0_i32_1 = arith.constant 0 : i32
    return %arg0, %c0_i32, %c0_i32_0, %arg1 : i32, i32, i32, i32
  }
  func.func @transform_5(%arg0: i32, %arg1: i32) -> (i32, i32, i32) {
    %c0_i32 = arith.constant 0 : i32
    %c0_i32_0 = arith.constant 0 : i32
    return %arg0, %c0_i32, %arg1 : i32, i32, i32
  }
}

module attributes {stable_mosaic.version = 11 : i64} {
  func.func @_se_residual_kernel(%arg0: i32, %arg1: i32, %arg2: i32, %arg3: memref<1x8x8x128xbf16, #tpu.memory_space<vmem>>, %arg4: memref<1x8x8x128xbf16, #tpu.memory_space<vmem>>, %arg5: memref<1x1x1x128xf32, #tpu.memory_space<vmem>>, %arg6: memref<1x8x8x128xf32, #tpu.memory_space<vmem>>) attributes {dimension_semantics = [#tpu.dimension_semantics<parallel>, #tpu.dimension_semantics<parallel>, #tpu.dimension_semantics<parallel>], iteration_bounds = array<i64: 2, 1, 1>, scalar_prefetch = 0 : i64, scratch_operands = 0 : i64, tpu.core_type = #tpu.core_type<tc>, window_params = [{transform_indices = @transform_0, window_bounds = array<i64: 1, 8, 8, 128>}, {transform_indices = @transform_1, window_bounds = array<i64: 1, 8, 8, 128>}, {transform_indices = @transform_2, window_bounds = array<i64: 1, 1, 1, 128>}, {transform_indices = @transform_3, window_bounds = array<i64: 1, 8, 8, 128>}]} {
    %c0 = arith.constant 0 : index
    %c0_0 = arith.constant 0 : index
    %c0_1 = arith.constant 0 : index
    %c0_2 = arith.constant 0 : index
    %0 = vector.load %arg3[%c0, %c0_0, %c0_1, %c0_2] : memref<1x8x8x128xbf16, #tpu.memory_space<vmem>>, vector<1x8x8x128xbf16>
    %1 = arith.extf %0 : vector<1x8x8x128xbf16> to vector<1x8x8x128xf32>
    %c0_3 = arith.constant 0 : index
    %c0_4 = arith.constant 0 : index
    %c0_5 = arith.constant 0 : index
    %c0_6 = arith.constant 0 : index
    %2 = vector.load %arg4[%c0_3, %c0_4, %c0_5, %c0_6] : memref<1x8x8x128xbf16, #tpu.memory_space<vmem>>, vector<1x8x8x128xbf16>
    %3 = arith.extf %2 : vector<1x8x8x128xbf16> to vector<1x8x8x128xf32>
    %c0_7 = arith.constant 0 : index
    %c0_8 = arith.constant 0 : index
    %c0_9 = arith.constant 0 : index
    %c0_10 = arith.constant 0 : index
    %4 = vector.load %arg5[%c0_7, %c0_8, %c0_9, %c0_10] : memref<1x1x1x128xf32, #tpu.memory_space<vmem>>, vector<1x1x1x128xf32>
    %5 = vector.broadcast %4 : vector<1x1x1x128xf32> to vector<1x8x8x128xf32>
    %6 = arith.mulf %1, %5 : vector<1x8x8x128xf32>
    %7 = arith.addf %6, %3 : vector<1x8x8x128xf32>
    %cst = arith.constant 0.000000e+00 : f32
    %8 = vector.broadcast %cst : f32 to vector<1x8x8x128xf32>
    %9 = arith.maximumf %7, %8 : vector<1x8x8x128xf32>
    %c0_11 = arith.constant 0 : index
    %c0_12 = arith.constant 0 : index
    %c0_13 = arith.constant 0 : index
    %c0_14 = arith.constant 0 : index
    %10 = vector.load %arg6[%c0_11, %c0_12, %c0_13, %c0_14] : memref<1x8x8x128xf32, #tpu.memory_space<vmem>>, vector<1x8x8x128xf32>
    tpu.vector_store %arg6[%c0_11, %c0_12, %c0_13, %c0_14], %9 {strides = array<i32>} : memref<1x8x8x128xf32, #tpu.memory_space<vmem>>, vector<1x8x8x128xf32>,
    return
  }
  func.func @transform_0(%arg0: i32, %arg1: i32, %arg2: i32) -> (i32, i32, i32, i32) {
    %c0_i32 = arith.constant 0 : i32
    %c0_i32_0 = arith.constant 0 : i32
    return %arg0, %arg1, %c0_i32, %arg2 : i32, i32, i32, i32
  }
  func.func @transform_1(%arg0: i32, %arg1: i32, %arg2: i32) -> (i32, i32, i32, i32) {
    %c0_i32 = arith.constant 0 : i32
    %c0_i32_0 = arith.constant 0 : i32
    return %arg0, %arg1, %c0_i32, %arg2 : i32, i32, i32, i32
  }
  func.func @transform_2(%arg0: i32, %arg1: i32, %arg2: i32) -> (i32, i32, i32, i32) {
    %c0_i32 = arith.constant 0 : i32
    %c0_i32_0 = arith.constant 0 : i32
    %c0_i32_1 = arith.constant 0 : i32
    return %arg0, %c0_i32, %c0_i32_0, %arg2 : i32, i32, i32, i32
  }
  func.func @transform_3(%arg0: i32, %arg1: i32, %arg2: i32) -> (i32, i32, i32, i32) {
    %c0_i32 = arith.constant 0 : i32
    %c0_i32_0 = arith.constant 0 : i32
    return %arg0, %arg1, %c0_i32, %arg2 : i32, i32, i32, i32
  }
}

</mosaic_0001>

<bundles_post_ra>
// kernel: enhanced_res_block_forward.5
= control target key start
LH: loop header
LB: loop body
LE: loop exit
PB: predicated region body
PF: predicated region fallthrough
CT: control target
= control target key end

     0   :  { %s638_s12 = smov 0   ;;  %s640_s13 = smov 0   ;;  %s682_s0 = inlined_call_operand.vmem [shape: bf16[2,8,8,128], index: 0, kind: input, shape index: {}]   ;;  %s683_s1 = inlined_call_operand.vmem [shape: bf16[2,8,8,128], index: 1, kind: input, shape index: {}]   ;;  %s684_s2 = inlined_call_operand.vmem [shape: f32[2,1,1,128], index: 2, kind: input, shape index: {}]   ;;  %s685_s3 = inlined_call_operand.vmem [shape: f32[2,8,8,128], index: 3, kind: output, shape index: {}]  }
   0x1   :  { %s642_s14 = smov 0  }
   0x2 LB: > { %s32_s15 = sadd.s32 1, %s612_s13  ;;  %p519_p0 = scmp.ge.s32.totalorder %s616_s14, 1  ;;  %s616_s14 = sphi %s642_s14, %s13_s14   ;;  %s612_s13 = sphi %s640_s13, %s687_s13   ;;  %s608_s12 = sphi %s638_s12, %s686_s12  }
   0x3   : > { %p34_p1 = scmp.ge.s32.totalorder %s32_s15, 2  ;;  %p207_p2 = scmp.lt.s32.totalorder %s616_s14, 3 }
   0x5   : > { %s689_s15 = smov (%p34_p1, %s32_s15), 0  ;;  %p208_p3 = pnand %p519_p0, %p207_p2 }
   0x6   : > { %p264_p4 = scmp.lt.s32.totalorder (!%p208_p3), %s608_s12, 1 }
   0x7   : > { %211 = sbr.rel (%p208_p3) target bundleno = 32 (0x20), region = 32 }
   0xc   : > { %s691_s12 = smov (!%p264_p4, %s608_s12), 1 }
   0xd   : > { %s529_s16 = sshll.u32 %s691_s12, 5  ;;  %s294_s19 = scalar_lea.vmem %s684_s2, %s691_s12 }
   0xe   : > { %s274_s22 = scalar_lea.vmem %s682_s0, %s529_s16  ;;  %s287_s25 = scalar_lea.vmem %s683_s1, %s529_s16  ;;  %v526_v0 = vld [vmem:[%s294_s19] ss:$0 sm:$0xff] }
   0xf   : > { %v533_v1 = vld [vmem:[%s274_s22] sm:$0xff]   ;;  %v564_v3 = vld [vmem:[%s274_s22 + $0x8] sm:$0xff]   ;;  %v565_v9 = vld [vmem:[%s274_s22 + $0x10] sm:$0xff]   ;;  %s531_s26 = sshll.u32 %s691_s12, 6 }
  0x10   : > { %v549_v2 = vld [vmem:[%s287_s25] sm:$0xff]   ;;  %v534_v4 = vunpack.c.l.bf16 %v533_v1  ;;  %v535_v6 = vunpack.c.h.bf16 %v533_v1  ;;  %v567_v8 = vld [vmem:[%s287_s25 + $0x8] sm:$0xff]   ;;  %v568_v10 = vld [vmem:[%s287_s25 + $0x10] sm:$0xff]   ;;  %v538_v11 = vunpack.c.l.bf16 %v564_v3  ;;  %v539_v13 = vunpack.c.h.bf16 %v564_v3  ;;  %s306_s29 = scalar_lea.vmem %s685_s3, %s531_s26 }
  0x11   : > { %v550_v5 = vunpack.c.l.bf16 %v549_v2  ;;  %v551_v7 = vunpack.c.h.bf16 %v549_v2  ;;  %v554_v12 = vunpack.c.l.bf16 %v567_v8  ;;  %v555_v14 = vunpack.c.h.bf16 %v567_v8  ;;  %v566_v15 = vld [vmem:[%s274_s22 + $0x18] sm:$0xff]  }
  0x12   : > { %v347_v16 = vmul.f32 %v534_v4, %v526_v0  ;;  %v348_v17 = vmul.f32 %v535_v6, %v526_v0  ;;  %v542_v18 = vunpack.c.l.bf16 %v565_v9  ;;  %v558_v19 = vunpack.c.l.bf16 %v568_v10  ;;  %v569_v20 = vld [vmem:[%s287_s25 + $0x18] sm:$0xff]  }
  0x13   : > { %v349_v21 = vmul.f32 %v538_v11, %v526_v0  ;;  %v350_v22 = vmul.f32 %v539_v13, %v526_v0  ;;  %v543_v23 = vunpack.c.h.bf16 %v565_v9  ;;  %v559_v24 = vunpack.c.h.bf16 %v568_v10 }
  0x14   : > { %v355_v25 = vadd.f32 %v550_v5, %v347_v16  ;;  %v356_v26 = vadd.f32 %v551_v7, %v348_v17  ;;  %v351_v27 = vmul.f32 %v542_v18, %v526_v0  ;;  %v546_v28 = vunpack.c.l.bf16 %v566_v15 }
  0x15   : > { %v357_v29 = vadd.f32 %v554_v12, %v349_v21  ;;  %v358_v30 = vadd.f32 %v555_v14, %v350_v22  ;;  %v352_v31 = vmul.f32 %v543_v23, %v526_v0  ;;  %v562_v32 = vunpack.c.l.bf16 %v569_v20 }
  0x16   : > { %v363_v33 = vmax.f32 %v355_v25, 0.0  ;;  %v364_v34 = vmax.f32 %v356_v26, 0.0  ;;  %v359_v35 = vadd.f32 %v558_v19, %v351_v27  ;;  %v353_v36 = vmul.f32 %v546_v28, %v526_v0 }
  0x17   : > { %v365_v37 = vmax.f32 %v357_v29, 0.0  ;;  %v366_v38 = vmax.f32 %v358_v30, 0.0  ;;  %v360_v39 = vadd.f32 %v559_v24, %v352_v31  ;;  %v547_v40 = vunpack.c.h.bf16 %v566_v15 }
  0x18   : > { %371 = vst [vmem:[%s306_s29] sm:$0xff] %v363_v33  ;;  %372 = vst [vmem:[%s306_s29 + $0x8] sm:$0xff] %v364_v34  ;;  %v367_v41 = vmax.f32 %v359_v35, 0.0  ;;  %v361_v42 = vadd.f32 %v562_v32, %v353_v36  ;;  %v563_v43 = vunpack.c.h.bf16 %v569_v20 }
  0x19   : > { %373 = vst [vmem:[%s306_s29 + $0x10] sm:$0xff] %v365_v37  ;;  %374 = vst [vmem:[%s306_s29 + $0x18] sm:$0xff] %v366_v38  ;;  %v368_v44 = vmax.f32 %v360_v39, 0.0  ;;  %v354_v45 = vmul.f32 %v547_v40, %v526_v0 }
  0x1a   : > { %375 = vst [vmem:[%s306_s29 + $0x20] sm:$0xff] %v367_v41  ;;  %v369_v46 = vmax.f32 %v361_v42, 0.0 }
  0x1b   : > { %376 = vst [vmem:[%s306_s29 + $0x28] sm:$0xff] %v368_v44  ;;  %v362_v47 = vadd.f32 %v563_v43, %v354_v45 }
  0x1c   : > { %377 = vst [vmem:[%s306_s29 + $0x30] sm:$0xff] %v369_v46 }
  0x1d   : > { %v370_v48 = vmax.f32 %v362_v47, 0.0 }
  0x1f   : > { %378 = vst [vmem:[%s306_s29 + $0x38] sm:$0xff] %v370_v48 }
  0x20 PF: > { %s13_s14 = sadd.s32 1, %s616_s14   ;;  %s686_s12 = smov %s612_s13 }
  0x21   : > { %p10_p5 = scmp.ge.s32.totalorder %s13_s14, 4   ;;  %s687_s13 = smov %s689_s15 }
  0x23   :  { %12 = sbr.rel (!%p10_p5) target bundleno = 2 (0x2), region = 68 }

// kernel: enhanced_res_block_forward.3
= control target key start
LH: loop header
LB: loop body
LE: loop exit
PB: predicated region body
PF: predicated region fallthrough
CT: control target
= control target key end

     0   :  { %s3719_s27 = smov 0   ;;  %s3721_s28 = smov 0   ;;  %s4235_s0 = inlined_call_operand.vmem [shape: bf16[2,4,9,9,128], index: 0, kind: input, shape index: {}]   ;;  %s4236_s1 = inlined_call_operand.vmem [shape: bf16[9,128,128], index: 1, kind: input, shape index: {}]   ;;  %s4237_s2 = inlined_call_operand.vmem [shape: f32[1,128], index: 2, kind: input, shape index: {}]   ;;  %s4238_s3 = inlined_call_operand.vmem [shape: f32[1,128], index: 3, kind: input, shape index: {}]   ;;  %s4239_s4 = inlined_call_operand.vmem [shape: bf16[1,128,128], index: 4, kind: input, shape index: {}]   ;;  %s4240_s5 = inlined_call_operand.vmem [shape: f32[1,128], index: 5, kind: input, shape index: {}]   ;;  %s4241_s6 = inlined_call_operand.vmem [shape: f32[1,128], index: 6, kind: input, shape index: {}]   ;;  %s4242_s7 = inlined_call_operand.vmem [shape: bf16[2,8,8,128], index: 7, kind: output, shape index: {0}]   ;;  %s4243_s8 = inlined_call_operand.vmem [shape: bf16[2,8,8,128], index: 8, kind: output, shape index: {1}]  }
   0x1   :  { %s3723_s29 = smov 0  }
   0x2 LB: > { %s31_s30 = sadd.s32 1, %s3668_s28  ;;  %p2769_p0 = scmp.ge.s32.totalorder %s3672_s29, 1  ;;  %s3672_s29 = sphi %s3723_s29, %s19_s29   ;;  %s3668_s28 = sphi %s3721_s28, %s4261_s28   ;;  %s3664_s27 = sphi %s3719_s27, %s4260_s27  }
   0x3   : > { %p33_p1 = scmp.ge.s32.totalorder %s31_s30, 2  ;;  %p331_p2 = scmp.lt.s32.totalorder %s3672_s29, 3 }
   0x5   : > { %s4263_s30 = smov (%p33_p1, %s31_s30), 0  ;;  %p332_p3 = pnand %p2769_p0, %p331_p2 }
   0x7   : > { %335 = sbr.rel (%p332_p3) target bundleno = 391 (0x187), region = 48 }
   0xc   : > { %v3542_v0 = vld [vmem:[%s4236_s1 + $0x78] sm:$0xff]   ;;  %p396_p4 = scmp.lt.s32.totalorder %s3664_s27, 1  ;;  %v3544_v2 = vld [vmem:[%s4236_s1 + $0x70] sm:$0xff]   ;;  %v3546_v4 = vld [vmem:[%s4236_s1 + $0x68] sm:$0xff]   ;;  %vm778_vm0 = vsmask.f32 3328 }
   0xd   : > { %v3543_v1 = vld [vmem:[%s4236_s1 + $0x38] sm:$0xff]   ;;  %3277 = vmatprep.subr.bf16.mxu0 %v3542_v0  ;;  %v3545_v3 = vld [vmem:[%s4236_s1 + $0x30] sm:$0xff]   ;;  %v3547_v5 = vld [vmem:[%s4236_s1 + $0x28] sm:$0xff]   ;;  %vm779_vm1 = vsmask.f32 7440 }
   0xe   : > { %3301 = vmatprep.subr.bf16.mxu1 %v3543_v1  ;;  %3278 = vmatpush3.bf16.msra.mxu0 %v3542_v0  ;;  %s4265_s27 = smov (!%p396_p4, %s3664_s27), 1  ;;  %v3548_v6 = vld [vmem:[%s4236_s1 + $0x60] sm:$0xff]   ;;  %v3550_v8 = vld [vmem:[%s4236_s1 + $0x58] sm:$0xff]   ;;  %v3552_v10 = vld [vmem:[%s4236_s1 + $0x50] sm:$0xff]  }
   0xf   : > { %3302 = vmatpush3.bf16.msra.mxu1 %v3543_v1  ;;  %3279 = vmatprep.subr.bf16.mxu0 %v3544_v2  ;;  %v3549_v7 = vld [vmem:[%s4236_s1 + $0x20] sm:$0xff]   ;;  %s3517_s25 = smul.u32 288, %s4265_s27  ;;  %v3551_v9 = vld [vmem:[%s4236_s1 + $0x18] sm:$0xff]   ;;  %v3553_v11 = vld [vmem:[%s4236_s1 + $0x10] sm:$0xff]   ;;  %s3109_s26 = sshll.u32 %s4265_s27, 5 }
  0x10   : > { %3303 = vmatprep.subr.bf16.mxu1 %v3545_v3  ;;  %v3554_v14 = vld [vmem:[%s4236_s1 + $0x48] sm:$0xff]   ;;  %v3556_v16 = vld [vmem:[%s4236_s1 + $0x40] sm:$0xff]   ;;  %v3562_v19 = vld [vmem:[%s4236_s1 + $0xb8] sm:$0xff]   ;;  %s4188_s11 = scalar_lea.vmem %s4243_s8, %s3109_s26  ;;  %s4201_s15 = scalar_lea.vmem %s4242_s7, %s3109_s26 }
  0x11   : > { %s3773_s14 = scalar_lea.vmem %s4235_s0, %s3517_s25  ;;  %v3555_v15 = vld [vmem:[%s4236_s1 + $0x8] sm:$0xff]   ;;  %v3557_v17 = vld [vmem:[%s4236_s1] sm:$0xff]   ;;  %v3563_v20 = vld [vmem:[%s4236_s1 + $0xf8] sm:$0xff]  }
  0x12   : > { %3280 = vmatpush3.bf16.msra.mxu0 %v3544_v2  ;;  %v3558_v12 = vld [vmem:[%s3773_s14 + $0x48] ss:$8 sps:$4 sm:$0xff]   ;;  %v3560_v18 = vld [vmem:[%s3773_s14 + $0x58] ss:$8 sps:$4 sm:$0xff]   ;;  %v763_v33 = vld [vmem:[%s3773_s14 + $0x4] sm:$0x1] }
  0x13   : > { %3304 = vmatpush3.bf16.msra.mxu1 %v3545_v3  ;;  %3281 = vmatprep.subr.bf16.mxu0 %v3546_v4  ;;  %v3559_v13 = vld [vmem:[%s3773_s14] ss:$8 sps:$4 sm:$0xff]   ;;  %v3561_v21 = vld [vmem:[%s3773_s14 + $0x10] ss:$8 sps:$4 sm:$0xff]   ;;  %v765_v35 = vld [vmem:[%s3773_s14 + $0xc] sm:$0x1] }
  0x14   : > { %3305 = vmatprep.subr.bf16.mxu1 %v3547_v5  ;;  %3293 = vmatprep.mubr.bf16.mxu0 %v3558_v12  ;;  %v3564_v22 = vld [vmem:[%s4236_s1 + $0xb0] sm:$0xff]   ;;  %v3573_v25 = vld [vmem:[%s3773_s14 + $0x20] ss:$8 sps:$4 sm:$0xff]   ;;  %v3570_v36 = vld [vmem:[%s4236_s1 + $0x98] sm:$0xff]   ;;  %v791_v39 = vshll.u32 %v763_v33, 16  ;;  %v805_v42 = vshll.u32 %v765_v35, 16 }
  0x15   : > { %3317 = vmatprep.mubr.bf16.mxu1 %v3559_v13  ;;  %v3565_v23 = vld [vmem:[%s4236_s1 + $0xf0] sm:$0xff]   ;;  %v3566_v26 = vld [vmem:[%s4236_s1 + $0xa8] sm:$0xff]   ;;  %v3568_v28 = vld [vmem:[%s4236_s1 + $0xa0] sm:$0xff]  }
  0x16   : > { %3282 = vmatpush3.bf16.msra.mxu0 %v3546_v4  ;;  %v3572_v24 = vld [vmem:[%s3773_s14 + $0x68] ss:$8 sps:$4 sm:$0xff]   ;;  %v3574_v29 = vld [vmem:[%s3773_s14 + $0x78] ss:$8 sps:$4 sm:$0xff]   ;;  %v793_v49 = vrot.slane %v791_v39, 5  ;;  %vm3845_vm2 = vmor %vm778_vm0, %vm779_vm1  ;;  %v807_v61 = vrot.slane %v805_v42, 5 }
  0x17   : > { %3306 = vmatpush3.bf16.msra.mxu1 %v3547_v5  ;;  %3283 = vmatprep.subr.bf16.mxu0 %v3548_v6  ;;  %v3567_v27 = vld [vmem:[%s4236_s1 + $0xe8] sm:$0xff]   ;;  %v3569_v30 = vld [vmem:[%s4236_s1 + $0xe0] sm:$0xff]   ;;  %v3575_v31 = vld [vmem:[%s3773_s14 + $0x30] ss:$8 sps:$4 sm:$0xff]  }
  0x18   : > { %3307 = vmatprep.subr.bf16.mxu1 %v3549_v7  ;;  %v762_v32 = vld [vmem:[%s3773_s14] sm:$0xf]  ;;  %v764_v34 = vld [vmem:[%s3773_s14 + $0x8] sm:$0xf]  ;;  %v3582_v43 = vld [vmem:[%s3773_s14 + $0x90] ss:$8 sps:$4 sm:$0xff]  }
  0x19   : > { %v782_v37 = vshrl.u32 %v762_v32, 16  ;;  %v785_v38 = vshll.u32 %v762_v32, 16  ;;  %v796_v40 = vshrl.u32 %v764_v34, 16  ;;  %v799_v41 = vshll.u32 %v764_v34, 16  ;;  %v3571_v44 = vld [vmem:[%s4236_s1 + $0xd8] sm:$0xff]   ;;  %v3576_v58 = vld [vmem:[%s4236_s1 + $0x90] sm:$0xff]  }
  0x1a   : > { %3284 = vmatpush3.bf16.msra.mxu0 %v3548_v6  ;;  %v766_v48 = vld [vmem:[%s3773_s14 + $0x10] sm:$0xf]  ;;  %v767_v51 = vld [vmem:[%s3773_s14 + $0x14] sm:$0x1]  ;;  %v768_v52 = vld [vmem:[%s3773_s14 + $0x18] sm:$0xf] }
  0x1b   : > { %3308 = vmatpush3.bf16.msra.mxu1 %v3549_v7  ;;  %3285 = vmatprep.subr.bf16.mxu0 %v3550_v8  ;;  %v784_v45 = vrot.slane %v782_v37, 4  ;;  %v787_v46 = vrot.slane %v785_v38, 5  ;;  %v798_v47 = vrot.slane %v796_v40, 4  ;;  %v801_v50 = vrot.slane %v799_v41, 5  ;;  %v769_v54 = vld [vmem:[%s3773_s14 + $0x1c] sm:$0x1] }
  0x1c   : > { %3309 = vmatprep.subr.bf16.mxu1 %v3551_v9  ;;  %v810_v55 = vshrl.u32 %v766_v48, 16  ;;  %v813_v56 = vshll.u32 %v766_v48, 16  ;;  %v819_v57 = vshll.u32 %v767_v51, 16  ;;  %v824_v62 = vshrl.u32 %v768_v52, 16  ;;  %v3577_v4 = vld [vmem:[%s4236_s1 + $0xd0] sm:$0xff]   ;;  %v3584_v51 = vld [vmem:[%s4236_s1 + $0x138] sm:$0xff]  }
  0x1d   : > { %v788_v53 = vor.u32 %v787_v46, %v784_v45  ;;  %v802_v60 = vor.u32 %v801_v50, %v798_v47  ;;  %v827_v63 = vshll.u32 %v768_v52, 16  ;;  %v833_v3 = vshll.u32 %v769_v54, 16  ;;  %v776_v40 = vld [vmem:[%s3773_s14 + $0x38] sm:$0xf] }
  0x1e   : > { %3286 = vmatpush3.bf16.msra.mxu0 %v3550_v8  ;;  %v812_v1 = vrot.slane %v810_v55, 4  ;;  %v815_v2 = vrot.slane %v813_v56, 5  ;;  %v3852_v6 = vrot.slane %v819_v57, 5  ;;  %v826_v7 = vrot.slane %v824_v62, 4  ;;  %v3585_v55 = vld [vmem:[%s4236_s1 + $0x178] sm:$0xff]  }
  0x1f   : > { %3310 = vmatpush3.bf16.msra.mxu1 %v3551_v9  ;;  %3287 = vmatprep.subr.bf16.mxu0 %v3552_v10  ;;  %v789_v0 = vrot.slane %v788_v53, 4  ;;  %v803_v5 = vrot.slane %v802_v60, 4  ;;  %v829_v8 = vrot.slane %v827_v63, 5  ;;  %v3578_v9 = vld [vmem:[%s4236_s1 + $0x88] sm:$0xff]   ;;  %v883_v50 = vshll.u32 %v776_v40, 16 }
  0x20   : > { %3311 = vmatprep.subr.bf16.mxu1 %v3553_v11 }
  0x21   : > { %v808_v12 = vsel %vm3845_vm2, %v803_v5, %v807_v61  ;;  %v830_v13 = vor.u32 %v829_v8, %v826_v7  ;;  %v3583_v61 = vld [vmem:[%s3773_s14 + $0xa0] ss:$8 sps:$4 sm:$0xff]   ;;  %v3587_v7 = vld [vmem:[%s4236_s1 + $0x170] sm:$0xff]  }
  0x22   : > { %3288 = vmatpush3.bf16.msra.mxu0 %v3552_v10  ;;  %v794_v10 = vsel %vm3845_vm2, %v789_v0, %v793_v49  ;;  %v880_v49 = vshrl.u32 %v776_v40, 16  ;;  %v2928_v40 = vld [vmem:[%s3773_s14 + $0xa4] sm:$0x1] }
  0x23   : > { %3312 = vmatpush3.bf16.msra.mxu1 %v3553_v11  ;;  %3289 = vmatprep.subr.bf16.mxu0 %v3554_v14  ;;  %v816_v11 = vor.u32 %v815_v2, %v812_v1 }
  0x24   : > { %3313 = vmatprep.subr.bf16.mxu1 %v3555_v15  ;;  %v882_v57 = vrot.slane %v880_v49, 4 }
  0x26   : > { %3290 = vmatpush3.bf16.msra.mxu0 %v3554_v14  ;;  %v2839_v14 = vcombine.low %v794_v10, %v808_v12  ;;  %v3588_v10 = vld [vmem:[%s4236_s1 + $0x128] sm:$0xff]  }
  0x27   : > { %3314 = vmatpush3.bf16.msra.mxu1 %v3555_v15  ;;  %3291 = vmatprep.subr.bf16.mxu0 %v3556_v16  ;;  %v817_v15 = vrot.slane %v816_v11, 4 }
  0x28   : > { %3315 = vmatprep.subr.bf16.mxu1 %v3557_v17 }
  0x2a   : > { %3292 = vmatpush3.bf16.msra.mxu0 %v3556_v16  ;;  %v835_v16 = vrot.slane %v833_v3, 5 }
  0x2b   : > { %3316 = vmatpush3.bf16.msra.mxu1 %v3557_v17  ;;  %3325 = vmatprep.subr.bf16.mxu0 %v3562_v19  ;;  %v3579_v17 = vld [vmem:[%s4236_s1 + $0xc8] sm:$0xff]  }
  0x2c   : > { %3349 = vmatprep.subr.bf16.mxu1 %v3563_v20 }
  0x2d   : > { %3294 = vmatmul.mubr.bf16.vlgmr.msra.gmra.mxu0 %v3560_v18  ;;  %v831_v18 = vrot.slane %v830_v13, 4  ;;  %v3589_v13 = vld [vmem:[%s4236_s1 + $0x168] sm:$0xff]  }
  0x2e   : > { %3318 = vmatmul.mubr.bf16.vlgmr.msra.gmra.mxu1 %v3561_v21  ;;  %3326 = vmatpush3.bf16.msra.mxu0 %v3562_v19  ;;  %v770_v19 = vld [vmem:[%s3773_s14 + $0x20] sm:$0xf]  ;;  %v772_v21 = vld [vmem:[%s3773_s14 + $0x28] sm:$0xf] }
  0x2f   : > { %3350 = vmatpush3.bf16.msra.mxu1 %v3563_v20  ;;  %3327 = vmatprep.subr.bf16.mxu0 %v3564_v22  ;;  %v771_v20 = vld [vmem:[%s3773_s14 + $0x24] sm:$0x1]  ;;  %v836_v32 = vsel %vm3845_vm2, %v831_v18, %v835_v16  ;;  %v3594_v18 = vld [vmem:[%s4236_s1 + $0x118] sm:$0xff]  }
  0x30   : > { %3351 = vmatprep.subr.bf16.mxu1 %v3565_v23  ;;  %3297 = vmatprep.mubr.bf16.mxu0 %v3572_v24  ;;  %v841_v24 = vshll.u32 %v770_v19, 16  ;;  %v3592_v16 = vld [vmem:[%s4236_s1 + $0x120] sm:$0xff]  }
  0x31   : > { %3321 = vmatprep.mubr.bf16.mxu1 %v3573_v25  ;;  %v3580_v25 = vld [vmem:[%s4236_s1 + $0x80] sm:$0xff]  }
  0x32   : > { %3328 = vmatpush3.bf16.msra.mxu0 %v3564_v22  ;;  %v773_v22 = vld [vmem:[%s3773_s14 + $0x2c] sm:$0x1]  ;;  %v843_v34 = vrot.slane %v841_v24, 5 }
  0x33   : > { %3352 = vmatpush3.bf16.msra.mxu1 %v3565_v23  ;;  %3329 = vmatprep.subr.bf16.mxu0 %v3566_v26  ;;  %v838_v23 = vshrl.u32 %v770_v19, 16  ;;  %v861_v35 = vshll.u32 %v773_v22, 16  ;;  %v3602_v19 = vld [vmem:[%s3773_s14 + $0xd8] ss:$8 sps:$4 sm:$0xff]  }
  0x34   : > { %3353 = vmatprep.subr.bf16.mxu1 %v3567_v27  ;;  %v2925_v22 = vld [vmem:[%s3773_s14 + $0x98] sm:$0xf] }
  0x35   : > { %3298 = vmatmul.mubr.bf16.gmra.mxu0 %v3574_v29  ;;  %v855_v29 = vshll.u32 %v772_v21, 16  ;;  %v840_v33 = vrot.slane %v838_v23, 4  ;;  %v2926_v23 = vld [vmem:[%s3773_s14 + $0x9c] sm:$0x1] }
  0x36   : > { %3330 = vmatpush3.bf16.msra.mxu0 %v3566_v26  ;;  %3322 = vmatmul.mubr.bf16.gmra.mxu1 %v3575_v31  ;;  %v822_v26 = vsel %vm3845_vm2, %v817_v15, %v3852_v6  ;;  %v3581_v31 = vld [vmem:[%s4236_s1 + $0xc0] sm:$0xff]   ;;  %v3590_v6 = vld [vmem:[%s3773_s14 + $0xb0] ss:$8 sps:$4 sm:$0xff]  }
  0x37   : > { %3354 = vmatpush3.bf16.msra.mxu1 %v3567_v27  ;;  %3331 = vmatprep.subr.bf16.mxu0 %v3568_v28  ;;  %v847_v27 = vshll.u32 %v771_v20, 16  ;;  %v857_v39 = vrot.slane %v855_v29, 5  ;;  %v844_v42 = vor.u32 %v843_v34, %v840_v33  ;;  %v2840_v60 = vcombine.low %v822_v26, %v836_v32  ;;  %v3591_v15 = vld [vmem:[%s3773_s14 + $0xc0] ss:$8 sps:$4 sm:$0xff]   ;;  %v2923_v20 = vld [vmem:[%s3773_s14 + $0x90] sm:$0xf] }
  0x38   : > { %3355 = vmatprep.subr.bf16.mxu1 %v3569_v30  ;;  %3365 = vmatprep.mubr.bf16.mxu1 %v3582_v43  ;;  %v863_v43 = vrot.slane %v861_v35, 5  ;;  %v1406_v24 = vshrl.u32 %v2923_v20, 16  ;;  %v1429_v29 = vshll.u32 %v2926_v23, 16  ;;  %v3596_v33 = vld [vmem:[%s4236_s1 + $0x110] sm:$0xff]   ;;  %v2935_v23 = vld [vmem:[%s3773_s14 + $0xc0] sm:$0xf] }
  0x39   : > { %3341 = vmatprep.mubr.bf16.mxu0 %v2839_v14  ;;  %v849_v37 = vrot.slane %v847_v27, 5  ;;  %v845_v52 = vrot.slane %v844_v42, 4  ;;  %v1420_v27 = vshrl.u32 %v2925_v22, 16  ;;  %v2930_v42 = vld [vmem:[%s3773_s14 + $0xac] sm:$0x1] }
  0x3a   : > { %3332 = vmatpush3.bf16.msra.mxu0 %v3568_v28  ;;  %v852_v28 = vshrl.u32 %v772_v21, 16  ;;  %v2924_v21 = vld [vmem:[%s3773_s14 + $0x94] sm:$0x1] }
  0x3b   : > { %3356 = vmatpush3.bf16.msra.mxu1 %v3569_v30  ;;  %3333 = vmatprep.subr.bf16.mxu0 %v3570_v36  ;;  %v774_v30 = vld [vmem:[%s3773_s14 + $0x30] sm:$0xf]  ;;  %v850_v62 = vsel %vm3845_vm2, %v845_v52, %v849_v37  ;;  %v1415_v26 = vshll.u32 %v2924_v21, 16  ;;  %v1422_v35 = vrot.slane %v1420_v27, 4  ;;  %v1431_v37 = vrot.slane %v1429_v29, 5 }
  0x3c   : > { %3357 = vmatprep.subr.bf16.mxu1 %v3571_v44  ;;  %v854_v38 = vrot.slane %v852_v28, 4  ;;  %v866_v41 = vshrl.u32 %v774_v30, 16  ;;  %v869_v45 = vshll.u32 %v774_v30, 16  ;;  %v1423_v28 = vshll.u32 %v2925_v22, 16  ;;  %v3595_v30 = vld [vmem:[%s4236_s1 + $0x158] sm:$0xff]  }
  0x3d   : > { %v1417_v34 = vrot.slane %v1415_v26, 5  ;;  %v2937_v29 = vld [vmem:[%s3773_s14 + $0xc8] sm:$0xf] }
  0x3e   : > { %3334 = vmatpush3.bf16.msra.mxu0 %v3570_v36  ;;  %v775_v36 = vld [vmem:[%s3773_s14 + $0x34] sm:$0x1]  ;;  %v858_v47 = vor.u32 %v857_v39, %v854_v38  ;;  %v868_v48 = vrot.slane %v866_v41, 4  ;;  %v871_v53 = vrot.slane %v869_v45, 5  ;;  %v2927_v38 = vld [vmem:[%s3773_s14 + $0xa0] sm:$0xf] }
  0x3f   : > { %3358 = vmatpush3.bf16.msra.mxu1 %v3571_v44  ;;  %3335 = vmatprep.subr.bf16.mxu0 %v3576_v58  ;;  %v777_v44 = vld [vmem:[%s3773_s14 + $0x3c] sm:$0x1]  ;;  %v875_v46 = vshll.u32 %v775_v36, 16  ;;  %v1425_v36 = vrot.slane %v1423_v28, 5  ;;  %v2929_v41 = vld [vmem:[%s3773_s14 + $0xa8] sm:$0xf] }
  0x40   : > { %3359 = vmatprep.subr.bf16.mxu1 %v3577_v4  ;;  %v889_v54 = vshll.u32 %v777_v44, 16  ;;  %v859_v56 = vrot.slane %v858_v47, 4  ;;  %v872_v63 = vor.u32 %v871_v53, %v868_v48  ;;  %v1434_v45 = vshrl.u32 %v2927_v38, 16 }
  0x41   : > { %v877_v1 = vrot.slane %v875_v46, 5  ;;  %v1426_v44 = vor.u32 %v1425_v36, %v1422_v35  ;;  %v1437_v46 = vshll.u32 %v2927_v38, 16  ;;  %v1443_v47 = vshll.u32 %v2928_v40, 16  ;;  %v3608_v35 = vld [vmem:[%s3773_s14 + $0xf8] ss:$8 sps:$4 sm:$0xff]   ;;  %v3606_v40 = vld [vmem:[%s4236_s1 + $0x1b0] sm:$0xff]  }
  0x42   : > { %3336 = vmatpush3.bf16.msra.mxu0 %v3576_v58  ;;  %v885_v58 = vrot.slane %v883_v50, 5  ;;  %v864_v0 = vsel %vm3845_vm2, %v859_v56, %v863_v43  ;;  %v891_v3 = vrot.slane %v889_v54, 5  ;;  %v873_v5 = vrot.slane %v872_v63, 4  ;;  %v3597_v43 = vld [vmem:[%s4236_s1 + $0x150] sm:$0xff]  }
  0x43   : > { %3360 = vmatpush3.bf16.msra.mxu1 %v3577_v4  ;;  %3337 = vmatprep.subr.bf16.mxu0 %v3578_v9  ;;  %v3586_v4 = vld [vmem:[%s4236_s1 + $0x130] sm:$0xff]   ;;  %v2841_v8 = vcombine.low %v850_v62, %v864_v0  ;;  %v1448_v49 = vshrl.u32 %v2929_v41, 16  ;;  %v1451_v50 = vshll.u32 %v2929_v41, 16  ;;  %v1427_v52 = vrot.slane %v1426_v44, 4 }
  0x44   : > { %3361 = vmatprep.subr.bf16.mxu1 %v3579_v17  ;;  %v886_v2 = vor.u32 %v885_v58, %v882_v57  ;;  %v878_v11 = vsel %vm3845_vm2, %v873_v5, %v877_v1  ;;  %v1436_v53 = vrot.slane %v1434_v45, 4  ;;  %v1439_v54 = vrot.slane %v1437_v46, 5  ;;  %v3607_v45 = vld [vmem:[%s4236_s1 + $0x1f0] sm:$0xff]  }
  0x45   : > { %v1450_v57 = vrot.slane %v1448_v49, 4  ;;  %v1453_v58 = vrot.slane %v1451_v50, 5  ;;  %v1445_v0 = vrot.slane %v1443_v47, 5  ;;  %v1504_v38 = vshrl.u32 %v2937_v29, 16 }
  0x46   : > { %3338 = vmatpush3.bf16.msra.mxu0 %v3578_v9  ;;  %v887_v9 = vrot.slane %v886_v2, 4  ;;  %v1440_v62 = vor.u32 %v1439_v54, %v1436_v53 }
  0x47   : > { %3362 = vmatpush3.bf16.msra.mxu1 %v3579_v17  ;;  %3339 = vmatprep.subr.bf16.mxu0 %v3580_v25  ;;  %v3593_v17 = vld [vmem:[%s4236_s1 + $0x160] sm:$0xff]   ;;  %v1454_v1 = vor.u32 %v1453_v58, %v1450_v57  ;;  %v1506_v47 = vrot.slane %v1504_v38, 4  ;;  %v3611_v58 = vld [vmem:[%s4236_s1 + $0x1e8] sm:$0xff]   ;;  %v3043_v38 = vld [vmem:[%s3773_s14 + $0x18] sm:$0xf] }
  0x48   : > { %3363 = vmatprep.subr.bf16.mxu1 %v3581_v31  ;;  %v892_v12 = vsel %vm3845_vm2, %v887_v9, %v891_v3  ;;  %v1441_v3 = vrot.slane %v1440_v62, 4  ;;  %v3604_v9 = vld [vmem:[%s4236_s1 + $0x1b8] sm:$0xff]   ;;  %v3609_v62 = vld [vmem:[%s3773_s14 + $0x108] ss:$8 sps:$4 sm:$0xff]  }
  0x49   : > { %v2842_v14 = vcombine.low %v878_v11, %v892_v12  ;;  %v1455_v5 = vrot.slane %v1454_v1, 4  ;;  %v2932_v11 = vld [vmem:[%s3773_s14 + $0xb4] sm:$0x1]  ;;  %v2933_v12 = vld [vmem:[%s3773_s14 + $0xb8] sm:$0xf] }
  0x4a   : > { %3340 = vmatpush3.bf16.msra.mxu0 %v3580_v25  ;;  %v1409_v25 = vshll.u32 %v2923_v20, 16  ;;  %v1479_v21 = vshll.u32 %v2933_v12, 16 }
  0x4b   : > { %3364 = vmatpush3.bf16.msra.mxu1 %v3581_v31  ;;  %3373 = vmatprep.subr.bf16.mxu0 %v3584_v51  ;;  %v1408_v31 = vrot.slane %v1406_v24, 4  ;;  %v2936_v24 = vld [vmem:[%s3773_s14 + $0xc4] sm:$0x1] }
  0x4c   : > { %3397 = vmatprep.subr.bf16.mxu1 %v3585_v55  ;;  %v1411_v32 = vrot.slane %v1409_v25, 5 }
  0x4d   : > { %3342 = vmatmul.mubr.bf16.vlgmr.msra.gmra.mxu0 %v2840_v60  ;;  %v3599_v60 = vld [vmem:[%s4236_s1 + $0x148] sm:$0xff]  }
  0x4e   : > { %3366 = vmatmul.mubr.bf16.vlgmr.msra.gmra.mxu1 %v3583_v61  ;;  %3374 = vmatpush3.bf16.msra.mxu0 %v3584_v51  ;;  %v1412_v39 = vor.u32 %v1411_v32, %v1408_v31  ;;  %v1457_v51 = vshll.u32 %v2930_v42, 16  ;;  %v1432_v61 = vsel %vm3845_vm2, %v1427_v52, %v1431_v37  ;;  %v2938_v32 = vld [vmem:[%s3773_s14 + $0xcc] sm:$0x1]  ;;  %v1499_v37 = vshll.u32 %v2936_v24, 16 }
  0x4f   : > { %3398 = vmatpush3.bf16.msra.mxu1 %v3585_v55  ;;  %3375 = vmatprep.subr.bf16.mxu0 %v3586_v4  ;;  %v3598_v55 = vld [vmem:[%s4236_s1 + $0x108] sm:$0xff]   ;;  %v1513_v44 = vshll.u32 %v2938_v32, 16 }
  0x50   : > { %3399 = vmatprep.subr.bf16.mxu1 %v3587_v7  ;;  %3345 = vmatprep.mubr.bf16.mxu0 %v2841_v8  ;;  %v1413_v48 = vrot.slane %v1412_v39, 4  ;;  %v1459_v2 = vrot.slane %v1457_v51, 5  ;;  %v1507_v39 = vshll.u32 %v2937_v29, 16  ;;  %v1501_v51 = vrot.slane %v1499_v37, 5  ;;  %v3040_v24 = vld [vmem:[%s3773_s14 + $0xc] sm:$0x1] }
  0x51   : > { %3369 = vmatprep.mubr.bf16.mxu1 %v3590_v6  ;;  %v3601_v6 = vld [vmem:[%s4236_s1 + $0x140] sm:$0xff]   ;;  %v1515_v54 = vrot.slane %v1513_v44, 5  ;;  %v3633_v32 = vld [vmem:[%s4239_s4 + $0x28] sm:$0xff]  }
  0x52   : > { %3376 = vmatpush3.bf16.msra.mxu0 %v3586_v4  ;;  %v1418_v56 = vsel %vm3845_vm2, %v1413_v48, %v1417_v34  ;;  %v3600_v4 = vld [vmem:[%s4236_s1 + $0x100] sm:$0xff]   ;;  %v1460_v8 = vsel %vm3845_vm2, %v1455_v5, %v1459_v2  ;;  %v1493_v34 = vshll.u32 %v2935_v23, 16  ;;  %v1509_v48 = vrot.slane %v1507_v39, 5  ;;  %v3622_v5 = vld [vmem:[%s3773_s14 + $0x8] ss:$8 sps:$4 sm:$0xff]  }
  0x53   : > { %3400 = vmatpush3.bf16.msra.mxu1 %v3587_v7  ;;  %3377 = vmatprep.subr.bf16.mxu0 %v3588_v10  ;;  %v2955_v63 = vcombine.low %v1418_v56, %v1432_v61  ;;  %v1446_v7 = vsel %vm3845_vm2, %v1441_v3, %v1445_v0  ;;  %v3612_v2 = vld [vmem:[%s4236_s1 + $0x1a0] sm:$0xff]  }
  0x54   : > { %3401 = vmatprep.subr.bf16.mxu1 %v3589_v13  ;;  %v2956_v20 = vcombine.low %v1446_v7, %v1460_v8  ;;  %v1510_v53 = vor.u32 %v1509_v48, %v1506_v47  ;;  %v3613_v3 = vld [vmem:[%s4236_s1 + $0x1e0] sm:$0xff]   ;;  %v3615_v7 = vld [vmem:[%s4236_s1 + $0x1d8] sm:$0xff]   ;;  %v3616_v8 = vld [vmem:[%s4236_s1 + $0x190] sm:$0xff]  }
  0x55   : > { %3346 = vmatmul.mubr.bf16.gmra.mxu0 %v2842_v14  ;;  %v2934_v14 = vld [vmem:[%s3773_s14 + $0xbc] sm:$0x1]  ;;  %v3635_v39 = vld [vmem:[%s3773_s14 + $0x80] ss:$8 sps:$4 sm:$0xff]  }
  0x56   : > { %3378 = vmatpush3.bf16.msra.mxu0 %v3588_v10  ;;  %3370 = vmatmul.mubr.bf16.gmra.mxu1 %v3591_v15  ;;  %v2931_v10 = vld [vmem:[%s3773_s14 + $0xb0] sm:$0xf]  ;;  %v1485_v22 = vshll.u32 %v2934_v14, 16  ;;  %v1511_v61 = vrot.slane %v1510_v53, 4  ;;  %v3624_v14 = vld [vmem:[%s3773_s14 + $0x18] ss:$8 sps:$4 sm:$0xff]  }
  0x57   : > { %3402 = vmatpush3.bf16.msra.mxu1 %v3589_v13  ;;  %3379 = vmatprep.subr.bf16.mxu0 %v3592_v16  ;;  %v3605_v13 = vld [vmem:[%s4236_s1 + $0x1f8] sm:$0xff]   ;;  %v1462_v15 = vshrl.u32 %v2931_v10, 16 }
  0x58   : > { %3403 = vmatprep.subr.bf16.mxu1 %v3593_v17  ;;  %3389 = vmatprep.mubr.bf16.mxu0 %v3602_v19  ;;  %v3603_v19 = vld [vmem:[%s3773_s14 + $0xe8] ss:$8 sps:$4 sm:$0xff]   ;;  %v1487_v31 = vrot.slane %v1485_v22, 5  ;;  %v1516_v0 = vsel %vm3845_vm2, %v1511_v61, %v1515_v54  ;;  %v3639_v61 = vld [vmem:[%s4239_s4 + $0x18] sm:$0xff]  }
  0x59   : > { %3413 = vmatprep.mubr.bf16.mxu1 %v2955_v63  ;;  %v1464_v25 = vrot.slane %v1462_v15, 4  ;;  %v3626_v15 = vld [vmem:[%s4236_s1 + $0x238] sm:$0xff]  }
  0x5a   : > { %3380 = vmatpush3.bf16.msra.mxu0 %v3592_v16  ;;  %v1465_v16 = vshll.u32 %v2931_v10, 16  ;;  %v3618_v10 = vld [vmem:[%s4236_s1 + $0x188] sm:$0xff]   ;;  %v3634_v22 = vld [vmem:[%s3773_s14 + $0x70] ss:$8 sps:$4 sm:$0xff]  }
  0x5b   : > { %3404 = vmatpush3.bf16.msra.mxu1 %v3593_v17  ;;  %3381 = vmatprep.subr.bf16.mxu0 %v3594_v18  ;;  %v1471_v17 = vshll.u32 %v2932_v11, 16  ;;  %v3619_v11 = vld [vmem:[%s4236_s1 + $0x1c8] sm:$0xff]  }
  0x5c   : > { %3405 = vmatprep.subr.bf16.mxu1 %v3595_v30  ;;  %v1467_v26 = vrot.slane %v1465_v16, 5  ;;  %v3627_v16 = vld [vmem:[%s4239_s4 + $0x38] sm:$0xff]  }
  0x5d   : > { %v1473_v27 = vrot.slane %v1471_v17, 5  ;;  %v3625_v17 = vld [vmem:[%s3773_s14 + $0x60] ss:$8 sps:$4 sm:$0xff]  }
  0x5e   : > { %3382 = vmatpush3.bf16.msra.mxu0 %v3594_v18  ;;  %v1476_v18 = vshrl.u32 %v2933_v12, 16  ;;  %v1468_v36 = vor.u32 %v1467_v26, %v1464_v25  ;;  %v3620_v12 = vld [vmem:[%s4236_s1 + $0x180] sm:$0xff]   ;;  %v3041_v25 = vld [vmem:[%s3773_s14 + $0x10] sm:$0xf]  ;;  %v3042_v26 = vld [vmem:[%s3773_s14 + $0x14] sm:$0x1] }
  0x5f   : > { %3406 = vmatpush3.bf16.msra.mxu1 %v3595_v30  ;;  %3383 = vmatprep.subr.bf16.mxu0 %v3596_v33  ;;  %v1481_v30 = vrot.slane %v1479_v21, 5  ;;  %v3632_v21 = vld [vmem:[%s4236_s1 + $0x228] sm:$0xff]  }
  0x60   : > { %3407 = vmatprep.subr.bf16.mxu1 %v3597_v43  ;;  %v1478_v28 = vrot.slane %v1476_v18, 4  ;;  %v1469_v46 = vrot.slane %v1468_v36, 4  ;;  %v3628_v18 = vld [vmem:[%s4236_s1 + $0x230] sm:$0xff]  }
  0x62   : > { %3384 = vmatpush3.bf16.msra.mxu0 %v3596_v33  ;;  %v1490_v33 = vshrl.u32 %v2935_v23, 16  ;;  %v1482_v41 = vor.u32 %v1481_v30, %v1478_v28  ;;  %v1474_v52 = vsel %vm3845_vm2, %v1469_v46, %v1473_v27  ;;  %v3039_v23 = vld [vmem:[%s3773_s14 + $0x8] sm:$0xf]  ;;  %v3631_v27 = vld [vmem:[%s3773_s14 + $0x38] ss:$8 sps:$4 sm:$0xff]   ;;  %v2039_v30 = vshll.u32 %v3040_v24, 16 }
  0x63   : > { %3408 = vmatpush3.bf16.msra.mxu1 %v3597_v43  ;;  %3385 = vmatprep.subr.bf16.mxu0 %v3598_v55  ;;  %v1495_v43 = vrot.slane %v1493_v34, 5  ;;  %v2030_v28 = vshrl.u32 %v3039_v23, 16  ;;  %v2033_v29 = vshll.u32 %v3039_v23, 16  ;;  %v2053_v34 = vshll.u32 %v3042_v26, 16 }
  0x64   : > { %3409 = vmatprep.subr.bf16.mxu1 %v3599_v60  ;;  %v1492_v42 = vrot.slane %v1490_v33, 4  ;;  %v1483_v49 = vrot.slane %v1482_v41, 4  ;;  %v2047_v33 = vshll.u32 %v3041_v25, 16  ;;  %v3045_v41 = vld [vmem:[%s3773_s14 + $0x20] sm:$0xf]  ;;  %v2058_v46 = vshrl.u32 %v3043_v38, 16 }
  0x65   : > { %v2035_v36 = vrot.slane %v2033_v29, 5  ;;  %v2055_v48 = vrot.slane %v2053_v34, 5  ;;  %v2075_v53 = vshll.u32 %v3045_v41, 16 }
  0x66   : > { %3386 = vmatpush3.bf16.msra.mxu0 %v3598_v55  ;;  %v1496_v50 = vor.u32 %v1495_v43, %v1492_v42  ;;  %v3610_v55 = vld [vmem:[%s4236_s1 + $0x1a8] sm:$0xff]   ;;  %v1488_v56 = vsel %vm3845_vm2, %v1483_v49, %v1487_v31  ;;  %v2044_v31 = vshrl.u32 %v3041_v25, 16  ;;  %v3636_v42 = vld [vmem:[%s4236_s1 + $0x220] sm:$0xff]  }
  0x67   : > { %3410 = vmatpush3.bf16.msra.mxu1 %v3599_v60  ;;  %3387 = vmatprep.subr.bf16.mxu0 %v3600_v4  ;;  %v2957_v60 = vcombine.low %v1474_v52, %v1488_v56  ;;  %v3637_v43 = vld [vmem:[%s4239_s4 + $0x20] sm:$0xff]   ;;  %v2072_v52 = vshrl.u32 %v3045_v41, 16 }
  0x68   : > { %3411 = vmatprep.subr.bf16.mxu1 %v3601_v6  ;;  %v1497_v57 = vrot.slane %v1496_v50, 4  ;;  %v2046_v37 = vrot.slane %v2044_v31, 4  ;;  %v3646_v49 = vld [vmem:[%s3773_s14 + $0xd8] ss:$8 sps:$4 sm:$0xff]   ;;  %v2061_v50 = vshll.u32 %v3043_v38, 16 }
  0x69   : > { %v3052_v38 = vld [vmem:[%s3773_s14 + $0x3c] sm:$0x1] }
  0x6a   : > { %3388 = vmatpush3.bf16.msra.mxu0 %v3600_v4  ;;  %v1502_v63 = vsel %vm3845_vm2, %v1497_v57, %v1501_v51  ;;  %v3614_v4 = vld [vmem:[%s4236_s1 + $0x198] sm:$0xff]   ;;  %v2060_v57 = vrot.slane %v2058_v46, 4 }
  0x6b   : > { %3412 = vmatpush3.bf16.msra.mxu1 %v3601_v6  ;;  %3421 = vmatprep.subr.bf16.mxu0 %v3604_v9  ;;  %v2958_v1 = vcombine.low %v1502_v63, %v1516_v0  ;;  %v3623_v6 = vld [vmem:[%s3773_s14 + $0x50] ss:$8 sps:$4 sm:$0xff]   ;;  %v3044_v63 = vld [vmem:[%s3773_s14 + $0x1c] sm:$0x1]  ;;  %v2063_v0 = vrot.slane %v2061_v50, 5  ;;  %v2123_v50 = vshll.u32 %v3052_v38, 16 }
  0x6c   : > { %3445 = vmatprep.subr.bf16.mxu1 %v3605_v13 }
  0x6d   : > { %3390 = vmatmul.mubr.bf16.vlgmr.msra.gmra.mxu0 %v3603_v19  ;;  %v3629_v19 = vld [vmem:[%s4239_s4 + $0x30] sm:$0xff]  }
  0x6e   : > { %3414 = vmatmul.mubr.bf16.vlgmr.msra.gmra.mxu1 %v2956_v20  ;;  %3422 = vmatpush3.bf16.msra.mxu0 %v3604_v9  ;;  %v3617_v9 = vld [vmem:[%s4236_s1 + $0x1d0] sm:$0xff]  }
  0x6f   : > { %3446 = vmatpush3.bf16.msra.mxu1 %v3605_v13  ;;  %3423 = vmatprep.subr.bf16.mxu0 %v3606_v40  ;;  %v3621_v13 = vld [vmem:[%s4236_s1 + $0x1c0] sm:$0xff]   ;;  %v3630_v20 = vld [vmem:[%s3773_s14 + $0x28] ss:$8 sps:$4 sm:$0xff]  }
  0x70   : > { %3447 = vmatprep.subr.bf16.mxu1 %v3607_v45  ;;  %3393 = vmatprep.mubr.bf16.mxu0 %v3608_v35  ;;  %v2032_v35 = vrot.slane %v2030_v28, 4 }
  0x71   : > { %3417 = vmatprep.mubr.bf16.mxu1 %v2957_v60  ;;  %v3049_v60 = vld [vmem:[%s3773_s14 + $0x30] sm:$0xf] }
  0x72   : > { %3424 = vmatpush3.bf16.msra.mxu0 %v3606_v40  ;;  %v2049_v40 = vrot.slane %v2047_v33, 5  ;;  %v2036_v44 = vor.u32 %v2035_v36, %v2032_v35  ;;  %v3644_v33 = vld [vmem:[%s4236_s1 + $0x200] sm:$0xff]  }
  0x73   : > { %3448 = vmatpush3.bf16.msra.mxu1 %v3607_v45  ;;  %3425 = vmatprep.subr.bf16.mxu0 %v3610_v55  ;;  %v2041_v45 = vrot.slane %v2039_v30, 5 }
  0x74   : > { %3449 = vmatprep.subr.bf16.mxu1 %v3611_v58  ;;  %v2050_v47 = vor.u32 %v2049_v40, %v2046_v37  ;;  %v2037_v51 = vrot.slane %v2036_v44, 4 }
  0x75   : > { %3394 = vmatmul.mubr.bf16.gmra.mxu0 %v3609_v62 }
  0x76   : > { %3426 = vmatpush3.bf16.msra.mxu0 %v3610_v55  ;;  %3418 = vmatmul.mubr.bf16.gmra.mxu1 %v2958_v1  ;;  %v2051_v54 = vrot.slane %v2050_v47, 4  ;;  %v3638_v55 = vld [vmem:[%s4236_s1 + $0x218] sm:$0xff]   ;;  %v2042_v56 = vsel %vm3845_vm2, %v2037_v51, %v2041_v45  ;;  %v3054_v47 = vld [vmem:[%s3773_s14 + $0x44] sm:$0x1] }
  0x77   : > { %3450 = vmatpush3.bf16.msra.mxu1 %v3611_v58  ;;  %3427 = vmatprep.subr.bf16.mxu0 %v3612_v2  ;;  %v3047_v58 = vld [vmem:[%s3773_s14 + $0x28] sm:$0xf] }
  0x78   : > { %3451 = vmatprep.subr.bf16.mxu1 %v3613_v3  ;;  %3437 = vmatprep.mubr.bf16.mxu0 %v3622_v5  ;;  %v2056_v62 = vsel %vm3845_vm2, %v2051_v54, %v2055_v48  ;;  %v2086_v1 = vshrl.u32 %v3047_v58, 16  ;;  %v2077_v5 = vrot.slane %v2075_v53, 5  ;;  %v3645_v48 = vld [vmem:[%s4239_s4] sm:$0xff]   ;;  %v2137_v54 = vshll.u32 %v3054_v47, 16 }
  0x79   : > { %3461 = vmatprep.mubr.bf16.mxu1 %v3623_v6  ;;  %v2100_v6 = vshrl.u32 %v3049_v60, 16 }
  0x7a   : > { %3428 = vmatpush3.bf16.msra.mxu0 %v3612_v2  ;;  %v2089_v2 = vshll.u32 %v3047_v58, 16  ;;  %v2125_v58 = vrot.slane %v2123_v50, 5 }
  0x7b   : > { %3452 = vmatpush3.bf16.msra.mxu1 %v3613_v3  ;;  %3429 = vmatprep.subr.bf16.mxu0 %v3614_v4  ;;  %v3071_v3 = vcombine.low %v2042_v56, %v2056_v62 }
  0x7c   : > { %3453 = vmatprep.subr.bf16.mxu1 %v3615_v7 }
  0x7e   : > { %3430 = vmatpush3.bf16.msra.mxu0 %v3614_v4  ;;  %v2074_v4 = vrot.slane %v2072_v52, 4 }
  0x7f   : > { %3454 = vmatpush3.bf16.msra.mxu1 %v3615_v7  ;;  %3431 = vmatprep.subr.bf16.mxu0 %v3616_v8  ;;  %v3046_v7 = vld [vmem:[%s3773_s14 + $0x24] sm:$0x1] }
  0x80   : > { %3455 = vmatprep.subr.bf16.mxu1 %v3617_v9 }
  0x82   : > { %3432 = vmatpush3.bf16.msra.mxu0 %v3616_v8  ;;  %v3048_v8 = vld [vmem:[%s3773_s14 + $0x2c] sm:$0x1] }
  0x83   : > { %3456 = vmatpush3.bf16.msra.mxu1 %v3617_v9  ;;  %3433 = vmatprep.subr.bf16.mxu0 %v3618_v10  ;;  %v2103_v9 = vshll.u32 %v3049_v60, 16  ;;  %v2095_v23 = vshll.u32 %v3048_v8, 16  ;;  %v3647_v60 = vld [vmem:[%s3773_s14 + $0xe8] ss:$8 sps:$4 sm:$0xff]  }
  0x84   : > { %3457 = vmatprep.subr.bf16.mxu1 %v3619_v11 }
  0x85   : > { %v2097_v44 = vrot.slane %v2095_v23, 5 }
  0x86   : > { %3434 = vmatpush3.bf16.msra.mxu0 %v3618_v10  ;;  %v3640_v10 = vld [vmem:[%s4236_s1 + $0x210] sm:$0xff]  }
  0x87   : > { %3458 = vmatpush3.bf16.msra.mxu1 %v3619_v11  ;;  %3435 = vmatprep.subr.bf16.mxu0 %v3620_v12  ;;  %v2088_v11 = vrot.slane %v2086_v1, 4  ;;  %v3648_v1 = vld [vmem:[%s3773_s14 + $0xf8] ss:$8 sps:$4 sm:$0xff]  }
  0x88   : > { %3459 = vmatprep.subr.bf16.mxu1 %v3621_v13 }
  0x8a   : > { %3436 = vmatpush3.bf16.msra.mxu0 %v3620_v12  ;;  %v2091_v12 = vrot.slane %v2089_v2, 5 }
  0x8b   : > { %3460 = vmatpush3.bf16.msra.mxu1 %v3621_v13  ;;  %3469 = vmatprep.subr.bf16.mxu0 %v3626_v15  ;;  %v2102_v13 = vrot.slane %v2100_v6, 4 }
  0x8c   : > { %3493 = vmatprep.subr.bf16.mxu1 %v3627_v16  ;;  %v2092_v28 = vor.u32 %v2091_v12, %v2088_v11 }
  0x8d   : > { %3438 = vmatmul.mubr.bf16.vlgmr.msra.gmra.mxu0 %v3624_v14  ;;  %v3051_v14 = vld [vmem:[%s3773_s14 + $0x38] sm:$0xf] }
  0x8e   : > { %3462 = vmatmul.mubr.bf16.vlgmr.msra.gmra.mxu1 %v3625_v17  ;;  %3470 = vmatpush3.bf16.msra.mxu0 %v3626_v15  ;;  %v3641_v15 = vld [vmem:[%s4239_s4 + $0x10] sm:$0xff]   ;;  %v2105_v17 = vrot.slane %v2103_v9, 5  ;;  %v2114_v24 = vshrl.u32 %v3051_v14, 16  ;;  %v2117_v25 = vshll.u32 %v3051_v14, 16 }
  0x8f   : > { %3494 = vmatpush3.bf16.msra.mxu1 %v3627_v16  ;;  %3471 = vmatprep.subr.bf16.mxu0 %v3628_v18  ;;  %v3050_v16 = vld [vmem:[%s3773_s14 + $0x34] sm:$0x1] }
  0x90   : > { %3495 = vmatprep.subr.bf16.mxu1 %v3629_v19  ;;  %3441 = vmatprep.mubr.bf16.mxu0 %v3630_v20  ;;  %v2067_v20 = vshll.u32 %v3044_v63, 16  ;;  %v2106_v29 = vor.u32 %v2105_v17, %v2102_v13  ;;  %v2109_v30 = vshll.u32 %v3050_v16, 16  ;;  %v2119_v40 = vrot.slane %v2117_v25, 5 }
  0x91   : > { %3465 = vmatprep.mubr.bf16.mxu1 %v3634_v22  ;;  %v2081_v22 = vshll.u32 %v3046_v7, 16 }
  0x92   : > { %3472 = vmatpush3.bf16.msra.mxu0 %v3628_v18  ;;  %v3053_v18 = vld [vmem:[%s3773_s14 + $0x40] sm:$0xf]  ;;  %v2069_v35 = vrot.slane %v2067_v20, 5  ;;  %v2107_v45 = vrot.slane %v2106_v29, 4  ;;  %v2111_v46 = vrot.slane %v2109_v30, 5 }
  0x93   : > { %3496 = vmatpush3.bf16.msra.mxu1 %v3629_v19  ;;  %3473 = vmatprep.subr.bf16.mxu0 %v3632_v21  ;;  %v2064_v19 = vor.u32 %v2063_v0, %v2060_v57  ;;  %v2128_v26 = vshrl.u32 %v3053_v18, 16  ;;  %v2131_v31 = vshll.u32 %v3053_v18, 16  ;;  %v2083_v37 = vrot.slane %v2081_v22, 5 }
  0x94   : > { %3497 = vmatprep.subr.bf16.mxu1 %v3633_v32  ;;  %v2112_v56 = vsel %vm3845_vm2, %v2107_v45, %v2111_v46  ;;  %v2139_v0 = vrot.slane %v2137_v54, 5 }
  0x95   : > { %3442 = vmatmul.mubr.bf16.gmra.mxu0 %v3631_v27  ;;  %v3642_v27 = vld [vmem:[%s4236_s1 + $0x208] sm:$0xff]   ;;  %v2065_v34 = vrot.slane %v2064_v19, 4  ;;  %v2130_v41 = vrot.slane %v2128_v26, 4 }
  0x96   : > { %3474 = vmatpush3.bf16.msra.mxu0 %v3632_v21  ;;  %3466 = vmatmul.mubr.bf16.gmra.mxu1 %v3635_v39  ;;  %v2078_v21 = vor.u32 %v2077_v5, %v2074_v4  ;;  %v2116_v39 = vrot.slane %v2114_v24, 4  ;;  %v3649_v5 = vld [vmem:[%s3773_s14 + $0x108] ss:$8 sps:$4 sm:$0xff]  }
  0x97   : > { %3498 = vmatpush3.bf16.msra.mxu1 %v3633_v32  ;;  %3475 = vmatprep.subr.bf16.mxu0 %v3636_v42  ;;  %v3643_v32 = vld [vmem:[%s4239_s4 + $0x8] sm:$0xff]  }
  0x98   : > { %3499 = vmatprep.subr.bf16.mxu1 %v3637_v43  ;;  %3509 = vmatprep.mubr.bf16.mxu1 %v3646_v49  ;;  %v2079_v36 = vrot.slane %v2078_v21, 4  ;;  %v2070_v49 = vsel %vm3845_vm2, %v2065_v34, %v2069_v35  ;;  %v2120_v52 = vor.u32 %v2119_v40, %v2116_v39 }
  0x99   : > { %3485 = vmatprep.mubr.bf16.mxu0 %v3071_v3 }
  0x9a   : > { %3476 = vmatpush3.bf16.msra.mxu0 %v3636_v42  ;;  %v2133_v42 = vrot.slane %v2131_v31, 5  ;;  %v2084_v51 = vsel %vm3845_vm2, %v2079_v36, %v2083_v37  ;;  %v2121_v62 = vrot.slane %v2120_v52, 4 }
  0x9b   : > { %3500 = vmatpush3.bf16.msra.mxu1 %v3637_v43  ;;  %3477 = vmatprep.subr.bf16.mxu0 %v3638_v55  ;;  %v2093_v43 = vrot.slane %v2092_v28, 4  ;;  %v3072_v57 = vcombine.low %v2070_v49, %v2084_v51 }
  0x9c   : > { %3501 = vmatprep.subr.bf16.mxu1 %v3639_v61  ;;  %v2134_v53 = vor.u32 %v2133_v42, %v2130_v41  ;;  %v2126_v2 = vsel %vm3845_vm2, %v2121_v62, %v2125_v58 }
  0x9e   : > { %3478 = vmatpush3.bf16.msra.mxu0 %v3638_v55  ;;  %v2098_v55 = vsel %vm3845_vm2, %v2093_v43, %v2097_v44  ;;  %v2135_v63 = vrot.slane %v2134_v53, 4 }
  0x9f   : > { %3502 = vmatpush3.bf16.msra.mxu1 %v3639_v61  ;;  %3479 = vmatprep.subr.bf16.mxu0 %v3640_v10  ;;  %v3073_v61 = vcombine.low %v2098_v55, %v2112_v56 }
  0xa0   : > { %3503 = vmatprep.subr.bf16.mxu1 %v3641_v15  ;;  %v2140_v3 = vsel %vm3845_vm2, %v2135_v63, %v2139_v0 }
  0xa1   : > { %v3074_v4 = vcombine.low %v2126_v2, %v2140_v3 }
  0xa2   : > { %3480 = vmatpush3.bf16.msra.mxu0 %v3640_v10 }
  0xa3   : > { %3504 = vmatpush3.bf16.msra.mxu1 %v3641_v15  ;;  %3481 = vmatprep.subr.bf16.mxu0 %v3642_v27 }
  0xa4   : > { %3505 = vmatprep.subr.bf16.mxu1 %v3643_v32 }
  0xa6   : > { %3482 = vmatpush3.bf16.msra.mxu0 %v3642_v27 }
  0xa7   : > { %3506 = vmatpush3.bf16.msra.mxu1 %v3643_v32  ;;  %3483 = vmatprep.subr.bf16.mxu0 %v3644_v33 }
  0xa8   : > { %3507 = vmatprep.subr.bf16.mxu1 %v3645_v48 }
  0xaa   : > { %3484 = vmatpush3.bf16.msra.mxu0 %v3644_v33 }
  0xab   : > { %3508 = vmatpush3.bf16.msra.mxu1 %v3645_v48 }
  0xad   : > { %3486 = vmatmul.mubr.bf16.vlgmr.msra.gmra.mxu0 %v3072_v57 }
  0xae   : > { %3510 = vmatmul.mubr.bf16.vlgmr.msra.gmra.mxu1 %v3647_v60  ;;  %3489 = vmatprep.mubr.bf16.mxu0 %v3073_v61 }
  0xaf   : > { %3513 = vmatprep.mubr.bf16.mxu1 %v3648_v1 }
  0xb5   : > { %3490 = vmatmul.mubr.bf16.gmra.mxu0 %v3074_v4 }
  0xb6   : > { %3514 = vmatmul.mubr.bf16.gmra.mxu1 %v3649_v5 }
  0xed   : > { %v3295_v6 = vpop.f32.mrf.mxu0 }
  0xee   : > { %v3319_v8 = vpop.f32.mrf.mxu1 }
  0xef   : > { %v594_v7 = vpop.f32.mrf.mxu0  ;;  %v740_v58 = vadd.f32 %v3319_v8, %v3295_v6 }
  0xf0   : > { %v731_v10 = vpop.f32.mrf.mxu1 }
  0xf1   : > { %v3296_v9 = vpop.f32.mrf.mxu0  ;;  %v732_v62 = vadd.f32 %v731_v10, %v594_v7 }
  0xf2   : > { %v3320_v13 = vpop.f32.mrf.mxu1 }
  0xf3   : > { %v597_v11 = vpop.f32.mrf.mxu0  ;;  %v743_v0 = vadd.f32 %v3320_v13, %v3296_v9 }
  0xf4   : > { %v734_v15 = vpop.f32.mrf.mxu1 }
  0xf5   : > { %v3299_v12 = vpop.f32.mrf.mxu0  ;;  %v735_v4 = vadd.f32 %v734_v15, %v597_v11 }
  0xf6   : > { %v3323_v16 = vpop.f32.mrf.mxu1 }
  0xf7   : > { %v610_v14 = vpop.f32.mrf.mxu0 }
  0xf8   : > { %v747_v59 = vpop.f32.mrf.mxu1 }
  0xf9   : > { %v4118_v17 = vpop.f32.mrf.mxu0 }
  0xfa   : > { %4246 = vst [vmem:[#allocation2_spill] sm:$0xff] %v4118_v17  ;;  %v3324_v20 = vpop.f32.mrf.mxu1  ;;  %v748_v17 = vadd.f32 %v747_v59, %v610_v14 }
  0xfb   : > { %v4120_v18 = vpop.f32.mrf.mxu0 }
  0xfc   : > { %4247 = vst [vmem:[#allocation3_spill] sm:$0xff] %v4120_v18  ;;  %v750_v22 = vpop.f32.mrf.mxu1 }
 0x101   : > { %v4253_v9 = vld [vmem:[#allocation2_spill] sm:$0xff] }
 0x102   : > { %v759_v13 = vadd.f32 %v3324_v20, %v4253_v9 }
 0x10d   : > { %v3343_v19 = vpop.f32.mrf.mxu0 }
 0x10e   : > { %v3367_v23 = vpop.f32.mrf.mxu1  ;;  %v1041_v63 = vadd.f32 %v3343_v19, %v740_v58  ;;  %v4254_v58 = vld [vmem:[#allocation3_spill] sm:$0xff] }
 0x10f   : > { %v1008_v21 = vpop.f32.mrf.mxu0  ;;  %v751_v11 = vadd.f32 %v750_v22, %v4254_v58 }
 0x110   : > { %v1179_v25 = vpop.f32.mrf.mxu1  ;;  %v1039_v1 = vadd.f32 %v1008_v21, %v732_v62  ;;  %v1212_v5 = vadd.f32 %v3367_v23, %v1041_v63 }
 0x111   : > { %v3344_v24 = vpop.f32.mrf.mxu0 }
 0x112   : > { %v3368_v27 = vpop.f32.mrf.mxu1 }
 0x113   : > { %v1011_v26 = vpop.f32.mrf.mxu0 }
 0x114   : > { %v1182_v29 = vpop.f32.mrf.mxu1 }
 0x115   : > { %v3347_v28 = vpop.f32.mrf.mxu0 }
 0x116   : > { %v3371_v31 = vpop.f32.mrf.mxu1 }
 0x117   : > { %v1024_v30 = vpop.f32.mrf.mxu0 }
 0x118   : > { %v1195_v33 = vpop.f32.mrf.mxu1  ;;  %v1043_v21 = vadd.f32 %v1024_v30, %v748_v17 }
 0x119   : > { %v3348_v32 = vpop.f32.mrf.mxu0 }
 0x11a   : > { %v4122_v35 = vpop.f32.mrf.mxu1 }
 0x11b   : > { %v1027_v34 = vpop.f32.mrf.mxu0  ;;  %4248 = vst [vmem:[#allocation4_spill] sm:$0xff] %v4122_v35  ;;  %v1040_v35 = vadd.f32 %v1011_v26, %v735_v4 }
 0x11c   : > { %v4124_v37 = vpop.f32.mrf.mxu1 }
 0x11d   : > { %4249 = vst [vmem:[#allocation5_spill] sm:$0xff] %v4124_v37  ;;  %v1210_v37 = vadd.f32 %v1179_v25, %v1039_v1  ;;  %v1211_v15 = vadd.f32 %v1182_v29, %v1040_v35  ;;  %v1044_v25 = vadd.f32 %v1027_v34, %v751_v11  ;;  %v4147_v34 = vld [vmem:[%s4240_s5] ss:$0 sm:$0xff] }
 0x122   : > { %v4255_v20 = vld [vmem:[#allocation4_spill] sm:$0xff] }
 0x124   : > { %v4256_v29 = vld [vmem:[#allocation5_spill] sm:$0xff] }
 0x12d   : > { %v3391_v36 = vpop.f32.mrf.mxu0 }
 0x12e   : > { %v3415_v39 = vpop.f32.mrf.mxu1  ;;  %v1383_v18 = vadd.f32 %v3391_v36, %v1212_v5 }
 0x12f   : > { %v1350_v38 = vpop.f32.mrf.mxu0 }
 0x130   : > { %v1632_v41 = vpop.f32.mrf.mxu1  ;;  %v1381_v10 = vadd.f32 %v1350_v38, %v1210_v37  ;;  %v1665_v23 = vadd.f32 %v3415_v39, %v1383_v18  ;;  %v1215_v18 = vadd.f32 %v4256_v29, %v1044_v25 }
 0x131   : > { %v3392_v40 = vpop.f32.mrf.mxu0 }
 0x132   : > { %v3416_v43 = vpop.f32.mrf.mxu1  ;;  %v1663_v26 = vadd.f32 %v1632_v41, %v1381_v10 }
 0x133   : > { %v1353_v42 = vpop.f32.mrf.mxu0 }
 0x134   : > { %v1635_v45 = vpop.f32.mrf.mxu1  ;;  %v1382_v14 = vadd.f32 %v1353_v42, %v1211_v15  ;;  %v4152_v42 = vld [vmem:[%s4237_s2] ss:$0 sm:$0xff] }
 0x135   : > { %v3395_v44 = vpop.f32.mrf.mxu0 }
 0x136   : > { %v3419_v46 = vpop.f32.mrf.mxu1  ;;  %v1664_v35 = vadd.f32 %v1635_v45, %v1382_v14 }
 0x137   : > { %v1366_v47 = vpop.f32.mrf.mxu0 }
 0x138   : > { %v4126_v48 = vpop.f32.mrf.mxu1 }
 0x139   : > { %4250 = vst [vmem:[#allocation6_spill] sm:$0xff] %v4126_v48  ;;  %v3396_v49 = vpop.f32.mrf.mxu0 }
 0x13a   : > { %v4128_v50 = vpop.f32.mrf.mxu1 }
 0x13b   : > { %4251 = vst [vmem:[#allocation7_spill] sm:$0xff] %v4128_v50  ;;  %v1369_v51 = vpop.f32.mrf.mxu0  ;;  %v1042_v50 = vadd.f32 %v3344_v24, %v743_v0 }
 0x13c   : > { %v4130_v53 = vpop.f32.mrf.mxu1 }
 0x13d   : > { %4252 = vst [vmem:[#allocation8_spill] sm:$0xff] %v4130_v53  ;;  %v756_v53 = vadd.f32 %v3323_v16, %v3299_v12  ;;  %v1213_v7 = vadd.f32 %v3368_v27, %v1042_v50  ;;  %v1046_v12 = vadd.f32 %v3348_v32, %v759_v13  ;;  %v1214_v27 = vadd.f32 %v1195_v33, %v1043_v21 }
 0x13f   : > { %v1045_v6 = vadd.f32 %v3347_v28, %v756_v53  ;;  %v1384_v24 = vadd.f32 %v3392_v40, %v1213_v7  ;;  %v1217_v17 = vadd.f32 %v4255_v20, %v1046_v12  ;;  %v1385_v30 = vadd.f32 %v1366_v47, %v1214_v27 }
 0x141   : > { %v1216_v62 = vadd.f32 %v3371_v31, %v1045_v6  ;;  %v1666_v37 = vadd.f32 %v3416_v43, %v1384_v24  ;;  %v1388_v33 = vadd.f32 %v3396_v49, %v1217_v17  ;;  %v1386_v43 = vadd.f32 %v1369_v51, %v1215_v18  ;;  %v4160_v49 = vld [vmem:[%s4241_s6] ss:$0 sm:$0xff] }
 0x143   : > { %v1387_v36 = vadd.f32 %v3395_v44, %v1216_v62 }
 0x145   : > { %v1669_v40 = vadd.f32 %v3419_v46, %v1387_v36 }
 0x14d   : > { %v3439_v52 = vpop.f32.mrf.mxu0 }
 0x14e   : > { %v3463_v54 = vpop.f32.mrf.mxu1  ;;  %v1836_v59 = vadd.f32 %v3439_v52, %v1665_v23  ;;  %v4257_v52 = vld [vmem:[#allocation6_spill] sm:$0xff] }
 0x14f   : > { %v1803_v55 = vpop.f32.mrf.mxu0  ;;  %v1667_v53 = vadd.f32 %v4257_v52, %v1385_v30 }
 0x150   : > { %v1974_v56 = vpop.f32.mrf.mxu1  ;;  %v1834_v38 = vadd.f32 %v1803_v55, %v1663_v26  ;;  %v2007_v31 = vadd.f32 %v3463_v54, %v1836_v59 }
 0x151   : > { %v3440_v57 = vpop.f32.mrf.mxu0 }
 0x152   : > { %v3464_v60 = vpop.f32.mrf.mxu1  ;;  %v1837_v32 = vadd.f32 %v3440_v57, %v1666_v37  ;;  %v2005_v44 = vadd.f32 %v1974_v56, %v1834_v38 }
 0x153   : > { %v1806_v61 = vpop.f32.mrf.mxu0 }
 0x154   : > { %v4132_v2 = vpop.f32.mrf.mxu1  ;;  %v1835_v47 = vadd.f32 %v1806_v61, %v1664_v35  ;;  %v2008_v63 = vadd.f32 %v3464_v60, %v1837_v32  ;;  %v4258_v61 = vld [vmem:[#allocation7_spill] sm:$0xff]  ;;  %v4259_v60 = vld [vmem:[#allocation8_spill] sm:$0xff] }
 0x155   : > { %v3443_v3 = vpop.f32.mrf.mxu0  ;;  %v1670_v0 = vadd.f32 %v4258_v61, %v1388_v33  ;;  %v1668_v5 = vadd.f32 %v4259_v60, %v1386_v43 }
 0x156   : > { %v4134_v48 = vpop.f32.mrf.mxu1  ;;  %v1840_v54 = vadd.f32 %v3443_v3, %v1669_v40  ;;  %v4166_v3 = vld [vmem:[%s4238_s3] ss:$0 sm:$0xff]  ;;  %v2006_v6 = vadd.f32 %v4132_v2, %v1835_v47 }
 0x157   : > { %v1819_v8 = vpop.f32.mrf.mxu0 }
 0x158   : > { %v4136_v19 = vpop.f32.mrf.mxu1  ;;  %v1838_v1 = vadd.f32 %v1819_v8, %v1667_v53  ;;  %v2011_v13 = vadd.f32 %v4134_v48, %v1840_v54 }
 0x159   : > { %v3444_v16 = vpop.f32.mrf.mxu0 }
 0x15a   : > { %v4140_v28 = vpop.f32.mrf.mxu1  ;;  %v1841_v15 = vadd.f32 %v3444_v16, %v1670_v0  ;;  %v2009_v12 = vadd.f32 %v4136_v19, %v1838_v1 }
 0x15b   : > { %v1822_v22 = vpop.f32.mrf.mxu0 }
 0x15c   : > { %v1993_v39 = vpop.f32.mrf.mxu1  ;;  %v1839_v25 = vadd.f32 %v1822_v22, %v1668_v5  ;;  %v2012_v32 = vadd.f32 %v4140_v28, %v1841_v15 }
 0x15e   : > { %v2010_v40 = vadd.f32 %v1993_v39, %v1839_v25 }
 0x16d   : > { %v3487_v41 = vpop.f32.mrf.mxu0 }
 0x16e   : > { %v2289_v45 = vadd.f32 %v3487_v41, %v2007_v31  ;;  %v3511_v50 = vpop.f32.mrf.mxu1 }
 0x16f   : > { %v2519_v55 = vmul.f32 %v3511_v50, %v4147_v34  ;;  %v2256_v57 = vpop.f32.mrf.mxu0 }
 0x170   : > { %v2304_v46 = vmul.f32 %v4152_v42, %v2289_v45  ;;  %v2287_v51 = vadd.f32 %v2256_v57, %v2005_v44  ;;  %v2479_v56 = vpop.f32.mrf.mxu1 }
 0x171   : > { %v3488_v4 = vpop.f32.mrf.mxu0  ;;  %v2534_v21 = vadd.f32 %v4160_v49, %v2519_v55  ;;  %v2517_v8 = vmul.f32 %v4147_v34, %v2479_v56 }
 0x172   : > { %v2302_v7 = vmul.f32 %v4152_v42, %v2287_v51  ;;  %v2290_v10 = vadd.f32 %v3488_v4, %v2008_v63  ;;  %v3512_v9 = vpop.f32.mrf.mxu1  ;;  %v2319_v23 = vadd.f32 %v4166_v3, %v2304_v46 }
 0x173   : > { %v2520_v58 = vmul.f32 %v3512_v9, %v4147_v34  ;;  %v2259_v11 = vpop.f32.mrf.mxu0  ;;  %v2532_v37 = vadd.f32 %v4160_v49, %v2517_v8 }
 0x174   : > { %v2305_v2 = vmul.f32 %v4152_v42, %v2290_v10  ;;  %v2288_v24 = vadd.f32 %v2259_v11, %v2006_v6  ;;  %v2482_v62 = vpop.f32.mrf.mxu1  ;;  %v2317_v59 = vadd.f32 %v4166_v3, %v2302_v7  ;;  %v2327_v22 = vmax.f32 %v2319_v23, 0.0 }
 0x175   : > { %v2535_v48 = vadd.f32 %v4160_v49, %v2520_v58  ;;  %v2518_v26 = vmul.f32 %v4147_v34, %v2482_v62  ;;  %v3491_v14 = vpop.f32.mrf.mxu0 }
 0x176   : > { %v2320_v27 = vadd.f32 %v4166_v3, %v2305_v2  ;;  %v2303_v16 = vmul.f32 %v4152_v42, %v2288_v24  ;;  %v2293_v19 = vadd.f32 %v3491_v14, %v2011_v13  ;;  %v3515_v36 = vpop.f32.mrf.mxu1  ;;  %v2325_v44 = vmax.f32 %v2317_v59, 0.0 }
 0x177   : > { %v3139_v38 = vpack.c.bf16 %v2535_v48, %v2534_v21  ;;  %v2533_v20 = vadd.f32 %v4160_v49, %v2518_v26  ;;  %v2523_v17 = vmul.f32 %v3515_v36, %v4147_v34  ;;  %v2272_v30 = vpop.f32.mrf.mxu0 }
 0x178   : > { %v2328_v29 = vmax.f32 %v2320_v27, 0.0  ;;  %v2318_v18 = vadd.f32 %v4166_v3, %v2303_v16  ;;  %v2291_v35 = vadd.f32 %v2272_v30, %v2009_v12  ;;  %v2495_v31 = vpop.f32.mrf.mxu1  ;;  %v2308_v41 = vmul.f32 %v4152_v42, %v2293_v19 }
 0x179   : > { %3154 = vst [vmem:[%s4188_s11 + $0x8] sm:$0xff] %v3139_v38   ;;  %v3134_v33 = vpack.c.bf16 %v2533_v20, %v2532_v37  ;;  %v3492_v43 = vpop.f32.mrf.mxu0  ;;  %v2538_v39 = vadd.f32 %v4160_v49, %v2523_v17  ;;  %v2521_v52 = vmul.f32 %v4147_v34, %v2495_v31 }
 0x17a   : > { %v3119_v47 = vpack.c.bf16 %v2328_v29, %v2327_v22  ;;  %v2326_v45 = vmax.f32 %v2318_v18, 0.0  ;;  %v2306_v50 = vmul.f32 %v4152_v42, %v2291_v35  ;;  %v3516_v28 = vpop.f32.mrf.mxu1  ;;  %v2294_v53 = vadd.f32 %v3492_v43, %v2012_v32 }
 0x17b   : > { %3135 = vst [vmem:[%s4188_s11] sm:$0xff] %v3134_v33   ;;  %v2524_v54 = vmul.f32 %v3516_v28, %v4147_v34  ;;  %v2275_v55 = vpop.f32.mrf.mxu0  ;;  %v2323_v51 = vadd.f32 %v4166_v3, %v2308_v41  ;;  %v2536_v60 = vadd.f32 %v4160_v49, %v2521_v52 }
 0x17c   : > { %3151 = vst [vmem:[%s4201_s15 + $0x8] sm:$0xff] %v3119_v47   ;;  %v3114_v57 = vpack.c.bf16 %v2326_v45, %v2325_v44  ;;  %v2292_v63 = vadd.f32 %v2275_v55, %v2010_v40  ;;  %v2498_v46 = vpop.f32.mrf.mxu1  ;;  %v2309_v56 = vmul.f32 %v4152_v42, %v2294_v53  ;;  %v2321_v1 = vadd.f32 %v4166_v3, %v2306_v50 }
 0x17d   : > { %v2539_v61 = vadd.f32 %v4160_v49, %v2524_v54  ;;  %v2522_v0 = vmul.f32 %v4147_v34, %v2498_v46  ;;  %v2331_v9 = vmax.f32 %v2323_v51, 0.0 }
 0x17e   : > { %3115 = vst [vmem:[%s4201_s15] sm:$0xff] %v3114_v57   ;;  %v2307_v4 = vmul.f32 %v4152_v42, %v2292_v63  ;;  %v2324_v5 = vadd.f32 %v4166_v3, %v2309_v56  ;;  %v2329_v21 = vmax.f32 %v2321_v1, 0.0 }
 0x17f   : > { %v3149_v6 = vpack.c.bf16 %v2539_v61, %v2538_v39  ;;  %v2537_v7 = vadd.f32 %v4160_v49, %v2522_v0 }
 0x180   : > { %v2322_v10 = vadd.f32 %v4166_v3, %v2307_v4  ;;  %v2332_v13 = vmax.f32 %v2324_v5, 0.0 }
 0x181   : > { %3156 = vst [vmem:[%s4188_s11 + $0x18] sm:$0xff] %v3149_v6   ;;  %v3144_v34 = vpack.c.bf16 %v2537_v7, %v2536_v60 }
 0x182   : > { %v2330_v8 = vmax.f32 %v2322_v10, 0.0  ;;  %v3129_v58 = vpack.c.bf16 %v2332_v13, %v2331_v9 }
 0x183   : > { %3155 = vst [vmem:[%s4188_s11 + $0x10] sm:$0xff] %v3144_v34  }
 0x184   : > { %v3124_v11 = vpack.c.bf16 %v2330_v8, %v2329_v21  ;;  %3153 = vst [vmem:[%s4201_s15 + $0x18] sm:$0xff] %v3129_v58  }
 0x186   : > { %3152 = vst [vmem:[%s4201_s15 + $0x10] sm:$0xff] %v3124_v11  }
 0x187 PF: > { %s19_s29 = sadd.s32 1, %s3672_s29   ;;  %s4260_s27 = smov %s3668_s28 }
 0x188   : > { %p16_p5 = scmp.ge.s32.totalorder %s19_s29, 4   ;;  %s4261_s28 = smov %s4263_s30 }
 0x18a   :  { %18 = sbr.rel (!%p16_p5) target bundleno = 2 (0x2), region = 121 }

// kernel: enhanced_res_block_forward.4
= control target key start
LH: loop header
LB: loop body
LE: loop exit
PB: predicated region body
PF: predicated region fallthrough
CT: control target
= control target key end

     0   :  { %s3467_s18 = smov 0   ;;  %s3469_s19 = smov 0   ;;  %s4110_s0 = inlined_call_operand.vmem [shape: bf16[2,8,8,128], index: 0, kind: input, shape index: {}]   ;;  %s4111_s1 = inlined_call_operand.vmem [shape: bf16[9,128,128], index: 1, kind: input, shape index: {}]   ;;  %s4112_s2 = inlined_call_operand.vmem [shape: f32[1,128], index: 2, kind: input, shape index: {}]   ;;  %s4113_s3 = inlined_call_operand.vmem [shape: f32[1,128], index: 3, kind: input, shape index: {}]   ;;  %s4114_s4 = inlined_call_operand.vmem [shape: bf16[2,8,8,128], index: 4, kind: output, shape index: {0}]   ;;  %s4115_s5 = inlined_call_operand.vmem [shape: f32[2,8,128], index: 5, kind: output, shape index: {1}]  }
   0x1   :  { %s3471_s20 = smov 0  }
   0x2 LB: > { %s28_s21 = sadd.s32 1, %s3430_s19  ;;  %p2668_p0 = scmp.ge.s32.totalorder %s3434_s20, 1  ;;  %s3434_s20 = sphi %s3471_s20, %s16_s20   ;;  %s3430_s19 = sphi %s3469_s19, %s4139_s19   ;;  %s3426_s18 = sphi %s3467_s18, %s4138_s18  }
   0x3   : > { %p30_p1 = scmp.ge.s32.totalorder %s28_s21, 2  ;;  %p231_p2 = scmp.lt.s32.totalorder %s3434_s20, 3 }
   0x5   : > { %s4141_s21 = smov (%p30_p1, %s28_s21), 0  ;;  %p232_p3 = pnand %p2668_p0, %p231_p2 }
   0x7   : > { %235 = sbr.rel (%p232_p3) target bundleno = 416 (0x1a0), region = 36 }
   0xc   : > { %v3328_v0 = vld [vmem:[%s4111_s1 + $0x78] sm:$0xff]   ;;  %v3330_v2 = vld [vmem:[%s4111_s1 + $0x70] sm:$0xff]   ;;  %p279_p4 = scmp.lt.s32.totalorder %s3426_s18, 1  ;;  %v3436_v3 = vmov 0   ;;  %v3332_v5 = vld [vmem:[%s4111_s1 + $0x68] sm:$0xff]   ;;  %vm419_vm0 = vcmask 1043456  }
   0xd   : > { %v3329_v1 = vld [vmem:[%s4111_s1 + $0x38] sm:$0xff]   ;;  %3071 = vmatprep.subr.bf16.mxu0 %v3328_v0  ;;  %310 = vst [vmem:[#allocation2] sm:$0xf] %v3436_v3  ;;  %311 = vst [vmem:[#allocation2 + $0x4] sm:$0x1] %v3436_v3  ;;  %v3331_v4 = vld [vmem:[%s4111_s1 + $0x30] sm:$0xff]  }
   0xe   : > { %312 = vst [vmem:[#allocation2 + $0x8] sm:$0xf] %v3436_v3  ;;  %313 = vst [vmem:[#allocation2 + $0xc] sm:$0x1] %v3436_v3  ;;  %3095 = vmatprep.subr.bf16.mxu1 %v3329_v1  ;;  %3072 = vmatpush3.bf16.msra.mxu0 %v3328_v0  ;;  %v3333_v6 = vld [vmem:[%s4111_s1 + $0x28] sm:$0xff]   ;;  %s4143_s18 = smov (!%p279_p4, %s3426_s18), 1 }
   0xf   : > { %314 = vst [vmem:[#allocation2 + $0x10] sm:$0xf] %v3436_v3  ;;  %315 = vst [vmem:[#allocation2 + $0x14] sm:$0x1] %v3436_v3  ;;  %3096 = vmatpush3.bf16.msra.mxu1 %v3329_v1  ;;  %3073 = vmatprep.subr.bf16.mxu0 %v3330_v2  ;;  %v3334_v7 = vld [vmem:[%s4111_s1 + $0x60] sm:$0xff]   ;;  %s2938_s13 = sshll.u32 %s4143_s18, 5 }
  0x10   : > { %316 = vst [vmem:[#allocation2 + $0x18] sm:$0xf] %v3436_v3  ;;  %317 = vst [vmem:[#allocation2 + $0x1c] sm:$0x1] %v3436_v3  ;;  %3097 = vmatprep.subr.bf16.mxu1 %v3331_v4  ;;  %v3335_v8 = vld [vmem:[%s4111_s1 + $0x20] sm:$0xff]   ;;  %v3336_v9 = vld [vmem:[%s4111_s1 + $0x58] sm:$0xff]   ;;  %s3529_s24 = scalar_lea.vmem %s4110_s0, %s2938_s13 }
  0x11   : > { %318 = vst [vmem:[#allocation2 + $0x20] sm:$0xf] %v3436_v3  ;;  %319 = vst [vmem:[#allocation2 + $0x24] sm:$0x1] %v3436_v3  ;;  %v3337_v10 = vld [vmem:[%s4111_s1 + $0x18] sm:$0xff]   ;;  %v3338_v11 = vld [vmem:[%s4111_s1 + $0x50] sm:$0xff]  }
  0x12   : > { %320 = vst [vmem:[#allocation2 + $0x28] sm:$0xf] %v3436_v3  ;;  %321 = vst [vmem:[#allocation2 + $0x2c] sm:$0x1] %v3436_v3  ;;  %3074 = vmatpush3.bf16.msra.mxu0 %v3330_v2  ;;  %v330_v12 = vld [vmem:[%s3529_s24] sm:$0xf] }
  0x13   : > { %322 = vst [vmem:[#allocation2 + $0x30] sm:$0xf] %v3436_v3  ;;  %323 = vst [vmem:[#allocation2 + $0x34] sm:$0x1] %v3436_v3  ;;  %3098 = vmatpush3.bf16.msra.mxu1 %v3331_v4  ;;  %3075 = vmatprep.subr.bf16.mxu0 %v3332_v5  ;;  %vm420_vm1 = vsmask.f32 7938 }
  0x14   : > { %324 = vst [vmem:[#allocation2 + $0x38] sm:$0xf] %v3436_v3  ;;  %325 = vst [vmem:[#allocation2 + $0x3c] sm:$0x1] %v3436_v3  ;;  %3099 = vmatprep.subr.bf16.mxu1 %v3333_v6  ;;  %v3339_v13 = vld [vmem:[%s4111_s1 + $0x10] sm:$0xff]   ;;  %v339_v14 = vshrl.u32 %v330_v12, 16 }
  0x15   : > { %326 = vst [vmem:[#allocation2 + $0x40] sm:$0xf] %v3436_v3  ;;  %327 = vst [vmem:[#allocation2 + $0x44] sm:$0x1] %v3436_v3  ;;  %v342_v15 = vshll.u32 %v330_v12, 16  ;;  %vm425_vm2 = vcmask 1040384  }
  0x16   : > { %328 = vst [vmem:[#allocation2 + $0x48] sm:$0xf] %v3436_v3  ;;  %329 = vst [vmem:[#allocation2 + $0x4c] sm:$0x1] %v3436_v3  ;;  %3076 = vmatpush3.bf16.msra.mxu0 %v3332_v5  ;;  %vm426_vm3 = vsmask.f32 256 }
  0x17   : > { %3100 = vmatpush3.bf16.msra.mxu1 %v3333_v6  ;;  %3077 = vmatprep.subr.bf16.mxu0 %v3334_v7  ;;  %v422_v16 = vld [vmem:[#allocation2 + $0x8] sm:$0xf]  ;;  %v3538_v17 = vld [vmem:[#allocation2] sm:$0xf]  ;;  %v341_v19 = vrot.slane %v339_v14, 7  ;;  %vm3543_vm4 = vmand %vm419_vm0, %vm420_vm1  ;;  %vm927_vm9 = vcmask 1042432  }
  0x18   : > { %3101 = vmatprep.subr.bf16.mxu1 %v3335_v8  ;;  %v3340_v18 = vld [vmem:[%s4111_s1 + $0x48] sm:$0xff]   ;;  %v509_v22 = vshrl.u32 %v3538_v17, 16  ;;  %v512_v23 = vshll.u32 %v3538_v17, 16  ;;  %vm3549_vm5 = vmand %vm425_vm2, %vm426_vm3  ;;  %v331_v25 = vld [vmem:[%s3529_s24 + $0x4] sm:$0xf]  ;;  %vm928_vm10 = vcmask 1046532  }
  0x19   : > { %v428_v21 = vld [vmem:[#allocation2 + $0xc] sm:$0x1]  ;;  %v332_v26 = vld [vmem:[%s3529_s24 + $0x8] sm:$0xf]  ;;  %v344_v28 = vor.u32 %v342_v15, %v341_v19  ;;  %v345_v29 = vrot.slane %v341_v19, 4  ;;  %v3342_v30 = vld [vmem:[%s4111_s1 + $0x40] sm:$0xff]  }
  0x1a   : > { %3078 = vmatpush3.bf16.msra.mxu0 %v3334_v7  ;;  %v3341_v27 = vld [vmem:[%s4111_s1 + $0x8] sm:$0xff]   ;;  %v511_v31 = vrot.slane %v509_v22, 4  ;;  %v347_v32 = vshrl.u32 %v331_v25, 16  ;;  %v350_v33 = vshll.u32 %v331_v25, 16  ;;  %v355_v34 = vshrl.u32 %v332_v26, 16  ;;  %v3343_v35 = vld [vmem:[%s4111_s1] sm:$0xff]   ;;  %vm3691_vm11 = vmor %vm927_vm9, %vm928_vm10 }
  0x1b   : > { %3102 = vmatpush3.bf16.msra.mxu1 %v3335_v8  ;;  %3079 = vmatprep.subr.bf16.mxu0 %v3336_v9  ;;  %v423_v36 = vsel %vm3543_vm4, %v344_v28, %v422_v16  ;;  %v429_v37 = vsel %vm3549_vm5, %v345_v29, %v428_v21  ;;  %v514_v38 = vrot.slane %v512_v23, 5  ;;  %v358_v39 = vshll.u32 %v332_v26, 16  ;;  %v431_v40 = vld [vmem:[#allocation2 + $0x10] sm:$0xf]  ;;  %v434_v41 = vld [vmem:[#allocation2 + $0x14] sm:$0x1] }
  0x1c   : > { %3103 = vmatprep.subr.bf16.mxu1 %v3337_v10  ;;  %v437_v42 = vld [vmem:[#allocation2 + $0x18] sm:$0xf]  ;;  %424 = vst [vmem:[#allocation2 + $0x8] sm:$0xf] %v423_v36  ;;  %430 = vst [vmem:[#allocation2 + $0xc] sm:$0x1] %v429_v37 }
  0x1d   : > { %vm505_vm6 = vsmask.f32 3328  ;;  %v349_v43 = vrot.slane %v347_v32, 7  ;;  %v357_v44 = vrot.slane %v355_v34, 7  ;;  %v3568_v45 = vld [vmem:[#allocation2 + $0x4] sm:$0x1]  ;;  %v515_v57 = vor.u32 %v514_v38, %v511_v31 }
  0x1e   : > { %3080 = vmatpush3.bf16.msra.mxu0 %v3336_v9  ;;  %v440_v46 = vld [vmem:[#allocation2 + $0x1c] sm:$0x1]  ;;  %v518_v58 = vshll.u32 %v3568_v45, 16  ;;  %vm506_vm7 = vsmask.f32 7440  ;;  %v3349_v34 = vld [vmem:[%s4111_s1 + $0xf0] sm:$0xff]  }
  0x1f   : > { %3104 = vmatpush3.bf16.msra.mxu1 %v3337_v10  ;;  %3081 = vmatprep.subr.bf16.mxu0 %v3338_v11  ;;  %v352_v47 = vor.u32 %v350_v33, %v349_v43  ;;  %v353_v48 = vrot.slane %v349_v43, 4  ;;  %v360_v49 = vor.u32 %v358_v39, %v357_v44  ;;  %v361_v50 = vrot.slane %v357_v44, 4  ;;  %v3579_v54 = vld [vmem:[%s4111_s1 + $0xb8] sm:$0xff]   ;;  %vm3596_vm8 = vmor %vm505_vm6, %vm506_vm7  ;;  %v333_v21 = vld [vmem:[%s3529_s24 + $0xc] sm:$0xf] }
  0x20   : > { %3105 = vmatprep.subr.bf16.mxu1 %v3339_v13  ;;  %v3586_v56 = vld [vmem:[%s4111_s1 + $0xf8] sm:$0xff]   ;;  %v516_v1 = vrot.slane %v515_v57, 4  ;;  %v520_v2 = vrot.slane %v518_v58, 5  ;;  %v334_v26 = vld [vmem:[%s3529_s24 + $0x10] sm:$0xf]  ;;  %v366_v39 = vshll.u32 %v333_v21, 16 }
  0x21   : > { %v432_v51 = vsel %vm3543_vm4, %v352_v47, %v431_v40  ;;  %v435_v52 = vsel %vm3549_vm5, %v353_v48, %v434_v41  ;;  %v438_v53 = vsel %vm3543_vm4, %v360_v49, %v437_v42  ;;  %v441_v55 = vsel %vm3549_vm5, %v361_v50, %v440_v46  ;;  %v335_v36 = vld [vmem:[%s3529_s24 + $0x14] sm:$0xf]  ;;  %v336_v37 = vld [vmem:[%s3529_s24 + $0x18] sm:$0xf]  ;;  %v443_v42 = vld [vmem:[#allocation2 + $0x20] sm:$0xf] }
  0x22   : > { %3082 = vmatpush3.bf16.msra.mxu0 %v3338_v11  ;;  %433 = vst [vmem:[#allocation2 + $0x10] sm:$0xf] %v432_v51  ;;  %436 = vst [vmem:[#allocation2 + $0x14] sm:$0x1] %v435_v52  ;;  %v521_v16 = vsel %vm3596_vm8, %v516_v1, %v520_v2  ;;  %v371_v40 = vshrl.u32 %v334_v26, 16  ;;  %v374_v41 = vshll.u32 %v334_v26, 16 }
  0x23   : > { %3106 = vmatpush3.bf16.msra.mxu1 %v3339_v13  ;;  %3083 = vmatprep.subr.bf16.mxu0 %v3340_v18  ;;  %439 = vst [vmem:[#allocation2 + $0x18] sm:$0xf] %v438_v53  ;;  %442 = vst [vmem:[#allocation2 + $0x1c] sm:$0x1] %v441_v55  ;;  %v474_v59 = vld [vmem:[#allocation2 + $0x8] sm:$0xf] }
  0x24   : > { %3107 = vmatprep.subr.bf16.mxu1 %v3341_v27  ;;  %v3589_v60 = vld [vmem:[#allocation2 + $0xc] sm:$0x1]  ;;  %v523_v61 = vshrl.u32 %v474_v59, 16  ;;  %v526_v62 = vshll.u32 %v474_v59, 16  ;;  %v2702_v0 = vcombine.low %v3538_v17, %v474_v59  ;;  %v446_v43 = vld [vmem:[#allocation2 + $0x24] sm:$0x1] }
  0x25   : > { %v532_v63 = vshll.u32 %v3589_v60, 16  ;;  %v3351_v46 = vld [vmem:[%s4111_s1 + $0xe8] sm:$0xff]   ;;  %v379_v50 = vshrl.u32 %v335_v36, 16  ;;  %v382_v51 = vshll.u32 %v335_v36, 16  ;;  %v373_v53 = vrot.slane %v371_v40, 7  ;;  %v3354_v40 = vld [vmem:[%s4111_s1 + $0x98] sm:$0xff]  }
  0x26   : > { %3084 = vmatpush3.bf16.msra.mxu0 %v3340_v18  ;;  %v525_v3 = vrot.slane %v523_v61, 4  ;;  %v528_v4 = vrot.slane %v526_v62, 5  ;;  %3111 = vmatprep.mubr.bf16.mxu1 %v2702_v0  ;;  %v449_v48 = vld [vmem:[#allocation2 + $0x28] sm:$0xf]  ;;  %v452_v49 = vld [vmem:[#allocation2 + $0x2c] sm:$0x1] }
  0x27   : > { %3108 = vmatpush3.bf16.msra.mxu1 %v3341_v27  ;;  %3085 = vmatprep.subr.bf16.mxu0 %v3342_v30  ;;  %v534_v6 = vrot.slane %v532_v63, 5  ;;  %v387_v55 = vshrl.u32 %v336_v37, 16  ;;  %v390_v57 = vshll.u32 %v336_v37, 16  ;;  %v455_v58 = vld [vmem:[#allocation2 + $0x30] sm:$0xf]  ;;  %v381_v0 = vrot.slane %v379_v50, 7 }
  0x28   : > { %3109 = vmatprep.subr.bf16.mxu1 %v3343_v35  ;;  %v529_v7 = vor.u32 %v528_v4, %v525_v3  ;;  %v3348_v61 = vld [vmem:[%s4111_s1 + $0xb0] sm:$0xff]   ;;  %v461_v2 = vld [vmem:[#allocation2 + $0x38] sm:$0xf]  ;;  %v376_v3 = vor.u32 %v374_v41, %v373_v53  ;;  %v377_v4 = vrot.slane %v373_v53, 4 }
  0x29   : > { %v475_v8 = vld [vmem:[#allocation2 + $0x10] sm:$0xf]  ;;  %v3600_v10 = vld [vmem:[#allocation2 + $0x14] sm:$0x1] }
  0x2a   : > { %3086 = vmatpush3.bf16.msra.mxu0 %v3342_v30  ;;  %v476_v9 = vld [vmem:[#allocation2 + $0x18] sm:$0xf]  ;;  %v3602_v11 = vld [vmem:[#allocation2 + $0x1c] sm:$0x1]  ;;  %v537_v12 = vshrl.u32 %v475_v8, 16  ;;  %v540_v13 = vshll.u32 %v475_v8, 16 }
  0x2b   : > { %3110 = vmatpush3.bf16.msra.mxu1 %v3343_v35  ;;  %3119 = vmatprep.subr.bf16.mxu0 %v3579_v54  ;;  %v546_v14 = vshll.u32 %v3600_v10, 16  ;;  %v551_v15 = vshrl.u32 %v476_v9, 16  ;;  %v530_v17 = vrot.slane %v529_v7, 4  ;;  %v554_v18 = vshll.u32 %v476_v9, 16  ;;  %v458_v1 = vld [vmem:[#allocation2 + $0x34] sm:$0x1] }
  0x2c   : > { %3143 = vmatprep.subr.bf16.mxu1 %v3586_v56  ;;  %v560_v19 = vshll.u32 %v3602_v11, 16  ;;  %v539_v22 = vrot.slane %v537_v12, 4  ;;  %v542_v23 = vrot.slane %v540_v13, 5  ;;  %v2703_v33 = vcombine.low %v475_v8, %v476_v9  ;;  %v464_v7 = vld [vmem:[#allocation2 + $0x3c] sm:$0x1] }
  0x2d   : > { %v553_v25 = vrot.slane %v551_v15, 4  ;;  %v535_v27 = vsel %vm3596_vm8, %v530_v17, %v534_v6  ;;  %v548_v28 = vrot.slane %v546_v14, 5  ;;  %v556_v29 = vrot.slane %v554_v18, 5  ;;  %v3353_v18 = vld [vmem:[%s4111_s1 + $0xe0] sm:$0xff]  }
  0x2e   : > { %v562_v30 = vrot.slane %v560_v19, 5  ;;  %v2690_v31 = vcombine.low %v521_v16, %v535_v27  ;;  %v543_v32 = vor.u32 %v542_v23, %v539_v22  ;;  %v363_v35 = vshrl.u32 %v333_v21, 16  ;;  %3112 = vmatmul.mubr.bf16.vlgmr.msra.gmra.mxu1 %v2703_v33  ;;  %v3651_v27 = vld [vmem:[#allocation2] sm:$0xe] }
  0x2f   : > { %v557_v38 = vor.u32 %v556_v29, %v553_v25  ;;  %3144 = vmatpush3.bf16.msra.mxu1 %v3586_v56  ;;  %v389_v6 = vrot.slane %v387_v55, 7  ;;  %v384_v13 = vor.u32 %v382_v51, %v381_v0  ;;  %v450_v14 = vsel %vm3543_vm4, %v376_v3, %v449_v48  ;;  %v3350_v25 = vld [vmem:[%s4111_s1 + $0xa8] sm:$0xff]   ;;  %v3352_v29 = vld [vmem:[%s4111_s1 + $0xa0] sm:$0xff]  }
  0x30   : > { %3087 = vmatprep.mubr.bf16.mxu0 %v2690_v31  ;;  %v544_v44 = vrot.slane %v543_v32, 4  ;;  %v365_v47 = vrot.slane %v363_v35, 7  ;;  %3145 = vmatprep.subr.bf16.mxu1 %v3349_v34  ;;  %v453_v15 = vsel %vm3549_vm5, %v377_v4, %v452_v49  ;;  %v385_v16 = vrot.slane %v381_v0, 4  ;;  %451 = vst [vmem:[#allocation2 + $0x28] sm:$0xf] %v450_v14  ;;  %v3359_v35 = vld [vmem:[%s4111_s1 + $0xd0] sm:$0xff]  }
  0x31   : > { %v558_v52 = vrot.slane %v557_v38, 4  ;;  %v392_v17 = vor.u32 %v390_v57, %v389_v6  ;;  %454 = vst [vmem:[#allocation2 + $0x2c] sm:$0x1] %v453_v15  ;;  %v393_v19 = vrot.slane %v389_v6, 4  ;;  %v456_v21 = vsel %vm3543_vm4, %v384_v13, %v455_v58  ;;  %v3358_v4 = vld [vmem:[%s4111_s1 + $0x90] sm:$0xff]   ;;  %v3361_v6 = vld [vmem:[%s4111_s1 + $0xc8] sm:$0xff]  }
  0x32   : > { %v549_v59 = vsel %vm3596_vm8, %v544_v44, %v548_v28  ;;  %v368_v62 = vor.u32 %v366_v39, %v365_v47  ;;  %v369_v63 = vrot.slane %v365_v47, 4  ;;  %457 = vst [vmem:[#allocation2 + $0x30] sm:$0xf] %v456_v21  ;;  %v459_v22 = vsel %vm3549_vm5, %v385_v16, %v458_v1  ;;  %v904_v47 = vld [vmem:[#allocation2 + $0x8] sm:$0xe] }
  0x33   : > { %v563_v56 = vsel %vm3596_vm8, %v558_v52, %v562_v30  ;;  %3146 = vmatpush3.bf16.msra.mxu1 %v3349_v34  ;;  %v462_v23 = vsel %vm3543_vm4, %v392_v17, %v461_v2  ;;  %460 = vst [vmem:[#allocation2 + $0x34] sm:$0x1] %v459_v22  ;;  %v465_v26 = vsel %vm3549_vm5, %v393_v19, %v464_v7  ;;  %v936_v28 = vrot.slane %v3589_v60, 5  ;;  %v3355_v30 = vld [vmem:[%s4111_s1 + $0xd8] sm:$0xff]   ;;  %v3687_v13 = vld [vmem:[#allocation2 + $0x10] sm:$0xe] }
  0x34   : > { %v2691_v8 = vcombine.low %v549_v59, %v563_v56  ;;  %v444_v9 = vsel %vm3543_vm4, %v368_v62, %v443_v42  ;;  %v447_v12 = vsel %vm3549_vm5, %v369_v63, %v446_v43  ;;  %3147 = vmatprep.subr.bf16.mxu1 %v3351_v46  ;;  %463 = vst [vmem:[#allocation2 + $0x38] sm:$0xf] %v462_v23  ;;  %466 = vst [vmem:[#allocation2 + $0x3c] sm:$0x1] %v465_v26  ;;  %v3364_v19 = vld [vmem:[#allocation2 + $0x8] ss:$8 sps:$4 sm:$0xff]  }
  0x35   : > { %445 = vst [vmem:[#allocation2 + $0x20] sm:$0xf] %v444_v9  ;;  %448 = vst [vmem:[#allocation2 + $0x24] sm:$0x1] %v447_v12  ;;  %v940_v31 = vrot.slane %v3600_v10, 5  ;;  %v2714_v32 = vrot.slane %v3651_v27, 9 }
  0x36   : > { %3088 = vmatmul.mubr.bf16.vlgmr.msra.gmra.mxu0 %v2691_v8  ;;  %v2715_v12 = vrot.slane %v904_v47, 9 }
  0x37   : > { %3120 = vmatpush3.bf16.msra.mxu0 %v3579_v54  ;;  %v932_v54 = vrot.slane %v3568_v45, 5  ;;  %3148 = vmatpush3.bf16.msra.mxu1 %v3351_v46  ;;  %v478_v36 = vld [vmem:[#allocation2 + $0x28] sm:$0xf]  ;;  %v2716_v45 = vrot.slane %v3687_v13, 9 }
  0x38   : > { %3121 = vmatprep.subr.bf16.mxu0 %v3348_v61  ;;  %3149 = vmatprep.subr.bf16.mxu1 %v3353_v18  ;;  %v3668_v37 = vld [vmem:[#allocation2 + $0x2c] sm:$0x1]  ;;  %v579_v42 = vshrl.u32 %v478_v36, 16  ;;  %v582_v43 = vshll.u32 %v478_v36, 16  ;;  %v908_v27 = vld [vmem:[#allocation2 + $0x28] sm:$0xe] }
  0x39   : > { %v588_v44 = vshll.u32 %v3668_v37, 16  ;;  %v479_v46 = vld [vmem:[#allocation2 + $0x30] sm:$0xf] }
  0x3a   : > { %v3675_v52 = vld [vmem:[#allocation2 + $0x34] sm:$0x1]  ;;  %v581_v55 = vrot.slane %v579_v42, 4  ;;  %v584_v57 = vrot.slane %v582_v43, 5  ;;  %v593_v62 = vshrl.u32 %v479_v46, 16  ;;  %v596_v63 = vshll.u32 %v479_v46, 16 }
  0x3b   : > { %3122 = vmatpush3.bf16.msra.mxu0 %v3348_v61  ;;  %3150 = vmatpush3.bf16.msra.mxu1 %v3353_v18  ;;  %v480_v51 = vld [vmem:[#allocation2 + $0x38] sm:$0xf]  ;;  %v590_v58 = vrot.slane %v588_v44, 5  ;;  %v3677_v59 = vld [vmem:[#allocation2 + $0x3c] sm:$0x1]  ;;  %v602_v0 = vshll.u32 %v3675_v52, 16 }
  0x3c   : > { %3123 = vmatprep.subr.bf16.mxu0 %v3350_v25  ;;  %v477_v33 = vld [vmem:[#allocation2 + $0x20] sm:$0xf]  ;;  %v3663_v34 = vld [vmem:[#allocation2 + $0x24] sm:$0x1]  ;;  %3151 = vmatprep.subr.bf16.mxu1 %v3355_v30  ;;  %v585_v1 = vor.u32 %v584_v57, %v581_v55  ;;  %v607_v2 = vshrl.u32 %v480_v51, 16  ;;  %v610_v56 = vshll.u32 %v480_v51, 16  ;;  %v2705_v23 = vcombine.low %v479_v46, %v480_v51 }
  0x3d   : > { %v565_v38 = vshrl.u32 %v477_v33, 16  ;;  %v568_v39 = vshll.u32 %v477_v33, 16  ;;  %v574_v41 = vshll.u32 %v3663_v34, 16  ;;  %v2704_v50 = vcombine.low %v477_v33, %v478_v36  ;;  %v906_v33 = vld [vmem:[#allocation2 + $0x18] sm:$0xe] }
  0x3e   : > { %v616_v3 = vshll.u32 %v3677_v59, 16  ;;  %v595_v8 = vrot.slane %v593_v62, 4  ;;  %v598_v9 = vrot.slane %v596_v63, 5  ;;  %v586_v14 = vrot.slane %v585_v1, 4  ;;  %v3367_v46 = vld [vmem:[#allocation2 + $0x18] ss:$8 sps:$4 sm:$0xff]  }
  0x3f   : > { %3124 = vmatpush3.bf16.msra.mxu0 %v3350_v25  ;;  %v567_v48 = vrot.slane %v565_v38, 4  ;;  %v570_v49 = vrot.slane %v568_v39, 5  ;;  %v576_v53 = vrot.slane %v574_v41, 5  ;;  %3152 = vmatpush3.bf16.msra.mxu1 %v3355_v30  ;;  %v604_v15 = vrot.slane %v602_v0, 5  ;;  %v3363_v30 = vld [vmem:[%s4111_s1 + $0xc0] sm:$0xff]   ;;  %v3365_v0 = vld [vmem:[%s4111_s1 + $0x138] sm:$0xff]  }
  0x40   : > { %3125 = vmatprep.subr.bf16.mxu0 %v3352_v29  ;;  %3115 = vmatprep.mubr.bf16.mxu1 %v2704_v50  ;;  %v609_v16 = vrot.slane %v607_v2, 4  ;;  %v612_v17 = vrot.slane %v610_v56, 5  ;;  %v599_v22 = vor.u32 %v598_v9, %v595_v8  ;;  %v591_v25 = vsel %vm3596_vm8, %v586_v14, %v590_v58  ;;  %v907_v41 = vld [vmem:[#allocation2 + $0x20] sm:$0xe]  ;;  %v909_v55 = vld [vmem:[#allocation2 + $0x30] sm:$0xe] }
  0x41   : > { %v571_v61 = vor.u32 %v570_v49, %v567_v48  ;;  %3153 = vmatprep.subr.bf16.mxu1 %v3359_v35  ;;  %3116 = vmatmul.mubr.bf16.gmra.mxu1 %v2705_v23  ;;  %v937_v39 = vsel %vm3691_vm11, %v2715_v12, %v936_v28  ;;  %v944_v42 = vrot.slane %v3602_v11, 5  ;;  %v3366_v11 = vld [vmem:[%s4111_s1 + $0x178] sm:$0xff]   ;;  %v2718_v47 = vrot.slane %v907_v41, 9  ;;  %v3372_v57 = vld [vmem:[#allocation2 + $0x28] ss:$8 sps:$4 sm:$0xff]  }
  0x42   : > { %v613_v26 = vor.u32 %v612_v17, %v609_v16  ;;  %v600_v38 = vrot.slane %v599_v22, 4  ;;  %3159 = vmatprep.mubr.bf16.mxu1 %v3364_v19  ;;  %v948_v48 = vrot.slane %v3663_v34, 5  ;;  %v2719_v50 = vrot.slane %v908_v27, 9  ;;  %v337_v58 = vld [vmem:[%s3529_s24 + $0x1c] sm:$0xf]  ;;  %v3368_v14 = vld [vmem:[%s4111_s1 + $0x130] sm:$0xff]   ;;  %s301_s24 = scalar_lea.vmem %s4114_s4, %s2938_s13 }
  0x43   : > { %3126 = vmatpush3.bf16.msra.mxu0 %v3352_v29  ;;  %v572_v7 = vrot.slane %v571_v61, 4  ;;  %3154 = vmatpush3.bf16.msra.mxu1 %v3359_v35  ;;  %v618_v29 = vrot.slane %v616_v3, 5  ;;  %v933_v35 = vsel %vm3691_vm11, %v2714_v32, %v932_v54  ;;  %v2717_v54 = vrot.slane %v906_v33, 9  ;;  %v3362_v32 = vld [vmem:[%s4111_s1 + $0x80] sm:$0xff]   ;;  %v910_v34 = vld [vmem:[#allocation2 + $0x38] sm:$0xe] }
  0x44   : > { %3127 = vmatprep.subr.bf16.mxu0 %v3354_v40  ;;  %3155 = vmatprep.subr.bf16.mxu1 %v3361_v6  ;;  %v614_v43 = vrot.slane %v613_v26, 4  ;;  %v605_v60 = vsel %vm3596_vm8, %v600_v38, %v604_v15  ;;  %v2738_v44 = vcombine.low %v933_v35, %v937_v39  ;;  %v952_v51 = vrot.slane %v3668_v37, 5  ;;  %v467_v56 = vld [vmem:[#allocation2 + $0x40] sm:$0xf]  ;;  %v3370_v15 = vld [vmem:[%s4111_s1 + $0x128] sm:$0xff]   ;;  %v3377_v26 = vld [vmem:[%s4111_s1 + $0x158] sm:$0xff]  }
  0x45   : > { %v577_v21 = vsel %vm3596_vm8, %v572_v7, %v576_v53  ;;  %v3369_v53 = vld [vmem:[%s4111_s1 + $0x170] sm:$0xff]   ;;  %v395_v61 = vshrl.u32 %v337_v58, 16  ;;  %v398_v62 = vshll.u32 %v337_v58, 16  ;;  %v941_v37 = vsel %vm3691_vm11, %v2716_v45, %v940_v31  ;;  %v3371_v7 = vld [vmem:[%s4111_s1 + $0x168] sm:$0xff]   ;;  %v1290_v38 = vld [vmem:[#allocation2 + $0x18] sm:$0xf] }
  0x46   : > { %v2692_v36 = vcombine.low %v577_v21, %v591_v25  ;;  %v619_v28 = vsel %vm3596_vm8, %v614_v43, %v618_v29  ;;  %v945_v63 = vsel %vm3691_vm11, %v2717_v54, %v944_v42  ;;  %v949_v2 = vsel %vm3691_vm11, %v2718_v47, %v948_v48  ;;  %v1286_v17 = vld [vmem:[#allocation2 + $0x8] sm:$0xf]  ;;  %v3770_v19 = vld [vmem:[#allocation2 + $0xc] sm:$0x1]  ;;  %v1288_v21 = vld [vmem:[#allocation2 + $0x10] sm:$0xf] }
  0x47   : > { %3128 = vmatpush3.bf16.msra.mxu0 %v3354_v40  ;;  %v3360_v40 = vld [vmem:[%s4111_s1 + $0x88] sm:$0xff]   ;;  %3156 = vmatpush3.bf16.msra.mxu1 %v3361_v6  ;;  %v2693_v49 = vcombine.low %v605_v60, %v619_v28  ;;  %v3742_v1 = vrot.slane %v395_v61, 7  ;;  %v953_v10 = vsel %vm3691_vm11, %v2719_v50, %v952_v51  ;;  %v2720_v31 = vrot.slane %v909_v55, 9  ;;  %v3772_v22 = vld [vmem:[#allocation2 + $0x14] sm:$0x1]  ;;  %v3374_v60 = vld [vmem:[%s4111_s1 + $0x120] sm:$0xff]  }
  0x48   : > { %3129 = vmatprep.subr.bf16.mxu0 %v3358_v4  ;;  %3091 = vmatprep.mubr.bf16.mxu0 %v2692_v36  ;;  %v956_v6 = vrot.slane %v3675_v52, 5  ;;  %v2740_v8 = vcombine.low %v949_v2, %v953_v10  ;;  %v2721_v9 = vrot.slane %v910_v34, 9  ;;  %v960_v12 = vrot.slane %v3677_v59, 5  ;;  %v3375_v52 = vld [vmem:[%s4111_s1 + $0x160] sm:$0xff]   ;;  %v3779_v42 = vld [vmem:[#allocation2 + $0x1c] sm:$0x1] }
  0x49   : > { %3157 = vmatprep.subr.bf16.mxu1 %v3363_v30  ;;  %3092 = vmatmul.mubr.bf16.gmra.mxu0 %v2693_v49  ;;  %v400_v3 = vor.u32 %v398_v62, %v3742_v1  ;;  %v401_v16 = vrot.slane %v3742_v1, 4  ;;  %v1303_v23 = vshrl.u32 %v1286_v17, 16  ;;  %v1306_v25 = vshll.u32 %v1286_v17, 16  ;;  %v1292_v43 = vld [vmem:[#allocation2 + $0x20] sm:$0xf]  ;;  %v3379_v61 = vld [vmem:[%s4111_s1 + $0x150] sm:$0xff]  }
  0x4a   : > { %3135 = vmatprep.mubr.bf16.mxu0 %v2738_v44  ;;  %v957_v59 = vsel %vm3691_vm11, %v2720_v31, %v956_v6  ;;  %v961_v20 = vsel %vm3691_vm11, %v2721_v9, %v960_v12  ;;  %v1312_v29 = vshll.u32 %v3770_v19, 16  ;;  %v1320_v33 = vshll.u32 %v1288_v21, 16  ;;  %v1568_v50 = vld [vmem:[#allocation2 + $0x8] sm:$0xe]  ;;  %v1569_v58 = vld [vmem:[#allocation2 + $0x10] sm:$0xe] }
  0x4b   : > { %3130 = vmatpush3.bf16.msra.mxu0 %v3358_v4  ;;  %3158 = vmatpush3.bf16.msra.mxu1 %v3363_v30  ;;  %v2739_v4 = vcombine.low %v941_v37, %v945_v63  ;;  %v468_v13 = vsel %vm3543_vm4, %v400_v3, %v467_v56  ;;  %v1317_v30 = vshrl.u32 %v1288_v21, 16  ;;  %v1326_v36 = vshll.u32 %v3772_v22, 16  ;;  %v3376_v63 = vld [vmem:[%s4111_s1 + $0x118] sm:$0xff]   ;;  %v3381_v31 = vld [vmem:[%s4111_s1 + $0x148] sm:$0xff]   ;;  %v3378_v17 = vld [vmem:[%s4111_s1 + $0x110] sm:$0xff]   ;;  %s2673_s13 = sshll.u32 %s4143_s18, 3 }
  0x4c   : > { %3131 = vmatprep.subr.bf16.mxu0 %v3360_v40  ;;  %3191 = vmatprep.subr.bf16.mxu1 %v3366_v11  ;;  %469 = vst [vmem:[#allocation2 + $0x40] sm:$0xf] %v468_v13  ;;  %v2741_v35 = vcombine.low %v957_v59, %v961_v20  ;;  %v1305_v39 = vrot.slane %v1303_v23, 4  ;;  %v1308_v41 = vrot.slane %v1306_v25, 5  ;;  %v1314_v45 = vrot.slane %v1312_v29, 5  ;;  %s308_s15 = scalar_lea.vmem %s4115_s5, %s2673_s13 }
  0x4d   : > { %v1319_v27 = vrot.slane %v1317_v30, 4  ;;  %v1328_v28 = vrot.slane %v1326_v36, 5  ;;  %v1331_v44 = vshrl.u32 %v1290_v38, 16  ;;  %v1340_v47 = vshll.u32 %v3779_v42, 16  ;;  %v1570_v13 = vld [vmem:[#allocation2 + $0x18] sm:$0xe] }
  0x4e   : > { %3160 = vmatmul.mubr.bf16.vlgmr.msra.gmra.mxu1 %v3367_v46  ;;  %v1309_v54 = vor.u32 %v1308_v41, %v1305_v39  ;;  %v1334_v46 = vshll.u32 %v1290_v38, 16  ;;  %v1345_v48 = vshrl.u32 %v1292_v43, 16  ;;  %v1348_v49 = vshll.u32 %v1292_v43, 16  ;;  %v3818_v29 = vld [vmem:[#allocation2 + $0x2c] sm:$0x1]  ;;  %v3383_v39 = vld [vmem:[%s4111_s1 + $0x140] sm:$0xff]  }
  0x4f   : > { %3132 = vmatpush3.bf16.msra.mxu0 %v3360_v40  ;;  %3192 = vmatpush3.bf16.msra.mxu1 %v3366_v11  ;;  %v1322_v11 = vrot.slane %v1320_v33, 5  ;;  %v1333_v55 = vrot.slane %v1331_v44, 4  ;;  %v3796_v10 = vrot.slane %v1340_v47, 5  ;;  %v2806_v56 = vrot.slane %v1568_v50, 9  ;;  %v1296_v36 = vld [vmem:[#allocation2 + $0x30] sm:$0xf] }
  0x50   : > { %3133 = vmatprep.subr.bf16.mxu0 %v3362_v32  ;;  %3163 = vmatprep.mubr.bf16.mxu1 %v3372_v57  ;;  %v1310_v51 = vrot.slane %v1309_v54, 4  ;;  %v1336_v62 = vrot.slane %v1334_v46, 5  ;;  %v1347_v34 = vrot.slane %v1345_v48, 4  ;;  %v1350_v37 = vrot.slane %v1348_v49, 5  ;;  %v3826_v38 = vld [vmem:[#allocation2 + $0x34] sm:$0x1] }
  0x51   : > { %3193 = vmatprep.subr.bf16.mxu1 %v3369_v53  ;;  %v2807_v6 = vrot.slane %v1569_v58, 9  ;;  %v1598_v12 = vrot.slane %v3772_v22, 5  ;;  %v2808_v21 = vrot.slane %v1570_v13, 9  ;;  %v1368_v43 = vshll.u32 %v3818_v29, 16  ;;  %v3846_v48 = vld [vmem:[#allocation2 + $0x3c] sm:$0x1] }
  0x52   : > { %v1337_v3 = vor.u32 %v1336_v62, %v1333_v55  ;;  %v1376_v54 = vshll.u32 %v1296_v36, 16  ;;  %v3382_v50 = vld [vmem:[%s4111_s1 + $0x100] sm:$0xff]   ;;  %v3385_v55 = vld [vmem:[%s4111_s1 + $0x1f8] sm:$0xff]   ;;  %v1573_v13 = vld [vmem:[#allocation2 + $0x30] sm:$0xe] }
  0x53   : > { %3134 = vmatpush3.bf16.msra.mxu0 %v3362_v32  ;;  %3194 = vmatpush3.bf16.msra.mxu1 %v3369_v53  ;;  %v3373_v40 = vld [vmem:[#allocation2 + $0x38] ss:$8 sps:$4 sm:$0xff]   ;;  %v3784_v32 = vld [vmem:[#allocation2 + $0x24] sm:$0x1]  ;;  %v1323_v53 = vor.u32 %v1322_v11, %v1319_v27  ;;  %v3380_v27 = vld [vmem:[%s4111_s1 + $0x108] sm:$0xff]   ;;  %v1382_v11 = vshll.u32 %v3826_v38, 16 }
  0x54   : > { %3167 = vmatprep.subr.bf16.mxu0 %v3365_v0  ;;  %3195 = vmatprep.subr.bf16.mxu1 %v3371_v7  ;;  %v1354_v57 = vshll.u32 %v3784_v32, 16  ;;  %v3807_v59 = vrot.slane %v1337_v3, 4  ;;  %v1606_v23 = vrot.slane %v3784_v32, 5  ;;  %v1298_v32 = vld [vmem:[#allocation2 + $0x38] sm:$0xf]  ;;  %v1378_v1 = vrot.slane %v1376_v54, 5 }
  0x55   : > { %v1324_v2 = vrot.slane %v1323_v53, 4  ;;  %v1387_v49 = vshrl.u32 %v1298_v32, 16  ;;  %v1384_v53 = vrot.slane %v1382_v11, 5  ;;  %v1300_v24 = vld [vmem:[#allocation2 + $0x40] sm:$0xf] }
  0x56   : > { %3136 = vmatmul.mubr.bf16.vlgmr.msra.gmra.mxu0 %v2739_v4  ;;  %3164 = vmatmul.mubr.bf16.gmra.mxu1 %v3373_v40  ;;  %v1594_v4 = vrot.slane %v3770_v19, 5  ;;  %v3804_v9 = vrot.slane %v1354_v57, 5  ;;  %v1599_v19 = vsel %vm3691_vm11, %v2807_v6, %v1598_v12  ;;  %v1343_v30 = vsel %vm3596_vm8, %v3807_v59, %v3796_v10  ;;  %v1572_v12 = vld [vmem:[#allocation2 + $0x28] sm:$0xe] }
  0x57   : > { %3168 = vmatpush3.bf16.msra.mxu0 %v3365_v0  ;;  %3139 = vmatprep.mubr.bf16.mxu0 %v2740_v8  ;;  %v1315_v0 = vsel %vm3596_vm8, %v1310_v51, %v1314_v45  ;;  %v1351_v8 = vor.u32 %v1350_v37, %v1347_v34  ;;  %v1373_v40 = vshrl.u32 %v1296_v36, 16  ;;  %v470_v45 = vld [vmem:[#allocation2 + $0x44] sm:$0x1]  ;;  %v1370_v51 = vrot.slane %v1368_v43, 5  ;;  %v3389_v43 = vld [vmem:[%s4111_s1 + $0x1e8] sm:$0xff]  }
  0x58   : > { %3169 = vmatprep.subr.bf16.mxu0 %v3368_v14  ;;  %3196 = vmatpush3.bf16.msra.mxu1 %v3371_v7  ;;  %v1329_v7 = vsel %vm3596_vm8, %v1324_v2, %v1328_v28  ;;  %v1595_v20 = vsel %vm3691_vm11, %v2806_v56, %v1594_v4  ;;  %v471_v28 = vsel %vm3549_vm5, %v401_v16, %v470_v45  ;;  %v1390_v16 = vshll.u32 %v1298_v32, 16  ;;  %v3387_v2 = vld [vmem:[%s4111_s1 + $0x1f0] sm:$0xff]   ;;  %v3391_v32 = vld [vmem:[%s4111_s1 + $0x1e0] sm:$0xff]  }
  0x59   : > { %3197 = vmatprep.subr.bf16.mxu1 %v3375_v52  ;;  %v2830_v25 = vcombine.low %v1595_v20, %v1599_v19  ;;  %v3824_v33 = vrot.slane %v1351_v8, 4  ;;  %v1375_v47 = vrot.slane %v1373_v40, 4  ;;  %472 = vst [vmem:[#allocation2 + $0x44] sm:$0x1] %v471_v28  ;;  %v1389_v58 = vrot.slane %v1387_v49, 4 }
  0x5a   : > { %v1404_v62 = vshll.u32 %v1300_v24, 16  ;;  %v1610_v4 = vrot.slane %v3818_v29, 5  ;;  %v1574_v19 = vld [vmem:[#allocation2 + $0x38] sm:$0xe]  ;;  %v1618_v29 = vrot.slane %v3846_v48, 5 }
  0x5b   : > { %3170 = vmatpush3.bf16.msra.mxu0 %v3368_v14  ;;  %v1571_v14 = vld [vmem:[#allocation2 + $0x20] sm:$0xe]  ;;  %3207 = vmatprep.mubr.bf16.mxu1 %v2830_v25  ;;  %v1379_v37 = vor.u32 %v1378_v1, %v1375_v47  ;;  %v1357_v6 = vsel %vm3596_vm8, %v3824_v33, %v3804_v9  ;;  %v3384_v9 = vld [vmem:[%s4111_s1 + $0x1b8] sm:$0xff]  }
  0x5c   : > { %3171 = vmatprep.subr.bf16.mxu0 %v3370_v15  ;;  %3198 = vmatpush3.bf16.msra.mxu1 %v3375_v52  ;;  %v2794_v52 = vcombine.low %v1315_v0, %v1329_v7  ;;  %v2809_v22 = vrot.slane %v1571_v14, 9  ;;  %v1396_v0 = vshll.u32 %v3846_v48, 16  ;;  %v1406_v3 = vrot.slane %v1404_v62, 5  ;;  %v3390_v47 = vld [vmem:[%s4111_s1 + $0x1a0] sm:$0xff]   ;;  %v3393_v48 = vld [vmem:[%s4111_s1 + $0x1d8] sm:$0xff]  }
  0x5d   : > { %3199 = vmatprep.subr.bf16.mxu1 %v3377_v26  ;;  %v1380_v7 = vrot.slane %v1379_v37, 4  ;;  %v1614_v14 = vrot.slane %v3826_v38, 5  ;;  %v2795_v33 = vcombine.low %v1343_v30, %v1357_v6  ;;  %v3400_v49 = vld [vmem:[#allocation2 + $0x10] ss:$8 sps:$4 sm:$0xff]   ;;  %v1955_v6 = vld [vmem:[#allocation2 + $0x28] sm:$0xf] }
  0x5e   : > { %3140 = vmatmul.mubr.bf16.gmra.mxu0 %v2741_v35  ;;  %v1607_v44 = vsel %vm3691_vm11, %v2809_v22, %v1606_v23  ;;  %v1398_v25 = vrot.slane %v1396_v0, 5  ;;  %v1951_v1 = vld [vmem:[#allocation2 + $0x18] sm:$0xf] }
  0x5f   : > { %3172 = vmatpush3.bf16.msra.mxu0 %v3370_v15  ;;  %v1602_v15 = vrot.slane %v3779_v42, 5  ;;  %3183 = vmatprep.mubr.bf16.mxu0 %v2794_v52  ;;  %v1385_v22 = vsel %vm3596_vm8, %v1380_v7, %v1384_v53  ;;  %v3910_v53 = vld [vmem:[#allocation2 + $0x1c] sm:$0x1]  ;;  %v1983_v62 = vshll.u32 %v1951_v1, 16 }
  0x60   : > { %3173 = vmatprep.subr.bf16.mxu0 %v3374_v60  ;;  %3200 = vmatpush3.bf16.msra.mxu1 %v3377_v26  ;;  %v1294_v26 = vld [vmem:[#allocation2 + $0x28] sm:$0xf]  ;;  %v1301_v23 = vld [vmem:[#allocation2 + $0x44] sm:$0x1] }
  0x61   : > { %3201 = vmatprep.subr.bf16.mxu1 %v3379_v61  ;;  %v1359_v35 = vshrl.u32 %v1294_v26, 16  ;;  %v3833_v41 = vsel %vm3691_vm11, %v2808_v21, %v1602_v15  ;;  %v1362_v42 = vshll.u32 %v1294_v26, 16  ;;  %v2810_v15 = vrot.slane %v1572_v12, 9  ;;  %v1575_v21 = vld [vmem:[#allocation2 + $0x40] sm:$0xe] }
  0x62   : > { %v2831_v34 = vcombine.low %v3833_v41, %v1607_v44  ;;  %v2812_v26 = vrot.slane %v1574_v19, 9  ;;  %v1410_v38 = vshll.u32 %v1301_v23, 16  ;;  %v2813_v59 = vrot.slane %v1575_v21, 9  ;;  %v3388_v44 = vld [vmem:[%s4111_s1 + $0x1a8] sm:$0xff]   ;;  %v3394_v21 = vld [vmem:[%s4111_s1 + $0x190] sm:$0xff]  }
  0x63   : > { %3174 = vmatpush3.bf16.msra.mxu0 %v3374_v60  ;;  %v1361_v60 = vrot.slane %v1359_v35, 4  ;;  %v1364_v46 = vrot.slane %v1362_v42, 5  ;;  %v1611_v35 = vsel %vm3691_vm11, %v2810_v15, %v1610_v4  ;;  %v3920_v4 = vld [vmem:[#allocation2 + $0x24] sm:$0x1]  ;;  %v2008_v15 = vshrl.u32 %v1955_v6, 16 }
  0x64   : > { %3175 = vmatprep.subr.bf16.mxu0 %v3376_v63  ;;  %3202 = vmatpush3.bf16.msra.mxu1 %v3379_v61  ;;  %v1401_v61 = vshrl.u32 %v1300_v24, 16  ;;  %v1412_v30 = vrot.slane %v1410_v38, 5  ;;  %v1619_v45 = vsel %vm3691_vm11, %v2812_v26, %v1618_v29 }
  0x65   : > { %3203 = vmatprep.subr.bf16.mxu1 %v3381_v31  ;;  %v1365_v57 = vor.u32 %v1364_v46, %v1361_v60  ;;  %v2010_v26 = vrot.slane %v2008_v15, 4 }
  0x67   : > { %3176 = vmatpush3.bf16.msra.mxu0 %v3376_v63  ;;  %v1392_v63 = vrot.slane %v1390_v16, 5  ;;  %v1366_v56 = vrot.slane %v1365_v57, 4  ;;  %v1980_v57 = vshrl.u32 %v1951_v1, 16  ;;  %v1961_v1 = vld [vmem:[#allocation2 + $0x40] sm:$0xf] }
  0x68   : > { %3177 = vmatprep.subr.bf16.mxu0 %v3378_v17  ;;  %3204 = vmatpush3.bf16.msra.mxu1 %v3381_v31  ;;  %v1403_v31 = vrot.slane %v1401_v61, 4  ;;  %v3395_v61 = vld [vmem:[%s4111_s1 + $0x1d0] sm:$0xff]  }
  0x69   : > { %3205 = vmatprep.subr.bf16.mxu1 %v3383_v39  ;;  %v1393_v8 = vor.u32 %v1392_v63, %v1389_v58  ;;  %v1371_v52 = vsel %vm3596_vm8, %v1366_v56, %v1370_v51  ;;  %v3908_v51 = vld [vmem:[#allocation2 + $0x14] sm:$0x1]  ;;  %v3392_v58 = vld [vmem:[%s4111_s1 + $0x198] sm:$0xff]   ;;  %v1953_v56 = vld [vmem:[#allocation2 + $0x20] sm:$0xf] }
  0x6a   : > { %v1407_v20 = vor.u32 %v1406_v3, %v1403_v31  ;;  %v2796_v41 = vcombine.low %v1371_v52, %v1385_v22  ;;  %v1985_v31 = vrot.slane %v1983_v62, 5  ;;  %v1994_v12 = vshrl.u32 %v1953_v56, 16  ;;  %v3397_v52 = vld [vmem:[%s4111_s1 + $0x1c8] sm:$0xff]  }
  0x6b   : > { %3178 = vmatpush3.bf16.msra.mxu0 %v3378_v17  ;;  %v2811_v17 = vrot.slane %v1573_v13, 9  ;;  %v1394_v36 = vrot.slane %v1393_v8, 4  ;;  %v3922_v8 = vld [vmem:[#allocation2 + $0x2c] sm:$0x1]  ;;  %v1997_v13 = vshll.u32 %v1953_v56, 16  ;;  %v2053_v56 = vshll.u32 %v1961_v1, 16 }
  0x6c   : > { %3179 = vmatprep.subr.bf16.mxu0 %v3380_v27  ;;  %3206 = vmatpush3.bf16.msra.mxu1 %v3383_v39  ;;  %v3386_v39 = vld [vmem:[%s4111_s1 + $0x1b0] sm:$0xff]   ;;  %v1408_v42 = vrot.slane %v1407_v20, 4  ;;  %v2017_v19 = vshll.u32 %v3922_v8, 16  ;;  %v1996_v22 = vrot.slane %v1994_v12, 4 }
  0x6d   : > { %3239 = vmatprep.subr.bf16.mxu1 %v3385_v55  ;;  %v1615_v10 = vsel %vm3691_vm11, %v2811_v17, %v1614_v14  ;;  %v1399_v11 = vsel %vm3596_vm8, %v1394_v36, %v1398_v25  ;;  %v2003_v14 = vshll.u32 %v3920_v4, 16  ;;  %v2011_v17 = vshll.u32 %v1955_v6, 16 }
  0x6e   : > { %v2832_v40 = vcombine.low %v1611_v35, %v1615_v10  ;;  %v1413_v28 = vsel %vm3596_vm8, %v1408_v42, %v1412_v30  ;;  %v3399_v35 = vld [vmem:[%s4111_s1 + $0x1c0] sm:$0xff]   ;;  %v2019_v42 = vrot.slane %v2017_v19, 5  ;;  %v1957_v30 = vld [vmem:[#allocation2 + $0x30] sm:$0xf]  ;;  %v2055_v15 = vrot.slane %v2053_v56, 5 }
  0x6f   : > { %3180 = vmatpush3.bf16.msra.mxu0 %v3380_v27  ;;  %3208 = vmatmul.mubr.bf16.vlgmr.msra.gmra.mxu1 %v2831_v34  ;;  %v1622_v27 = vrot.slane %v1301_v23, 5  ;;  %v2797_v46 = vcombine.low %v1399_v11, %v1413_v28  ;;  %v1989_v34 = vshll.u32 %v3910_v53, 16  ;;  %v1999_v23 = vrot.slane %v1997_v13, 5  ;;  %v3946_v11 = vld [vmem:[#allocation2 + $0x3c] sm:$0x1] }
  0x70   : > { %3181 = vmatprep.subr.bf16.mxu0 %v3382_v50  ;;  %3240 = vmatpush3.bf16.msra.mxu1 %v3385_v55  ;;  %v1975_v55 = vshll.u32 %v3908_v51, 16  ;;  %v2013_v29 = vrot.slane %v2011_v17, 5  ;;  %v2005_v38 = vrot.slane %v2003_v14, 5  ;;  %v2025_v28 = vshll.u32 %v1957_v30, 16  ;;  %v3401_v14 = vld [vmem:[#allocation2 + $0x20] ss:$8 sps:$4 sm:$0xff]  }
  0x71   : > { %3241 = vmatprep.subr.bf16.mxu1 %v3387_v2  ;;  %3211 = vmatprep.mubr.bf16.mxu1 %v2832_v40  ;;  %v1623_v60 = vsel %vm3691_vm11, %v2813_v59, %v1622_v27  ;;  %v1991_v3 = vrot.slane %v1989_v34, 5  ;;  %v2000_v36 = vor.u32 %v1999_v23, %v1996_v22  ;;  %v1959_v27 = vld [vmem:[#allocation2 + $0x38] sm:$0xf]  ;;  %v3406_v22 = vld [vmem:[%s4111_s1 + $0x228] sm:$0xff]  }
  0x72   : > { %v2833_v54 = vcombine.low %v1619_v45, %v1623_v60  ;;  %v1977_v0 = vrot.slane %v1975_v55, 5  ;;  %v3942_v45 = vld [vmem:[#allocation2 + $0x34] sm:$0x1]  ;;  %v2022_v60 = vshrl.u32 %v1957_v30, 16  ;;  %v3404_v17 = vld [vmem:[#allocation2 + $0x30] ss:$8 sps:$4 sm:$0xff]  }
  0x73   : > { %3182 = vmatpush3.bf16.msra.mxu0 %v3382_v50  ;;  %v1949_v50 = vld [vmem:[#allocation2 + $0x10] sm:$0xf]  ;;  %v2001_v59 = vrot.slane %v2000_v36, 4  ;;  %v2273_v30 = vrot.slane %v3942_v45, 5  ;;  %v2234_v56 = vld [vmem:[#allocation2 + $0x28] sm:$0xe] }
  0x74   : > { %3215 = vmatprep.subr.bf16.mxu0 %v3384_v9  ;;  %3242 = vmatpush3.bf16.msra.mxu1 %v3387_v2  ;;  %v1966_v24 = vshrl.u32 %v1949_v50, 16  ;;  %v1969_v16 = vshll.u32 %v1949_v50, 16  ;;  %v1982_v2 = vrot.slane %v1980_v57, 4  ;;  %v2045_v50 = vshll.u32 %v3946_v11, 16 }
  0x75   : > { %3243 = vmatprep.subr.bf16.mxu1 %v3389_v43 }
  0x76   : > { %3184 = vmatmul.mubr.bf16.vlgmr.msra.gmra.mxu0 %v2795_v33  ;;  %v1968_v37 = vrot.slane %v1966_v24, 4  ;;  %v1971_v63 = vrot.slane %v1969_v16, 5  ;;  %v1986_v20 = vor.u32 %v1985_v31, %v1982_v2  ;;  %v3398_v24 = vld [vmem:[%s4111_s1 + $0x180] sm:$0xff]   ;;  %v2027_v16 = vrot.slane %v2025_v28, 5 }
  0x77   : > { %3216 = vmatpush3.bf16.msra.mxu0 %v3384_v9  ;;  %3187 = vmatprep.mubr.bf16.mxu0 %v2796_v41  ;;  %v2014_v41 = vor.u32 %v2013_v29, %v2010_v26  ;;  %v2047_v34 = vrot.slane %v2045_v50, 5  ;;  %v2050_v2 = vshrl.u32 %v1961_v1, 16  ;;  %v2277_v28 = vrot.slane %v3946_v11, 5  ;;  %v3408_v50 = vld [vmem:[%s4111_s1 + $0x218] sm:$0xff]  }
  0x78   : > { %3217 = vmatprep.subr.bf16.mxu0 %v3386_v39  ;;  %3212 = vmatmul.mubr.bf16.gmra.mxu1 %v2833_v54  ;;  %v1972_v7 = vor.u32 %v1971_v63, %v1968_v37  ;;  %v1987_v25 = vrot.slane %v1986_v20, 4  ;;  %v2006_v54 = vsel %vm3596_vm8, %v2001_v59, %v2005_v38  ;;  %v1963_v37 = vld [vmem:[#allocation2 + $0x48] sm:$0xf]  ;;  %v3962_v63 = vld [vmem:[#allocation2 + $0x4c] sm:$0x1]  ;;  %v2261_v59 = vrot.slane %v3910_v53, 5 }
  0x79   : > { %3244 = vmatpush3.bf16.msra.mxu1 %v3389_v43  ;;  %v3396_v43 = vld [vmem:[%s4111_s1 + $0x188] sm:$0xff]   ;;  %v2015_v40 = vrot.slane %v2014_v41, 4  ;;  %v2067_v12 = vshll.u32 %v1963_v37, 16  ;;  %v2073_v13 = vshll.u32 %v3962_v63, 16  ;;  %v2052_v20 = vrot.slane %v2050_v2, 4 }
  0x7a   : > { %3245 = vmatprep.subr.bf16.mxu1 %v3391_v32  ;;  %v1973_v9 = vrot.slane %v1972_v7, 4  ;;  %v2064_v7 = vshrl.u32 %v1963_v37, 16  ;;  %v2257_v41 = vrot.slane %v3908_v51, 5  ;;  %v2233_v2 = vld [vmem:[#allocation2 + $0x20] sm:$0xe] }
  0x7b   : > { %3218 = vmatpush3.bf16.msra.mxu0 %v3386_v39  ;;  %v1992_v39 = vsel %vm3596_vm8, %v1987_v25, %v1991_v3  ;;  %v3403_v3 = vld [vmem:[%s4111_s1 + $0x230] sm:$0xff]   ;;  %v2056_v25 = vor.u32 %v2055_v15, %v2052_v20  ;;  %v2075_v29 = vrot.slane %v2073_v13, 5 }
  0x7c   : > { %3219 = vmatprep.subr.bf16.mxu0 %v3388_v44  ;;  %v1978_v33 = vsel %vm3596_vm8, %v1973_v9, %v1977_v0  ;;  %v2069_v9 = vrot.slane %v2067_v12, 5 }
  0x7d   : > { %3246 = vmatpush3.bf16.msra.mxu1 %v3391_v32  ;;  %v2886_v10 = vcombine.low %v1978_v33, %v1992_v39  ;;  %v2031_v32 = vshll.u32 %v3942_v45, 16  ;;  %v2231_v39 = vld [vmem:[#allocation2 + $0x10] sm:$0xe] }
  0x7e   : > { %3188 = vmatmul.mubr.bf16.gmra.mxu0 %v2797_v46  ;;  %3247 = vmatprep.subr.bf16.mxu1 %v3393_v48  ;;  %v3952_v46 = vld [vmem:[%s4111_s1 + $0x238] sm:$0xff]  }
  0x7f   : > { %3220 = vmatpush3.bf16.msra.mxu0 %v3388_v44  ;;  %3231 = vmatprep.mubr.bf16.mxu0 %v3400_v49  ;;  %v2036_v44 = vshrl.u32 %v1959_v27, 16  ;;  %v2039_v49 = vshll.u32 %v1959_v27, 16  ;;  %v2033_v55 = vrot.slane %v2031_v32, 5 }
  0x80   : > { %3221 = vmatprep.subr.bf16.mxu0 %v3390_v47  ;;  %3255 = vmatprep.mubr.bf16.mxu1 %v2886_v10  ;;  %v2898_v10 = vrot.slane %v2231_v39, 9 }
  0x81   : > { %3248 = vmatpush3.bf16.msra.mxu1 %v3393_v48  ;;  %v2024_v48 = vrot.slane %v2022_v60, 4  ;;  %v2038_v57 = vrot.slane %v2036_v44, 4  ;;  %v2041_v62 = vrot.slane %v2039_v49, 5  ;;  %v2235_v60 = vld [vmem:[#allocation2 + $0x30] sm:$0xe]  ;;  %v3407_v44 = vld [vmem:[%s4111_s1 + $0x220] sm:$0xff]  }
  0x82   : > { %3249 = vmatprep.subr.bf16.mxu1 %v3395_v61  ;;  %v2902_v32 = vrot.slane %v2235_v60, 9 }
  0x83   : > { %3222 = vmatpush3.bf16.msra.mxu0 %v3390_v47  ;;  %v2020_v47 = vsel %vm3596_vm8, %v2015_v40, %v2019_v42  ;;  %v2028_v0 = vor.u32 %v2027_v16, %v2024_v48  ;;  %v2042_v6 = vor.u32 %v2041_v62, %v2038_v57  ;;  %v3405_v48 = vld [vmem:[#allocation2 + $0x40] ss:$8 sps:$4 sm:$0xff]   ;;  %v2285_v62 = vrot.slane %v3962_v63, 5 }
  0x84   : > { %3223 = vmatprep.subr.bf16.mxu0 %v3392_v58  ;;  %v2274_v5 = vsel %vm3691_vm11, %v2902_v32, %v2273_v30  ;;  %v3410_v16 = vld [vmem:[%s4111_s1 + $0x208] sm:$0xff]   ;;  %v2900_v63 = vrot.slane %v2233_v2, 9 }
  0x85   : > { %3250 = vmatpush3.bf16.msra.mxu1 %v3395_v61  ;;  %v2887_v61 = vcombine.low %v2006_v54, %v2020_v47  ;;  %v2043_v19 = vrot.slane %v2042_v6, 4  ;;  %v2236_v54 = vld [vmem:[#allocation2 + $0x38] sm:$0xe]  ;;  %v2258_v47 = vsel %vm3691_vm11, %v2898_v10, %v2257_v41  ;;  %v2238_v57 = vld [vmem:[#allocation2 + $0x48] sm:$0xe]  ;;  %v2901_v6 = vrot.slane %v2234_v56, 9 }
  0x86   : > { %3251 = vmatprep.subr.bf16.mxu1 %v3397_v52  ;;  %v2903_v53 = vrot.slane %v2236_v54, 9  ;;  %v2905_v37 = vrot.slane %v2238_v57, 9 }
  0x87   : > { %3224 = vmatpush3.bf16.msra.mxu0 %v3392_v58  ;;  %v3960_v58 = vld [vmem:[#allocation2 + $0x44] sm:$0x1]  ;;  %v2048_v33 = vsel %vm3596_vm8, %v2043_v19, %v2047_v34 }
  0x88   : > { %3225 = vmatprep.subr.bf16.mxu0 %v3394_v21  ;;  %v2059_v31 = vshll.u32 %v3960_v58, 16 }
  0x89   : > { %3252 = vmatpush3.bf16.msra.mxu1 %v3397_v52  ;;  %v2029_v52 = vrot.slane %v2028_v0, 4  ;;  %v3411_v0 = vld [vmem:[%s4111_s1 + $0x200] sm:$0xff]  }
  0x8a   : > { %3253 = vmatprep.subr.bf16.mxu1 %v3399_v35  ;;  %v2061_v26 = vrot.slane %v2059_v31, 5 }
  0x8b   : > { %3226 = vmatpush3.bf16.msra.mxu0 %v3394_v21  ;;  %v2066_v21 = vrot.slane %v2064_v7, 4  ;;  %v2034_v23 = vsel %vm3596_vm8, %v2029_v52, %v2033_v55  ;;  %v2237_v55 = vld [vmem:[#allocation2 + $0x40] sm:$0xe]  ;;  %v2269_v7 = vrot.slane %v3922_v8, 5 }
  0x8c   : > { %3227 = vmatprep.subr.bf16.mxu0 %v3396_v43  ;;  %v2888_v38 = vcombine.low %v2034_v23, %v2048_v33  ;;  %v2904_v34 = vrot.slane %v2237_v55, 9 }
  0x8d   : > { %3254 = vmatpush3.bf16.msra.mxu1 %v3399_v35  ;;  %v2070_v36 = vor.u32 %v2069_v9, %v2066_v21  ;;  %v2057_v35 = vrot.slane %v2056_v25, 4 }
  0x8e   : > { %3287 = vmatprep.subr.bf16.mxu1 %v3952_v46 }
  0x8f   : > { %3228 = vmatpush3.bf16.msra.mxu0 %v3396_v43  ;;  %v2071_v42 = vrot.slane %v2070_v36, 4  ;;  %v2232_v43 = vld [vmem:[#allocation2 + $0x18] sm:$0xe]  ;;  %v2062_v40 = vsel %vm3596_vm8, %v2057_v35, %v2061_v26 }
  0x90   : > { %3229 = vmatprep.subr.bf16.mxu0 %v3398_v24  ;;  %3256 = vmatmul.mubr.bf16.vlgmr.msra.gmra.mxu1 %v2887_v61  ;;  %v2899_v27 = vrot.slane %v2232_v43, 9  ;;  %v2281_v61 = vrot.slane %v3960_v58, 5  ;;  %v2286_v58 = vsel %vm3691_vm11, %v2905_v37, %v2285_v62 }
  0x91   : > { %3295 = vmatpush3.bf16.msra.mxu1 %v3952_v46  ;;  %v2076_v51 = vsel %vm3596_vm8, %v2071_v42, %v2075_v29  ;;  %3259 = vmatprep.mubr.bf16.mxu1 %v2888_v38 }
  0x92   : > { %3288 = vmatprep.subr.bf16.mxu1 %v3403_v3  ;;  %v2889_v45 = vcombine.low %v2062_v40, %v2076_v51  ;;  %v2262_v11 = vsel %vm3691_vm11, %v2899_v27, %v2261_v59  ;;  %v2282_v31 = vsel %vm3691_vm11, %v2904_v34, %v2281_v61 }
  0x93   : > { %3230 = vmatpush3.bf16.msra.mxu0 %v3398_v24  ;;  %v2922_v1 = vcombine.low %v2258_v47, %v2262_v11  ;;  %v3409_v24 = vld [vmem:[%s4111_s1 + $0x210] sm:$0xff]   ;;  %v2925_v12 = vcombine.low %v2282_v31, %v2286_v58 }
  0x94   : > { %3263 = vmatprep.subr.bf16.mxu0 %v3952_v46 }
  0x95   : > { %3296 = vmatpush3.bf16.msra.mxu1 %v3403_v3 }
  0x96   : > { %3232 = vmatmul.mubr.bf16.vlgmr.msra.gmra.mxu0 %v3401_v14  ;;  %3289 = vmatprep.subr.bf16.mxu1 %v3406_v22  ;;  %v2270_v14 = vsel %vm3691_vm11, %v2901_v6, %v2269_v7 }
  0x97   : > { %3264 = vmatpush3.bf16.msra.mxu0 %v3952_v46  ;;  %3235 = vmatprep.mubr.bf16.mxu0 %v3404_v17  ;;  %v2278_v46 = vsel %vm3691_vm11, %v2903_v53, %v2277_v28 }
  0x98   : > { %3265 = vmatprep.subr.bf16.mxu0 %v3403_v3  ;;  %v2924_v49 = vcombine.low %v2274_v5, %v2278_v46  ;;  %3260 = vmatmul.mubr.bf16.gmra.mxu1 %v2889_v45 }
  0x99   : > { %3297 = vmatpush3.bf16.msra.mxu1 %v3406_v22 }
  0x9a   : > { %3290 = vmatprep.subr.bf16.mxu1 %v3407_v44  ;;  %3283 = vmatprep.mubr.bf16.mxu1 %v2924_v49 }
  0x9b   : > { %3266 = vmatpush3.bf16.msra.mxu0 %v3403_v3  ;;  %v2265_v3 = vrot.slane %v3920_v4, 5 }
  0x9c   : > { %3267 = vmatprep.subr.bf16.mxu0 %v3406_v22 }
  0x9d   : > { %3298 = vmatpush3.bf16.msra.mxu1 %v3407_v44  ;;  %v2266_v13 = vsel %vm3691_vm11, %v2900_v63, %v2265_v3 }
  0x9e   : > { %3236 = vmatmul.mubr.bf16.gmra.mxu0 %v3405_v48  ;;  %3291 = vmatprep.subr.bf16.mxu1 %v3408_v50  ;;  %v2923_v52 = vcombine.low %v2266_v13, %v2270_v14 }
  0x9f   : > { %3268 = vmatpush3.bf16.msra.mxu0 %v3406_v22  ;;  %3279 = vmatprep.mubr.bf16.mxu0 %v2922_v1 }
  0xa0   : > { %3269 = vmatprep.subr.bf16.mxu0 %v3407_v44 }
  0xa1   : > { %3299 = vmatpush3.bf16.msra.mxu1 %v3408_v50 }
  0xa2   : > { %3292 = vmatprep.subr.bf16.mxu1 %v3409_v24 }
  0xa3   : > { %3270 = vmatpush3.bf16.msra.mxu0 %v3407_v44 }
  0xa4   : > { %3271 = vmatprep.subr.bf16.mxu0 %v3408_v50 }
  0xa5   : > { %3300 = vmatpush3.bf16.msra.mxu1 %v3409_v24 }
  0xa6   : > { %3293 = vmatprep.subr.bf16.mxu1 %v3410_v16 }
  0xa7   : > { %3272 = vmatpush3.bf16.msra.mxu0 %v3408_v50 }
  0xa8   : > { %3273 = vmatprep.subr.bf16.mxu0 %v3409_v24 }
  0xa9   : > { %3301 = vmatpush3.bf16.msra.mxu1 %v3410_v16 }
  0xaa   : > { %3294 = vmatprep.subr.bf16.mxu1 %v3411_v0 }
  0xab   : > { %3274 = vmatpush3.bf16.msra.mxu0 %v3409_v24 }
  0xac   : > { %3275 = vmatprep.subr.bf16.mxu0 %v3410_v16 }
  0xad   : > { %3302 = vmatpush3.bf16.msra.mxu1 %v3411_v0 }
  0xaf   : > { %3276 = vmatpush3.bf16.msra.mxu0 %v3410_v16 }
  0xb0   : > { %3277 = vmatprep.subr.bf16.mxu0 %v3411_v0  ;;  %3284 = vmatmul.mubr.bf16.vlgmr.msra.gmra.mxu1 %v2925_v12 }
  0xb3   : > { %3278 = vmatpush3.bf16.msra.mxu0 %v3411_v0 }
  0xb6   : > { %3280 = vmatmul.mubr.bf16.vlgmr.msra.gmra.mxu0 %v2923_v52 }
  0xee   : > { %v3113_v20 = vpop.f32.mrf.mxu1 }
  0xf0   : > { %v4023_v15 = vpop.f32.mrf.mxu1 }
  0xf2   : > { %v4027_v17 = vpop.f32.mrf.mxu1 }
  0xf4   : > { %v4031_v21 = vpop.f32.mrf.mxu1 }
  0xf6   : > { %v3089_v4 = vpop.f32.mrf.mxu0 }
  0xf7   : > { %v881_v13 = vadd.f32 %v3113_v20, %v3089_v4 }
  0xf8   : > { %v4025_v8 = vpop.f32.mrf.mxu0 }
  0xfa   : > { %v4029_v19 = vpop.f32.mrf.mxu0 }
  0xfc   : > { %v4033_v18 = vpop.f32.mrf.mxu0 }
  0xfd   : > { %v876_v4 = vadd.f32 %v4031_v21, %v4033_v18 }
 0x101   : > { %v3117_v9 = vpop.f32.mrf.mxu1 }
 0x103   : > { %v888_v23 = vpop.f32.mrf.mxu1 }
 0x105   : > { %v3118_v26 = vpop.f32.mrf.mxu1 }
 0x107   : > { %v891_v33 = vpop.f32.mrf.mxu1 }
 0x109   : > { %v3093_v22 = vpop.f32.mrf.mxu0 }
 0x10a   : > { %v897_v31 = vadd.f32 %v3117_v9, %v3093_v22 }
 0x10b   : > { %v751_v25 = vpop.f32.mrf.mxu0 }
 0x10c   : > { %v889_v3 = vadd.f32 %v888_v23, %v751_v25 }
 0x10d   : > { %v3094_v29 = vpop.f32.mrf.mxu0 }
 0x10e   : > { %v4035_v36 = vpop.f32.mrf.mxu1  ;;  %v900_v7 = vadd.f32 %v3118_v26, %v3094_v29 }
 0x10f   : > { %v754_v38 = vpop.f32.mrf.mxu0 }
 0x110   : > { %v4037_v39 = vpop.f32.mrf.mxu1 }
 0x112   : > { %v4039_v42 = vpop.f32.mrf.mxu1 }
 0x114   : > { %v4041_v10 = vpop.f32.mrf.mxu1 }
 0x116   : > { %v3137_v35 = vpop.f32.mrf.mxu0  ;;  %v3165_v30 = vpop.f32.mrf.mxu1 }
 0x118   : > { %v1077_v41 = vpop.f32.mrf.mxu0  ;;  %v1263_v27 = vpop.f32.mrf.mxu1 }
 0x11a   : > { %v3138_v43 = vpop.f32.mrf.mxu0  ;;  %v3166_v54 = vpop.f32.mrf.mxu1 }
 0x11c   : > { %v1080_v59 = vpop.f32.mrf.mxu0  ;;  %v1266_v51 = vpop.f32.mrf.mxu1 }
 0x11e   : > { %v3141_v40 = vpop.f32.mrf.mxu0 }
 0x11f   : > { %v1114_v6 = vadd.f32 %v3141_v40, %v897_v31  ;;  %v1109_v40 = vadd.f32 %v1080_v59, %v876_v4 }
 0x120   : > { %v1093_v60 = vpop.f32.mrf.mxu0 }
 0x121   : > { %v1112_v12 = vadd.f32 %v1093_v60, %v889_v3  ;;  %v1279_v18 = vadd.f32 %v4041_v10, %v1109_v40 }
 0x122   : > { %v3142_v28 = vpop.f32.mrf.mxu0 }
 0x124   : > { %v1096_v53 = vpop.f32.mrf.mxu0 }
 0x12f   : > { %v4043_v32 = vpop.f32.mrf.mxu1 }
 0x131   : > { %v4045_v44 = vpop.f32.mrf.mxu1 }
 0x133   : > { %v4047_v11 = vpop.f32.mrf.mxu1 }
 0x134   : > { %4124 = vst [vmem:[#allocation3_spill] sm:$0xff] %v4047_v11  ;;  %v1110_v11 = vadd.f32 %v3137_v35, %v881_v13 }
 0x135   : > { %v4049_v46 = vpop.f32.mrf.mxu1 }
 0x136   : > { %v3185_v45 = vpop.f32.mrf.mxu0  ;;  %4125 = vst [vmem:[#allocation4_spill] sm:$0xff] %v4049_v46  ;;  %v1284_v46 = vadd.f32 %v3165_v30, %v1114_v6 }
 0x138   : > { %v1529_v47 = vpop.f32.mrf.mxu0  ;;  %v3213_v49 = vpop.f32.mrf.mxu1 }
 0x13a   : > { %v3186_v5 = vpop.f32.mrf.mxu0  ;;  %v1755_v1 = vpop.f32.mrf.mxu1 }
 0x13c   : > { %v4051_v48 = vpop.f32.mrf.mxu0  ;;  %v3214_v16 = vpop.f32.mrf.mxu1 }
 0x13e   : > { %v3189_v50 = vpop.f32.mrf.mxu0  ;;  %v1758_v57 = vpop.f32.mrf.mxu1 }
 0x13f   : > { %v1566_v22 = vadd.f32 %v3189_v50, %v1284_v46  ;;  %v1561_v50 = vadd.f32 %v4051_v48, %v1279_v18 }
 0x140   : > { %v1545_v24 = vpop.f32.mrf.mxu0 }
 0x142   : > { %v3190_v55 = vpop.f32.mrf.mxu0 }
 0x144   : > { %v1548_v62 = vpop.f32.mrf.mxu0 }
 0x150   : > { %v4053_v61 = vpop.f32.mrf.mxu1 }
 0x151   : > { %4126 = vst [vmem:[#allocation5_spill] sm:$0xff] %v4053_v61  ;;  %v892_v61 = vadd.f32 %v891_v33, %v754_v38  ;;  %v1280_v33 = vadd.f32 %v4035_v36, %v1110_v11 }
 0x152   : > { %v4055_v37 = vpop.f32.mrf.mxu1 }
 0x153   : > { %4127 = vst [vmem:[#allocation6_spill] sm:$0xff] %v4055_v37  ;;  %v1115_v37 = vadd.f32 %v3142_v28, %v900_v7  ;;  %v1113_v9 = vadd.f32 %v1096_v53, %v892_v61 }
 0x154   : > { %v4059_v56 = vpop.f32.mrf.mxu1 }
 0x155   : > { %4129 = vst [vmem:[#allocation8_spill] sm:$0xff] %v4059_v56  ;;  %v1282_v56 = vadd.f32 %v1263_v27, %v1112_v12  ;;  %v1285_v29 = vadd.f32 %v3166_v54, %v1115_v37  ;;  %v1283_v30 = vadd.f32 %v1266_v51, %v1113_v9  ;;  %v1562_v27 = vadd.f32 %v3185_v45, %v1280_v33  ;;  %v4132_v37 = vld [vmem:[#allocation4_spill] sm:$0xff] }
 0x156   : > { %v3233_v34 = vpop.f32.mrf.mxu0  ;;  %v4063_v63 = vpop.f32.mrf.mxu1 }
 0x157   : > { %4130 = vst [vmem:[#allocation9_spill] sm:$0xff] %v4063_v63  ;;  %v884_v63 = vadd.f32 %v4027_v17, %v4029_v19  ;;  %v1564_v20 = vadd.f32 %v1545_v24, %v1282_v56  ;;  %v1772_v36 = vadd.f32 %v4043_v32, %v1562_v27  ;;  %v2934_v32 = vld [vmem:[%s4112_s2] ss:$0 sm:$0xff] }
 0x158   : > { %v1910_v0 = vpop.f32.mrf.mxu0  ;;  %v3261_v52 = vpop.f32.mrf.mxu1 }
 0x159   : > { %v1111_v38 = vadd.f32 %v3138_v43, %v884_v63  ;;  %v1774_v19 = vadd.f32 %v1755_v1, %v1564_v20  ;;  %v1943_v1 = vadd.f32 %v3233_v34, %v1772_v36 }
 0x15a   : > { %v4057_v2 = vpop.f32.mrf.mxu0  ;;  %v2208_v26 = vpop.f32.mrf.mxu1  ;;  %v4135_v12 = vld [vmem:[#allocation6_spill] sm:$0xff] }
 0x15b   : > { %4128 = vst [vmem:[#allocation7_spill] sm:$0xff] %v4057_v2  ;;  %v873_v2 = vadd.f32 %v4023_v15, %v4025_v8  ;;  %v1776_v15 = vadd.f32 %v3213_v49, %v1566_v22  ;;  %v1567_v8 = vadd.f32 %v3190_v55, %v1285_v29  ;;  %v1281_v54 = vadd.f32 %v4039_v42, %v1111_v38  ;;  %v4131_v55 = vld [vmem:[#allocation3_spill] sm:$0xff] }
 0x15c   : > { %v4061_v58 = vpop.f32.mrf.mxu0  ;;  %v3262_v17 = vpop.f32.mrf.mxu1  ;;  %v4136_v29 = vld [vmem:[#allocation8_spill] sm:$0xff] }
 0x15d   : > { %v1108_v23 = vadd.f32 %v1077_v41, %v873_v2  ;;  %v1565_v41 = vadd.f32 %v1548_v62, %v1283_v30  ;;  %v1777_v46 = vadd.f32 %v3214_v16, %v1567_v8  ;;  %v1563_v43 = vadd.f32 %v3186_v5, %v1281_v54 }
 0x15e   : > { %v3237_v14 = vpop.f32.mrf.mxu0  ;;  %v2211_v11 = vpop.f32.mrf.mxu1  ;;  %v1771_v2 = vadd.f32 %v4132_v37, %v1561_v50  ;;  %v4137_v8 = vld [vmem:[#allocation9_spill] sm:$0xff] }
 0x15f   : > { %v1278_v35 = vadd.f32 %v4037_v39, %v1108_v23  ;;  %v1947_v28 = vadd.f32 %v3237_v14, %v1776_v15  ;;  %v1775_v39 = vadd.f32 %v1758_v57, %v1565_v41  ;;  %v1773_v61 = vadd.f32 %v4131_v55, %v1563_v43 }
 0x160   : > { %v1926_v25 = vpop.f32.mrf.mxu0  ;;  %v1942_v13 = vadd.f32 %v4061_v58, %v1771_v2 }
 0x161   : > { %v1560_v53 = vadd.f32 %v1529_v47, %v1278_v35  ;;  %v1945_v21 = vadd.f32 %v1926_v25, %v1774_v19  ;;  %v2229_v59 = vadd.f32 %v3261_v52, %v1947_v28  ;;  %v2935_v52 = vld [vmem:[%s4113_s3] ss:$0 sm:$0xff] }
 0x162   : > { %v3238_v60 = vpop.f32.mrf.mxu0  ;;  %v4134_v48 = vld [vmem:[#allocation7_spill] sm:$0xff]  ;;  %v2224_v58 = vadd.f32 %v4137_v8, %v1942_v13 }
 0x163   : > { %v1948_v45 = vadd.f32 %v3238_v60, %v1777_v46  ;;  %v1770_v49 = vadd.f32 %v4045_v44, %v1560_v53  ;;  %v2227_v42 = vadd.f32 %v2208_v26, %v1945_v21  ;;  %v4133_v44 = vld [vmem:[#allocation5_spill] sm:$0xff]  ;;  %v1944_v34 = vadd.f32 %v4134_v48, %v1773_v61 }
 0x164   : > { %v1929_v51 = vpop.f32.mrf.mxu0  ;;  %v2225_v56 = vadd.f32 %v4133_v44, %v1943_v1 }
 0x165   : > { %v1946_v47 = vadd.f32 %v1929_v51, %v1775_v39  ;;  %v1941_v10 = vadd.f32 %v1910_v0, %v1770_v49  ;;  %v2230_v57 = vadd.f32 %v3262_v17, %v1948_v45  ;;  %v2226_v20 = vadd.f32 %v4136_v29, %v1944_v34 }
 0x167   : > { %v2228_v63 = vadd.f32 %v2211_v11, %v1946_v47  ;;  %v2223_v0 = vadd.f32 %v4135_v12, %v1941_v10 }
 0x170   : > { %v3285_v24 = vpop.f32.mrf.mxu1 }
 0x171   : > { %v2439_v16 = vadd.f32 %v3285_v24, %v2229_v59 }
 0x172   : > { %v2418_v5 = vpop.f32.mrf.mxu1 }
 0x173   : > { %v2437_v62 = vadd.f32 %v2418_v5, %v2227_v42  ;;  %v2454_v6 = vmul.f32 %v2934_v32, %v2439_v16 }
 0x174   : > { %v3286_v31 = vpop.f32.mrf.mxu1 }
 0x175   : > { %v2440_v7 = vadd.f32 %v3286_v31, %v2230_v57  ;;  %v2452_v23 = vmul.f32 %v2934_v32, %v2437_v62  ;;  %v2469_v33 = vadd.f32 %v2935_v52, %v2454_v6 }
 0x176   : > { %v3281_v3 = vpop.f32.mrf.mxu0  ;;  %v2421_v9 = vpop.f32.mrf.mxu1 }
 0x177   : > { %v2435_v14 = vadd.f32 %v3281_v3, %v2225_v56  ;;  %v2455_v25 = vmul.f32 %v2934_v32, %v2440_v7  ;;  %v2438_v26 = vadd.f32 %v2421_v9, %v2228_v63  ;;  %v2467_v27 = vadd.f32 %v2935_v52, %v2452_v23 }
 0x178   : > { %v2402_v22 = vpop.f32.mrf.mxu0 }
 0x179   : > { %v2433_v4 = vadd.f32 %v2402_v22, %v2223_v0  ;;  %v2470_v30 = vadd.f32 %v2935_v52, %v2455_v25  ;;  %v2453_v15 = vmul.f32 %v2934_v32, %v2438_v26  ;;  %v2450_v35 = vmul.f32 %v2934_v32, %v2435_v14 }
 0x17a   : > { %v3282_v38 = vpop.f32.mrf.mxu0 }
 0x17b   : > { %v2436_v40 = vadd.f32 %v3282_v38, %v2226_v20  ;;  %v2958_v60 = vpack.c.bf16 %v2470_v30, %v2469_v33  ;;  %v2468_v19 = vadd.f32 %v2935_v52, %v2453_v15  ;;  %v2448_v41 = vmul.f32 %v2934_v32, %v2433_v4 }
 0x17c   : > { %v2405_v17 = vpop.f32.mrf.mxu0  ;;  %v2465_v46 = vadd.f32 %v2935_v52, %v2450_v35 }
 0x17d   : > { %v2451_v28 = vmul.f32 %v2934_v32, %v2436_v40  ;;  %v2434_v54 = vadd.f32 %v2405_v17, %v2224_v58  ;;  %2962 = vst [vmem:[%s301_s24 + $0x18] sm:$0xff] %v2958_v60   ;;  %v2953_v53 = vpack.c.bf16 %v2468_v19, %v2467_v27  ;;  %v2463_v36 = vadd.f32 %v2935_v52, %v2448_v41 }
 0x17f   : > { %v2466_v21 = vadd.f32 %v2935_v52, %v2451_v28  ;;  %v2449_v18 = vmul.f32 %v2934_v32, %v2434_v54  ;;  %2961 = vst [vmem:[%s301_s24 + $0x10] sm:$0xff] %v2953_v53  }
 0x181   : > { %v2948_v43 = vpack.c.bf16 %v2466_v21, %v2465_v46  ;;  %v2464_v51 = vadd.f32 %v2935_v52, %v2449_v18 }
 0x183   : > { %2960 = vst [vmem:[%s301_s24 + $0x8] sm:$0xff] %v2948_v43   ;;  %v2943_v11 = vpack.c.bf16 %v2464_v51, %v2463_v36  ;;  %v2487_v39 = vadd.f32 %v2464_v51, %v2463_v36 }
 0x185   : > { %2944 = vst [vmem:[%s301_s24] sm:$0xff] %v2943_v11   ;;  %v2488_v59 = vadd.f32 %v2487_v39, %v2465_v46 }
 0x187   : > { %v2489_v45 = vadd.f32 %v2488_v59, %v2466_v21 }
 0x189   : > { %v2490_v49 = vadd.f32 %v2489_v45, %v2467_v27 }
 0x18b   : > { %v2491_v50 = vadd.f32 %v2490_v49, %v2468_v19 }
 0x18d   : > { %v2492_v1 = vadd.f32 %v2491_v50, %v2469_v33 }
 0x18f   : > { %v2493_v24 = vadd.f32 %v2492_v1, %v2470_v30 }
 0x191   : > { %v2494_v42 = vrot.slane %v2493_v24, 4 }
 0x193   : > { %v2495_v47 = vadd.f32 %v2494_v42, %v2493_v24 }
 0x195   : > { %v2496_v16 = vrot.slane %v2495_v47, 2 }
 0x197   : > { %v2497_v55 = vadd.f32 %v2496_v16, %v2495_v47 }
 0x199   : > { %v2498_v61 = vrot.slane %v2497_v55, 1 }
 0x19b   : > { %v2499_v10 = vadd.f32 %v2498_v61, %v2497_v55 }
 0x19d   : > { %v2501_v32 = vmul.f32 0.015625, %v2499_v10 }
 0x19f   : > { %2502 = vst [vmem:[%s308_s15] sm:$0xff] %v2501_v32 }
 0x1a0 PF: > { %s16_s20 = sadd.s32 1, %s3434_s20   ;;  %s4138_s18 = smov %s3430_s19 }
 0x1a1   : > { %p13_p5 = scmp.ge.s32.totalorder %s16_s20, 4   ;;  %s4139_s19 = smov %s4141_s21 }
 0x1a3   :  { %15 = sbr.rel (!%p13_p5) target bundleno = 2 (0x2), region = 97 }

</bundles_post_ra>
